<compile_context>
chip_gen: v6e
topology: v6e:2x2x1
jax: 0.10.0
libtpu: 0.0.40
codegen_flags: <defaults>
</compile_context>

<pallas_src>
import jax
import jax.numpy as jnp
from jax import lax
from jax.experimental import pallas as pl
from jax.experimental.pallas import tpu as pltpu


# ----------------------------------------------------------------------------- helpers (verbatim semantics)
def accum_log(log, new_logs):
    for key, new_value in new_logs.items():
        old_value = log.get(key, 0.0)
        log[key] = old_value + new_value
    return log


def exists(val):
    return val is not None


def default(val, d):
    return val if exists(val) else d


H_PAD = 128   # hidden width padded to one full lane dimension
C_PAD = 128   # packed head channels padded to one full lane dimension


# ----------------------------------------------------------------------------- fused Pallas kernel
def _fused_forward_loss_kernel(x_ref, w1_ref, b1_ref, w2_ref, b2_ref,
                               target_ref, lw_ref, cw_ref,
                               loss_ref, corr_ref):
    """Fused model forward + poisson NLL + pearson partials (lane dense).

    x      : (tile_m*T, K)   un-pooled one-hot, K = downsample*4 (pool folded in w1)
    w1/b1  : (K, 128) / (1, 128)      zero-padded to 128 lanes
    w2/b2  : (128, 128) / (1, 128)    all branch heads packed + zero-padded
    target : (tile_m, T, 128)         zero-padded outside the branch's channels
    lw/cw  : (tile_m, 128)            per-row poisson / pearson weights (mask/norm)
    loss   : (tile_m, 128)            lane-broadcast per-row poisson partial
    corr   : (tile_m, 128)            lane-broadcast per-row pearson partial
    """
    tm, t, c = target_ref.shape

    # ---- MLP on the MXU: (tm*T, K)@(K,128) -> relu -> (tm*T,128)@(128,128) ----
    h = jnp.dot(x_ref[...], w1_ref[...],
                preferred_element_type=jnp.float32) + b1_ref[...]
    h = jnp.maximum(h, 0.0)
    y = jnp.dot(h, w2_ref[...],
                preferred_element_type=jnp.float32) + b2_ref[...]
    pred = jnp.maximum(y, 0.0) + jnp.log1p(jnp.exp(-jnp.abs(y)))   # stable softplus
    pred = pred.reshape(tm, t, c)

    tgt = target_ref[...]
    lw = lw_ref[...][:, None, :]          # (tm, 1, c)
    cw = cw_ref[...]                      # (tm, c)

    # ---- poisson NLL (torch F.poisson_nll_loss, log_input=False, eps=1e-8) ----
    elem = (pred - tgt * jnp.log(pred + 1e-8)) * lw
    lsum = jnp.sum(jnp.sum(elem, axis=2), axis=1)[:, None]          # (tm, 1)

    # ---- pearson over the bin axis (T), moment form (no live centered tensors) ----
    inv_t = 1.0 / t
    ps = jnp.sum(pred, axis=1)            # (tm, c)
    ts = jnp.sum(tgt, axis=1)
    spt = jnp.sum(pred * tgt, axis=1)
    spp = jnp.sum(pred * pred, axis=1)
    stt = jnp.sum(tgt * tgt, axis=1)
    num = spt - ps * ts * inv_t
    pvar = spp - ps * ps * inv_t
    tvar = stt - ts * ts * inv_t
    den = jnp.maximum(pvar * tvar, 0.0)   # guard f32 cancellation before rsqrt
    r = num * lax.rsqrt(den + 1e-8)       # EUP rsqrt
    csum = jnp.sum(r * cw, axis=1)[:, None]                         # (tm, 1)

    # lane-dense stores: full vreg rows, no masked vst
    loss_ref[...] = jnp.broadcast_to(lsum, loss_ref.shape)
    corr_ref[...] = jnp.broadcast_to(csum, corr_ref.shape)


def fused_forward_losses(x, w1, b1, w2, b2, target, lw, cw, *, tile_m):
    """One pallas_call for all stacked rows. Returns two (M, 128) partial slabs."""
    m, t, c = target.shape
    k = x.shape[1]
    assert c == C_PAD and x.shape[0] == m * t and m % tile_m == 0
    grid = (m // tile_m,)
    return pl.pallas_call(
        _fused_forward_loss_kernel,
        out_shape=(jax.ShapeDtypeStruct((m, 128), jnp.float32),
                   jax.ShapeDtypeStruct((m, 128), jnp.float32)),
        grid=grid,
        in_specs=[
            pl.BlockSpec((tile_m * t, k), lambda i: (i, 0)),
            pl.BlockSpec((k, H_PAD), lambda i: (0, 0)),
            pl.BlockSpec((1, H_PAD), lambda i: (0, 0)),
            pl.BlockSpec((H_PAD, C_PAD), lambda i: (0, 0)),
            pl.BlockSpec((1, C_PAD), lambda i: (0, 0)),
            pl.BlockSpec((tile_m, t, C_PAD), lambda i: (i, 0, 0)),
            pl.BlockSpec((tile_m, C_PAD), lambda i: (i, 0)),
            pl.BlockSpec((tile_m, C_PAD), lambda i: (i, 0)),
        ],
        out_specs=(pl.BlockSpec((tile_m, 128), lambda i: (i, 0)),
                   pl.BlockSpec((tile_m, 128), lambda i: (i, 0))),
        compiler_params=pltpu.CompilerParams(
            dimension_semantics=("parallel",)),   # v7x: shard tiles across both TCs
    )(x, w1, b1, w2, b2, target, lw, cw)


def _pick_tile_m(rows, target_len):
    """grid=1 on single-TC chips (v5e/v6e); 2 parallel tiles on v7x (2 TC/chip)."""
    kind = ""
    try:
        kind = jax.devices()[0].device_kind.lower()
    except Exception:
        pass
    half = rows // 2
    if ('v7' in kind and rows % 2 == 0
            and half % 8 == 0 and (half * target_len) % 8 == 0):
        return half
    return rows


# ----------------------------------------------------------------------------- trainer
class BigWigTrainerPallas:
    """Synthetic re-implementation of BigWigTrainer.forward().

    Data loaders are replaced with deterministic PRNG-generated batches; the
    conditioned model (protein/text embedders) is replaced by a small
    relu-MLP + softplus head whose matmuls run on the MXU via a single fused
    Pallas kernel that also computes the poisson / pearson reductions.
    """

    def __init__(self, *, batch_size=2, context_length=64, downsample_factor=8,
                 hidden=32, n_head_tracks=8, grad_accum_every=2,
                 validate_every=250, seed=0):
        assert context_length % downsample_factor == 0
        self.B = batch_size
        self.L = context_length
        self.down = downsample_factor
        self.T = context_length // downsample_factor     # target_length
        self.F = 4                                        # one-hot DNA channels
        self.K = self.down * self.F                       # folded contraction depth
        self.H = hidden
        self.C_head = n_head_tracks
        self.C_tot = 1 + n_head_tracks                    # ctx head (1) + track head
        assert self.H <= H_PAD and self.C_tot <= C_PAD
        self.grad_accum_every = grad_accum_every
        self.validate_every = validate_every
        self.steps = 0

        key = jax.random.PRNGKey(seed)
        k1, k2, k3, kd = jax.random.split(key, 4)
        w1 = jax.random.normal(k1, (self.F, self.H), jnp.float32) * 0.1
        w2_ctx = jax.random.normal(k3, (self.H, 1), jnp.float32) * 0.1
        w2_head = jax.random.normal(k2, (self.H, self.C_head), jnp.float32) * 0.1
        self.data_key = kd

        # ---- lane-padded + downsample-folded weights ----
        # pooled @ w1 == onehot.reshape(., down*4) @ tile(w1/down, (down,1))
        w1_pad = jnp.zeros((self.F, H_PAD), jnp.float32).at[:, :self.H].set(w1)
        self.w1_fold = jnp.tile(w1_pad / float(self.down), (self.down, 1))  # (K, 128)
        self.b1_pad = jnp.zeros((1, H_PAD), jnp.float32)
        w2_cat = jnp.concatenate([w2_ctx, w2_head], axis=1)                 # (H, C_tot)
        self.w2_pad = (jnp.zeros((H_PAD, C_PAD), jnp.float32)
                       .at[:self.H, :self.C_tot].set(w2_cat))
        self.b2_pad = jnp.zeros((1, C_PAD), jnp.float32)

        # branch bookkeeping (same 4 streams for train and valid)
        self.branch_is_head = (False, False, True, True)
        self.train_names = ('human_loss', 'mouse_loss',
                            'human_head_loss', 'mouse_head_loss')
        self.valid_names = ('human_valid', 'mouse_valid',
                            'human_head_valid', 'mouse_head_valid')
        self.n_branches = len(self.branch_is_head)
        self.rows = self.n_branches * self.grad_accum_every * self.B        # M

        # generation-aware tiling (train-only call and fused train+valid call)
        self.tile_m_train = _pick_tile_m(self.rows, self.T)
        self.tile_m_both = _pick_tile_m(2 * self.rows, self.T)

        # per-row channel masks + loss / corr weights with the mean
        # normalization folded in (no divides on the kernel's critical path)
        mask_ctx = jnp.zeros((C_PAD,), jnp.float32).at[0].set(1.0)
        mask_head = jnp.zeros((C_PAD,), jnp.float32).at[1:self.C_tot].set(1.0)
        tmask_rows, lw_rows, cw_rows = [], [], []
        for is_head in self.branch_is_head:
            mask = mask_head if is_head else mask_ctx
            cv = self.C_head if is_head else 1
            lwr = mask / float(self.B * self.T * cv)
            cwr = mask / float(self.B * cv)
            for _ in range(self.grad_accum_every * self.B):
                tmask_rows.append(mask)
                lw_rows.append(lwr)
                cw_rows.append(cwr)
        self.tgt_mask = jnp.stack(tmask_rows)[:, None, :]     # (M, 1, C_PAD)
        self.lw = jnp.stack(lw_rows)                          # (M, C_PAD) dense
        self.cw = jnp.stack(cw_rows)                          # (M, C_PAD) dense

        self._run_train = jax.jit(self._make_runner(with_valid=False))
        self._run_train_valid = jax.jit(self._make_runner(with_valid=True))

        # TODO(synk): BigWigDataset / dataloaders, ESM protein + free-text
        # conditioning, autograd .backward(), grad clipping, the optimizer
        # step and checkpoint saving have no Pallas equivalent; they are
        # host-side / framework machinery and are omitted.

    # ---- build the jitted per-step compute: vectorized batch synth + fused kernel ----
    def _make_runner(self, *, with_valid):
        n_br, A, B = self.n_branches, self.grad_accum_every, self.B
        L, T, K, M = self.L, self.T, self.K, self.rows
        tgt_mask, lw, cw = self.tgt_mask, self.lw, self.cw
        tile_m = self.tile_m_both if with_valid else self.tile_m_train

        def synth(key):
            # ONE randint + ONE one_hot + ONE uniform for all branch x accum x batch rows
            kseq, ktgt = jax.random.split(key)
            tokens = jax.random.randint(kseq, (M, L), 0, 4)
            seq = jax.nn.one_hot(tokens, 4, dtype=jnp.float32)            # (M, L, 4)
            x = seq.reshape(M * T, K)                                     # pool folded into w1
            tgt = jax.random.uniform(ktgt, (M, T, C_PAD),
                                     minval=0.0, maxval=5.0) * tgt_mask   # masked channels
            return x, tgt

        def reduce_rows(rows_vec):
            # per-iteration mean folded into lw/cw; accum_log mean over A grad-accum iters
            return rows_vec.reshape(n_br, A, B).sum(axis=(1, 2)) / A

        if not with_valid:
            def run(key, w1, b1, w2, b2):
                x, tgt = synth(key)
                loss_p, _ = fused_forward_losses(x, w1, b1, w2, b2, tgt, lw, cw,
                                                 tile_m=tile_m)
                return reduce_rows(loss_p[:, 0])
            return run

        def run(key_train, key_valid, w1, b1, w2, b2):
            # train + valid stacked into ONE kernel dispatch
            xt, tt = synth(key_train)
            xv, tv = synth(key_valid)
            x = jnp.concatenate([xt, xv], axis=0)
            tgt = jnp.concatenate([tt, tv], axis=0)
            lw2 = jnp.concatenate([lw, lw], axis=0)
            cw2 = jnp.concatenate([cw, cw], axis=0)
            loss_p, corr_p = fused_forward_losses(x, w1, b1, w2, b2, tgt, lw2, cw2,
                                                  tile_m=tile_m)
            train_losses = reduce_rows(loss_p[:M, 0])
            valid_losses = reduce_rows(loss_p[M:, 0])
            valid_corrs = reduce_rows(corr_p[M:, 0])
            return train_losses, valid_losses, valid_corrs
        return run

    # ---- forward: one training "step", mirrors BigWigTrainer.forward ----
    def forward(self, finetune_enformer_ln_only=True, **kwargs):
        curr_step = int(self.steps)
        key = jax.random.fold_in(self.data_key, curr_step)
        key_train = jax.random.fold_in(key, 0)
        key_valid = jax.random.fold_in(key, 1)

        do_valid = (curr_step % self.validate_every == 0)

        if do_valid:
            # training branches + validation metrics in a single fused dispatch
            train_l, valid_l, valid_c = self._run_train_valid(
                key_train, key_valid,
                self.w1_fold, self.b1_pad, self.w2_pad, self.b2_pad)
            # ---- single host sync for the whole step ----
            train_np = jax.device_get(jax.block_until_ready(train_l))
            valid_l_np = jax.device_get(valid_l)
            valid_c_np = jax.device_get(valid_c)
        else:
            train_l = self._run_train(key_train, self.w1_fold, self.b1_pad,
                                      self.w2_pad, self.b2_pad)
            train_np = jax.device_get(jax.block_until_ready(train_l))

        # TODO(synk): (loss / grad_accum / loss_divisor).backward() + optim.step() skipped.

        log = {}
        for name, v in zip(self.train_names, train_np):
            log = accum_log(log, {name: float(v)})
        if do_valid:
            for name, vl, vc in zip(self.valid_names, valid_l_np, valid_c_np):
                log = accum_log(log, {f'{name}_loss': float(vl),
                                      f'{name}_corr_coef': float(vc)})

        self.steps += 1
        return log


# ----------------------------------------------------------------------------- main
if __name__ == "__main__":
    trainer = BigWigTrainerPallas(
        batch_size=2, context_length=64, downsample_factor=8,
        hidden=32, n_head_tracks=8, grad_accum_every=2,
        validate_every=250, seed=0,
    )
    log = trainer.forward()

    expected_keys = {
        'human_loss', 'mouse_loss', 'human_head_loss', 'mouse_head_loss',
        'human_valid_loss', 'human_valid_corr_coef',
        'mouse_valid_loss', 'mouse_valid_corr_coef',
        'human_head_valid_loss', 'human_head_valid_corr_coef',
        'mouse_head_valid_loss', 'mouse_head_valid_corr_coef',
    }
    assert expected_keys.issubset(log.keys()), sorted(log.keys())
    for k, v in log.items():
        assert jnp.isfinite(jnp.float32(v)), (k, v)
        if k.endswith('corr_coef'):
            assert -1.0 - 1e-5 <= v <= 1.0 + 1e-5, (k, v)

    print("KERNEL_OK")
</pallas_src>

<mosaic_0001>
module attributes {stable_mosaic.version = 11 : i64} {
  func.func @_fused_forward_loss_kernel(%arg0: i32, %arg1: memref<256x32xf32, #tpu.memory_space<vmem>>, %arg2: memref<32x128xf32, #tpu.memory_space<vmem>>, %arg3: memref<1x128xf32, #tpu.memory_space<vmem>>, %arg4: memref<128x128xf32, #tpu.memory_space<vmem>>, %arg5: memref<1x128xf32, #tpu.memory_space<vmem>>, %arg6: memref<32x8x128xf32, #tpu.memory_space<vmem>>, %arg7: memref<32x128xf32, #tpu.memory_space<vmem>>, %arg8: memref<32x128xf32, #tpu.memory_space<vmem>>, %arg9: memref<32x128xf32, #tpu.memory_space<vmem>>, %arg10: memref<32x128xf32, #tpu.memory_space<vmem>>) attributes {dimension_semantics = [#tpu.dimension_semantics<parallel>], iteration_bounds = array<i64: 1>, scalar_prefetch = 0 : i64, scratch_operands = 0 : i64, tpu.core_type = #tpu.core_type<tc>, window_params = [{transform_indices = @transform_0, window_bounds = array<i64: 256, 32>}, {pipeline_mode = #tpu.pipeline_mode<synchronous>, transform_indices = @transform_1, window_bounds = array<i64: 32, 128>}, {pipeline_mode = #tpu.pipeline_mode<synchronous>, transform_indices = @transform_2, window_bounds = array<i64: 1, 128>}, {pipeline_mode = #tpu.pipeline_mode<synchronous>, transform_indices = @transform_3, window_bounds = array<i64: 128, 128>}, {pipeline_mode = #tpu.pipeline_mode<synchronous>, transform_indices = @transform_4, window_bounds = array<i64: 1, 128>}, {transform_indices = @transform_5, window_bounds = array<i64: 32, 8, 128>}, {transform_indices = @transform_6, window_bounds = array<i64: 32, 128>}, {transform_indices = @transform_7, window_bounds = array<i64: 32, 128>}, {transform_indices = @transform_8, window_bounds = array<i64: 32, 128>}, {transform_indices = @transform_9, window_bounds = array<i64: 32, 128>}]} {
    %c0 = arith.constant 0 : index
    %c0_0 = arith.constant 0 : index
    %0 = vector.load %arg1[%c0, %c0_0] : memref<256x32xf32, #tpu.memory_space<vmem>>, vector<256x32xf32>
    %c0_1 = arith.constant 0 : index
    %c0_2 = arith.constant 0 : index
    %1 = vector.load %arg2[%c0_1, %c0_2] : memref<32x128xf32, #tpu.memory_space<vmem>>, vector<32x128xf32>
    %cst = arith.constant dense<0.000000e+00> : vector<256x128xf32>
    %2 = tpu.matmul %0, %1, %cst {dimension_numbers = #tpu.dot_dimension_numbers<[1], [0], [0], [1], [0, 0, 1, 1], [], []>} : vector<256x32xf32>, vector<32x128xf32>, vector<256x128xf32> -> vector<256x128xf32>
    %c0_3 = arith.constant 0 : index
    %c0_4 = arith.constant 0 : index
    %3 = vector.load %arg3[%c0_3, %c0_4] : memref<1x128xf32, #tpu.memory_space<vmem>>, vector<1x128xf32>
    %4 = vector.broadcast %3 : vector<1x128xf32> to vector<256x128xf32>
    %5 = arith.addf %2, %4 : vector<256x128xf32>
    %cst_5 = arith.constant 0.000000e+00 : f32
    %6 = vector.broadcast %cst_5 : f32 to vector<256x128xf32>
    %7 = arith.maximumf %5, %6 : vector<256x128xf32>
    %c0_6 = arith.constant 0 : index
    %c0_7 = arith.constant 0 : index
    %8 = vector.load %arg4[%c0_6, %c0_7] : memref<128x128xf32, #tpu.memory_space<vmem>>, vector<128x128xf32>
    %cst_8 = arith.constant dense<0.000000e+00> : vector<256x128xf32>
    %9 = tpu.matmul %7, %8, %cst_8 {dimension_numbers = #tpu.dot_dimension_numbers<[1], [0], [0], [1], [0, 0, 1, 1], [], []>} : vector<256x128xf32>, vector<128x128xf32>, vector<256x128xf32> -> vector<256x128xf32>
    %c0_9 = arith.constant 0 : index
    %c0_10 = arith.constant 0 : index
    %10 = vector.load %arg5[%c0_9, %c0_10] : memref<1x128xf32, #tpu.memory_space<vmem>>, vector<1x128xf32>
    %11 = vector.broadcast %10 : vector<1x128xf32> to vector<256x128xf32>
    %12 = arith.addf %9, %11 : vector<256x128xf32>
    %cst_11 = arith.constant 0.000000e+00 : f32
    %13 = vector.broadcast %cst_11 : f32 to vector<256x128xf32>
    %14 = arith.maximumf %12, %13 : vector<256x128xf32>
    %15 = math.absf %12 : vector<256x128xf32>
    %cst_12 = arith.constant 0.000000e+00 : f32
    %16 = vector.broadcast %cst_12 : f32 to vector<256x128xf32>
    %17 = arith.subf %16, %15 : vector<256x128xf32>
    %18 = math.exp %17 : vector<256x128xf32>
    %19 = math.log1p %18 : vector<256x128xf32>
    %20 = arith.addf %14, %19 : vector<256x128xf32>
    %21 = vector.shape_cast %20 : vector<256x128xf32> to vector<32x8x128xf32>
    %c0_13 = arith.constant 0 : index
    %c0_14 = arith.constant 0 : index
    %c0_15 = arith.constant 0 : index
    %22 = vector.load %arg6[%c0_13, %c0_14, %c0_15] : memref<32x8x128xf32, #tpu.memory_space<vmem>>, vector<32x8x128xf32>
    %c0_16 = arith.constant 0 : index
    %c0_17 = arith.constant 0 : index
    %23 = vector.load %arg7[%c0_16, %c0_17] : memref<32x128xf32, #tpu.memory_space<vmem>>, vector<32x128xf32>
    %24 = vector.shape_cast %23 : vector<32x128xf32> to vector<32x1x128xf32>
    %c0_18 = arith.constant 0 : index
    %c0_19 = arith.constant 0 : index
    %25 = vector.load %arg8[%c0_18, %c0_19] : memref<32x128xf32, #tpu.memory_space<vmem>>, vector<32x128xf32>
    %cst_20 = arith.constant 9.99999993E-9 : f32
    %26 = vector.broadcast %cst_20 : f32 to vector<32x8x128xf32>
    %27 = arith.addf %21, %26 : vector<32x8x128xf32>
    %28 = math.log %27 : vector<32x8x128xf32>
    %29 = arith.mulf %22, %28 : vector<32x8x128xf32>
    %30 = arith.subf %21, %29 : vector<32x8x128xf32>
    %31 = vector.broadcast %24 : vector<32x1x128xf32> to vector<32x8x128xf32>
    %32 = arith.mulf %30, %31 : vector<32x8x128xf32>
    %cst_21 = arith.constant dense<0.000000e+00> : vector<32x8xf32>
    %33 = vector.multi_reduction <add>, %32, %cst_21 [2] : vector<32x8x128xf32> to vector<32x8xf32>
    %cst_22 = arith.constant dense<0.000000e+00> : vector<32xf32>
    %34 = vector.multi_reduction <add>, %33, %cst_22 [1] : vector<32x8xf32> to vector<32xf32>
    %35 = vector.shape_cast %34 : vector<32xf32> to vector<32x1xf32>
    %cst_23 = arith.constant dense<0.000000e+00> : vector<32x128xf32>
    %36 = vector.multi_reduction <add>, %21, %cst_23 [1] : vector<32x8x128xf32> to vector<32x128xf32>
    %cst_24 = arith.constant dense<0.000000e+00> : vector<32x128xf32>
    %37 = vector.multi_reduction <add>, %22, %cst_24 [1] : vector<32x8x128xf32> to vector<32x128xf32>
    %38 = arith.mulf %21, %22 : vector<32x8x128xf32>
    %cst_25 = arith.constant dense<0.000000e+00> : vector<32x128xf32>
    %39 = vector.multi_reduction <add>, %38, %cst_25 [1] : vector<32x8x128xf32> to vector<32x128xf32>
    %40 = arith.mulf %21, %21 : vector<32x8x128xf32>
    %cst_26 = arith.constant dense<0.000000e+00> : vector<32x128xf32>
    %41 = vector.multi_reduction <add>, %40, %cst_26 [1] : vector<32x8x128xf32> to vector<32x128xf32>
    %42 = arith.mulf %22, %22 : vector<32x8x128xf32>
    %cst_27 = arith.constant dense<0.000000e+00> : vector<32x128xf32>
    %43 = vector.multi_reduction <add>, %42, %cst_27 [1] : vector<32x8x128xf32> to vector<32x128xf32>
    %44 = arith.mulf %36, %37 : vector<32x128xf32>
    %cst_28 = arith.constant 1.250000e-01 : f32
    %45 = vector.broadcast %cst_28 : f32 to vector<32x128xf32>
    %46 = arith.mulf %44, %45 : vector<32x128xf32>
    %47 = arith.subf %39, %46 : vector<32x128xf32>
    %48 = arith.mulf %36, %36 : vector<32x128xf32>
    %cst_29 = arith.constant 1.250000e-01 : f32
    %49 = vector.broadcast %cst_29 : f32 to vector<32x128xf32>
    %50 = arith.mulf %48, %49 : vector<32x128xf32>
    %51 = arith.subf %41, %50 : vector<32x128xf32>
    %52 = arith.mulf %37, %37 : vector<32x128xf32>
    %cst_30 = arith.constant 1.250000e-01 : f32
    %53 = vector.broadcast %cst_30 : f32 to vector<32x128xf32>
    %54 = arith.mulf %52, %53 : vector<32x128xf32>
    %55 = arith.subf %43, %54 : vector<32x128xf32>
    %56 = arith.mulf %51, %55 : vector<32x128xf32>
    %cst_31 = arith.constant 0.000000e+00 : f32
    %57 = vector.broadcast %cst_31 : f32 to vector<32x128xf32>
    %58 = arith.maximumf %56, %57 : vector<32x128xf32>
    %cst_32 = arith.constant 9.99999993E-9 : f32
    %59 = vector.broadcast %cst_32 : f32 to vector<32x128xf32>
    %60 = arith.addf %58, %59 : vector<32x128xf32>
    %61 = math.rsqrt %60 : vector<32x128xf32>
    %62 = arith.mulf %47, %61 : vector<32x128xf32>
    %63 = arith.mulf %62, %25 : vector<32x128xf32>
    %cst_33 = arith.constant dense<0.000000e+00> : vector<32xf32>
    %64 = vector.multi_reduction <add>, %63, %cst_33 [1] : vector<32x128xf32> to vector<32xf32>
    %65 = vector.shape_cast %64 : vector<32xf32> to vector<32x1xf32>
    %66 = vector.shape_cast %35 : vector<32x1xf32> to vector<32x1xf32>
    %67 = vector.broadcast %66 : vector<32x1xf32> to vector<32x128xf32>
    %c0_34 = arith.constant 0 : index
    %c0_35 = arith.constant 0 : index
    %68 = vector.load %arg9[%c0_34, %c0_35] : memref<32x128xf32, #tpu.memory_space<vmem>>, vector<32x128xf32>
    tpu.vector_store %arg9[%c0_34, %c0_35], %67 {strides = array<i32>} : memref<32x128xf32, #tpu.memory_space<vmem>>, vector<32x128xf32>,
    %69 = vector.shape_cast %65 : vector<32x1xf32> to vector<32x1xf32>
    %70 = vector.broadcast %69 : vector<32x1xf32> to vector<32x128xf32>
    %c0_36 = arith.constant 0 : index
    %c0_37 = arith.constant 0 : index
    %71 = vector.load %arg10[%c0_36, %c0_37] : memref<32x128xf32, #tpu.memory_space<vmem>>, vector<32x128xf32>
    tpu.vector_store %arg10[%c0_36, %c0_37], %70 {strides = array<i32>} : memref<32x128xf32, #tpu.memory_space<vmem>>, vector<32x128xf32>,
    return
  }
  func.func @transform_0(%arg0: i32) -> (i32, i32) {
    %c0_i32 = arith.constant 0 : i32
    %c0_i32_0 = arith.constant 0 : i32
    return %arg0, %c0_i32 : i32, i32
  }
  func.func @transform_1(%arg0: i32) -> (i32, i32) {
    %c0_i32 = arith.constant 0 : i32
    %c0_i32_0 = arith.constant 0 : i32
    %c0_i32_1 = arith.constant 0 : i32
    return %c0_i32, %c0_i32_0 : i32, i32
  }
  func.func @transform_2(%arg0: i32) -> (i32, i32) {
    %c0_i32 = arith.constant 0 : i32
    %c0_i32_0 = arith.constant 0 : i32
    %c0_i32_1 = arith.constant 0 : i32
    return %c0_i32, %c0_i32_0 : i32, i32
  }
  func.func @transform_3(%arg0: i32) -> (i32, i32) {
    %c0_i32 = arith.constant 0 : i32
    %c0_i32_0 = arith.constant 0 : i32
    %c0_i32_1 = arith.constant 0 : i32
    return %c0_i32, %c0_i32_0 : i32, i32
  }
  func.func @transform_4(%arg0: i32) -> (i32, i32) {
    %c0_i32 = arith.constant 0 : i32
    %c0_i32_0 = arith.constant 0 : i32
    %c0_i32_1 = arith.constant 0 : i32
    return %c0_i32, %c0_i32_0 : i32, i32
  }
  func.func @transform_5(%arg0: i32) -> (i32, i32, i32) {
    %c0_i32 = arith.constant 0 : i32
    %c0_i32_0 = arith.constant 0 : i32
    %c0_i32_1 = arith.constant 0 : i32
    return %arg0, %c0_i32, %c0_i32_0 : i32, i32, i32
  }
  func.func @transform_6(%arg0: i32) -> (i32, i32) {
    %c0_i32 = arith.constant 0 : i32
    %c0_i32_0 = arith.constant 0 : i32
    return %arg0, %c0_i32 : i32, i32
  }
  func.func @transform_7(%arg0: i32) -> (i32, i32) {
    %c0_i32 = arith.constant 0 : i32
    %c0_i32_0 = arith.constant 0 : i32
    return %arg0, %c0_i32 : i32, i32
  }
  func.func @transform_8(%arg0: i32) -> (i32, i32) {
    %c0_i32 = arith.constant 0 : i32
    %c0_i32_0 = arith.constant 0 : i32
    return %arg0, %c0_i32 : i32, i32
  }
  func.func @transform_9(%arg0: i32) -> (i32, i32) {
    %c0_i32 = arith.constant 0 : i32
    %c0_i32_0 = arith.constant 0 : i32
    return %arg0, %c0_i32 : i32, i32
  }
}

</mosaic_0001>

<bundles_post_ra>
// kernel: squeeze.33
= control target key start
LH: loop header
LB: loop body
LE: loop exit
PB: predicated region body
PF: predicated region fallthrough
CT: control target
= control target key end

     0   :  { %vm8_vm0 = vcmask 15360   ;;  %s93_s8 = smov 122   ;;  %s94_s9 = smov 124   ;;  %s132_s0 = inlined_call_operand.vmem [shape: f32[16], index: 0, kind: input, shape index: {}]   ;;  %s133_s1 = inlined_call_operand.vmem [shape: f32[4,2,2], index: 1, kind: output, shape index: {}]  }
   0x1   :  { %v5_v0 = vld [vmem:[%s132_s0] sm:$0x1]  ;;  %s92_s0 = smov 126   ;;  %s95_s10 = smov 120  }
   0x2   :  { %6 = vst [vmem:[#allocation1] sm:$0x1] %v5_v0  ;;  %s96_s11 = smov 118   ;;  %s97_s12 = smov 116  }
   0x3   :  { %s98_s13 = smov 114  }
   0x9   :  { %v10_v1 = vld [vmem:[#allocation1] sm:$0x1]  }
   0xa   :  { %v22_v2 = vld [vmem:[#allocation1] sm:$0x1]   ;;  %11 = vrot.lane.b32.xlu0 %v10_v1, %s92_s0 }
   0xb   :  { %23 = vrot.lane.b32.xlu1 %v22_v2, %s93_s8  ;;  %v16_v3 = vld [vmem:[#allocation1] sm:$0x1]  }
   0xc   :  { %v28_v4 = vld [vmem:[#allocation1] sm:$0x1]  }
   0xd   :  { %v7_v5 = vld [vmem:[#allocation1] sm:$0x1]  }
   0xe   :  { %9 = vst.msk [vmem:[#allocation0] sm:$0x1] %vm8_vm0, %v7_v5   ;;  %17 = vrot.lane.b32.xlu0 %v16_v3, %s94_s9  ;;  %v34_v6 = vld [vmem:[#allocation1] sm:$0x1]  }
   0xf   :  { %29 = vrot.lane.b32.xlu1 %v28_v4, %s95_s10  ;;  %v40_v7 = vld [vmem:[#allocation1] sm:$0x1]  }
  0x10   :  { %v46_v8 = vld [vmem:[#allocation1] sm:$0x1]  }
  0x12   :  { %35 = vrot.lane.b32.xlu0 %v34_v6, %s96_s11 }
  0x13   :  { %41 = vrot.lane.b32.xlu1 %v40_v7, %s97_s12 }
  0x16   :  { %47 = vrot.lane.b32.xlu0 %v46_v8, %s98_s13 }
  0x7c   :  { %v12_v9 = vpop.permute.xlu0 %11  }
  0x7d   :  { %v24_v10 = vpop.permute.xlu1 %23   ;;  %15 = vst.msk [vmem:[#allocation0 + $0x1] sm:$0x1] %vm8_vm0, %v12_v9  }
  0x7e   :  { %27 = vst.msk [vmem:[#allocation0 + $0x9] sm:$0x1] %vm8_vm0, %v24_v10  }
  0x80   :  { %v18_v11 = vpop.permute.xlu0 %17  }
  0x81   :  { %v30_v12 = vpop.permute.xlu1 %29   ;;  %21 = vst.msk [vmem:[#allocation0 + $0x8] sm:$0x1] %vm8_vm0, %v18_v11  }
  0x82   :  { %33 = vst.msk [vmem:[#allocation0 + $0x10] sm:$0x1] %vm8_vm0, %v30_v12  }
  0x84   :  { %v56_v13 = vld [vmem:[#allocation0] sm:$0x3]  ;;  %v36_v14 = vpop.permute.xlu0 %35  }
  0x85   :  { %v42_v15 = vpop.permute.xlu1 %41   ;;  %59 = vst [vmem:[%s133_s1] sm:$0x3] %v56_v13  ;;  %39 = vst.msk [vmem:[#allocation0 + $0x11] sm:$0x1] %vm8_vm0, %v36_v14  }
  0x86   :  { %45 = vst.msk [vmem:[#allocation0 + $0x18] sm:$0x1] %vm8_vm0, %v42_v15  }
  0x88   :  { %v61_v16 = vld [vmem:[#allocation0 + $0x8] sm:$0x3]  ;;  %v48_v17 = vpop.permute.xlu0 %47  }
  0x89   :  { %82 = vst [vmem:[%s133_s1 + $0x2] sm:$0x3] %v61_v16  ;;  %51 = vst.msk [vmem:[#allocation0 + $0x19] sm:$0x1] %vm8_vm0, %v48_v17  }
  0x8c   :  { %v67_v18 = vld [vmem:[#allocation0 + $0x10] sm:$0x3] }
  0x8d   :  { %83 = vst [vmem:[%s133_s1 + $0x4] sm:$0x3] %v67_v18 }
  0x90   :  { %v74_v19 = vld [vmem:[#allocation0 + $0x18] sm:$0x3] }
  0x91   :  { %84 = vst [vmem:[%s133_s1 + $0x6] sm:$0x3] %v74_v19 }

// kernel: run.1
= control target key start
LH: loop header
LB: loop body
LE: loop exit
PB: predicated region body
PF: predicated region fallthrough
CT: control target
= control target key end

     0   :  { %vm74_vm0 = vcmask 261120   ;;  %s7251_s1 = inlined_call_operand.vmem [shape: f32[32,128], index: 1, kind: input, shape index: {}]   ;;  %s7252_s0 = inlined_call_operand.vmem [shape: f32[256,32], index: 0, kind: input, shape index: {}]   ;;  %s7253_s3 = inlined_call_operand.vmem [shape: f32[128,128], index: 3, kind: input, shape index: {}]   ;;  %s7254_s2 = inlined_call_operand.vmem [shape: f32[1,128], index: 2, kind: input, shape index: {}]   ;;  %s7255_s4 = inlined_call_operand.vmem [shape: f32[1,128], index: 4, kind: input, shape index: {}]   ;;  %s7256_s6 = inlined_call_operand.vmem [shape: f32[32,128], index: 6, kind: input, shape index: {}]   ;;  %s7257_s5 = inlined_call_operand.vmem [shape: f32[32,8,128], index: 5, kind: input, shape index: {}]   ;;  %s7258_s7 = inlined_call_operand.vmem [shape: f32[32,128], index: 7, kind: input, shape index: {}]   ;;  %s7259_s9 = inlined_call_operand.vmem [shape: f32[32,128], index: 9, kind: output, shape index: {1}]   ;;  %s7260_s8 = inlined_call_operand.vmem [shape: f32[32,128], index: 8, kind: output, shape index: {0}]  }
   0x1   :  { %v66_v0 = vld [vmem:[%s7251_s1 + $0x18] sm:$0xff]  ;;  %v65_v1 = vld [vmem:[%s7251_s1 + $0x10] sm:$0xff]  ;;  %v31_v2 = vld [vmem:[%s7252_s0] sm:$0xff] }
   0x2   :  { %3860 = vmatprep.subr.mxu0 %v66_v0  ;;  %v64_v3 = vld [vmem:[%s7251_s1 + $0x8] sm:$0xff]  ;;  %3868 = vmatprep.mubr.msk.f32.mxu0 %vm74_vm0, %v31_v2  ;;  %v63_v4 = vld [vmem:[%s7251_s1] sm:$0xff]  ;;  %v33_v6 = vld [vmem:[%s7252_s0 + $0x10] sm:$0xff] }
   0x3   :  { %3861 = vmatpush3.msra.mxu0 %v66_v0  ;;  %v32_v5 = vld [vmem:[%s7252_s0 + $0x8] sm:$0xff]  ;;  %v34_v7 = vld [vmem:[%s7252_s0 + $0x18] sm:$0xff]  ;;  %v35_v8 = vld [vmem:[%s7252_s0 + $0x20] sm:$0xff] }
   0x4   :  { %3862 = vmatprep.subr.mxu0 %v65_v1  ;;  %v443_v9 = vld [vmem:[%s7253_s3 + $0x78] sm:$0xff]  ;;  %v442_v10 = vld [vmem:[%s7253_s3 + $0x70] sm:$0xff]  ;;  %v36_v11 = vld [vmem:[%s7252_s0 + $0x28] sm:$0xff] }
   0x5   :  { %3863 = vmatpush3.msra.mxu0 %v65_v1  ;;  %v441_v12 = vld [vmem:[%s7253_s3 + $0x68] sm:$0xff]  ;;  %v37_v13 = vld [vmem:[%s7252_s0 + $0x30] sm:$0xff]  ;;  %3996 = vmatprep.subr.mxu1 %v443_v9  ;;  %v440_v14 = vld [vmem:[%s7253_s3 + $0x60] sm:$0xff] }
   0x6   :  { %3864 = vmatprep.subr.mxu0 %v64_v3  ;;  %4012 = vmatpush3.msra.mxu1 %v443_v9  ;;  %v38_v15 = vld [vmem:[%s7252_s0 + $0x38] sm:$0xff]  ;;  %v39_v17 = vld [vmem:[%s7252_s0 + $0x40] sm:$0xff]  ;;  %v438_v18 = vld [vmem:[%s7253_s3 + $0x50] sm:$0xff] }
   0x7   :  { %3865 = vmatpush3.msra.mxu0 %v64_v3  ;;  %v439_v16 = vld [vmem:[%s7253_s3 + $0x58] sm:$0xff]  ;;  %3997 = vmatprep.subr.mxu1 %v442_v10  ;;  %v40_v19 = vld [vmem:[%s7252_s0 + $0x48] sm:$0xff]  ;;  %v41_v21 = vld [vmem:[%s7252_s0 + $0x50] sm:$0xff] }
   0x8   :  { %3866 = vmatprep.subr.mxu0 %v63_v4  ;;  %4013 = vmatpush3.msra.mxu1 %v442_v10  ;;  %v437_v20 = vld [vmem:[%s7253_s3 + $0x48] sm:$0xff]  ;;  %v436_v22 = vld [vmem:[%s7253_s3 + $0x40] sm:$0xff]  ;;  %v42_v23 = vld [vmem:[%s7252_s0 + $0x58] sm:$0xff] }
   0x9   :  { %3867 = vmatpush3.msra.mxu0 %v63_v4  ;;  %3998 = vmatprep.subr.mxu1 %v441_v12  ;;  %v435_v24 = vld [vmem:[%s7253_s3 + $0x38] sm:$0xff]  ;;  %v43_v25 = vld [vmem:[%s7252_s0 + $0x60] sm:$0xff]  ;;  %v434_v26 = vld [vmem:[%s7253_s3 + $0x30] sm:$0xff] }
   0xa   :  { %3869 = vmatmul.mubr.msk.f32.vlgmr.msra.gmra.mxu0 %vm74_vm0, %v32_v5  ;;  %3916 = vmatprep.subr.mxu0 %v443_v9  ;;  %v44_v27 = vld [vmem:[%s7252_s0 + $0x68] sm:$0xff]  ;;  %v45_v29 = vld [vmem:[%s7252_s0 + $0x70] sm:$0xff]  ;;  %v432_v30 = vld [vmem:[%s7253_s3 + $0x20] sm:$0xff] }
   0xb   :  { %3871 = vmatprep.mubr.msk.f32.mxu0 %vm74_vm0, %v33_v6  ;;  %3917 = vmatpush3.msra.mxu0 %v443_v9  ;;  %v433_v28 = vld [vmem:[%s7253_s3 + $0x28] sm:$0xff]  ;;  %v46_v31 = vld [vmem:[%s7252_s0 + $0x78] sm:$0xff]  ;;  %v47_v32 = vld [vmem:[%s7252_s0 + $0x80] sm:$0xff] }
   0xc   :  { %3918 = vmatprep.subr.mxu0 %v442_v10  ;;  %4014 = vmatpush3.msra.mxu1 %v441_v12  ;;  %v48_v33 = vld [vmem:[%s7252_s0 + $0x88] sm:$0xff]  ;;  %v49_v34 = vld [vmem:[%s7252_s0 + $0x90] sm:$0xff]  ;;  %v50_v35 = vld [vmem:[%s7252_s0 + $0x98] sm:$0xff] }
   0xd   :  { %3919 = vmatpush3.msra.mxu0 %v442_v10  ;;  %3999 = vmatprep.subr.mxu1 %v440_v14  ;;  %v51_v36 = vld [vmem:[%s7252_s0 + $0xa0] sm:$0xff]  ;;  %v52_v37 = vld [vmem:[%s7252_s0 + $0xa8] sm:$0xff]  ;;  %v53_v38 = vld [vmem:[%s7252_s0 + $0xb0] sm:$0xff] }
   0xe   :  { %3872 = vmatmul.mubr.msk.f32.gmra.mxu0 %vm74_vm0, %v34_v7  ;;  %3920 = vmatprep.subr.mxu0 %v441_v12  ;;  %v54_v39 = vld [vmem:[%s7252_s0 + $0xb8] sm:$0xff]  ;;  %v55_v40 = vld [vmem:[%s7252_s0 + $0xc0] sm:$0xff]  ;;  %v56_v41 = vld [vmem:[%s7252_s0 + $0xc8] sm:$0xff] }
   0xf   :  { %3874 = vmatprep.mubr.msk.f32.mxu0 %vm74_vm0, %v35_v8  ;;  %3921 = vmatpush3.msra.mxu0 %v441_v12  ;;  %v57_v42 = vld [vmem:[%s7252_s0 + $0xd0] sm:$0xff]  ;;  %v58_v43 = vld [vmem:[%s7252_s0 + $0xd8] sm:$0xff]  ;;  %v59_v44 = vld [vmem:[%s7252_s0 + $0xe0] sm:$0xff] }
  0x10   :  { %3922 = vmatprep.subr.mxu0 %v440_v14  ;;  %4015 = vmatpush3.msra.mxu1 %v440_v14  ;;  %v60_v45 = vld [vmem:[%s7252_s0 + $0xe8] sm:$0xff]  ;;  %v61_v46 = vld [vmem:[%s7252_s0 + $0xf0] sm:$0xff]  ;;  %v62_v47 = vld [vmem:[%s7252_s0 + $0xf8] sm:$0xff] }
  0x11   :  { %3923 = vmatpush3.msra.mxu0 %v440_v14  ;;  %4000 = vmatprep.subr.mxu1 %v439_v16  ;;  %v431_v48 = vld [vmem:[%s7253_s3 + $0x18] sm:$0xff]  ;;  %v430_v49 = vld [vmem:[%s7253_s3 + $0x10] sm:$0xff]  ;;  %v429_v50 = vld [vmem:[%s7253_s3 + $0x8] sm:$0xff] }
  0x12   :  { %3875 = vmatmul.mubr.msk.f32.gmra.mxu0 %vm74_vm0, %v36_v11  ;;  %3924 = vmatprep.subr.mxu0 %v439_v16  ;;  %v428_v51 = vld [vmem:[%s7253_s3] sm:$0xff] }
  0x13   :  { %3877 = vmatprep.mubr.msk.f32.mxu0 %vm74_vm0, %v37_v13  ;;  %3925 = vmatpush3.msra.mxu0 %v439_v16  ;;  %v4534_v52 = vld [vmem:[%s7254_s2] ss:$0 sm:$0xff] }
  0x14   :  { %3926 = vmatprep.subr.mxu0 %v438_v18  ;;  %4016 = vmatpush3.msra.mxu1 %v439_v16 }
  0x15   :  { %3927 = vmatpush3.msra.mxu0 %v438_v18  ;;  %4001 = vmatprep.subr.mxu1 %v438_v18 }
  0x16   :  { %3878 = vmatmul.mubr.msk.f32.gmra.mxu0 %vm74_vm0, %v38_v15  ;;  %3928 = vmatprep.subr.mxu0 %v437_v20 }
  0x17   :  { %3880 = vmatprep.mubr.msk.f32.mxu0 %vm74_vm0, %v39_v17  ;;  %3929 = vmatpush3.msra.mxu0 %v437_v20 }
  0x18   :  { %3930 = vmatprep.subr.mxu0 %v436_v22  ;;  %4017 = vmatpush3.msra.mxu1 %v438_v18 }
  0x19   :  { %3931 = vmatpush3.msra.mxu0 %v436_v22  ;;  %4002 = vmatprep.subr.mxu1 %v437_v20 }
  0x1a   :  { %3881 = vmatmul.mubr.msk.f32.gmra.mxu0 %vm74_vm0, %v40_v19  ;;  %3932 = vmatprep.subr.mxu0 %v435_v24 }
  0x1b   :  { %3883 = vmatprep.mubr.msk.f32.mxu0 %vm74_vm0, %v41_v21  ;;  %3933 = vmatpush3.msra.mxu0 %v435_v24 }
  0x1c   :  { %3934 = vmatprep.subr.mxu0 %v434_v26  ;;  %4018 = vmatpush3.msra.mxu1 %v437_v20 }
  0x1d   :  { %3935 = vmatpush3.msra.mxu0 %v434_v26  ;;  %4003 = vmatprep.subr.mxu1 %v436_v22 }
  0x1e   :  { %3884 = vmatmul.mubr.msk.f32.gmra.mxu0 %vm74_vm0, %v42_v23  ;;  %3936 = vmatprep.subr.mxu0 %v433_v28 }
  0x1f   :  { %3886 = vmatprep.mubr.msk.f32.mxu0 %vm74_vm0, %v43_v25  ;;  %3937 = vmatpush3.msra.mxu0 %v433_v28 }
  0x20   :  { %3938 = vmatprep.subr.mxu0 %v432_v30  ;;  %4019 = vmatpush3.msra.mxu1 %v436_v22 }
  0x21   :  { %3939 = vmatpush3.msra.mxu0 %v432_v30  ;;  %4004 = vmatprep.subr.mxu1 %v435_v24 }
  0x22   :  { %3887 = vmatmul.mubr.msk.f32.gmra.mxu0 %vm74_vm0, %v44_v27  ;;  %4020 = vmatpush3.msra.mxu1 %v435_v24 }
  0x23   :  { %3889 = vmatprep.mubr.msk.f32.mxu0 %vm74_vm0, %v45_v29  ;;  %4005 = vmatprep.subr.mxu1 %v434_v26 }
  0x24   :  { %4021 = vmatpush3.msra.mxu1 %v434_v26  ;;  %3940 = vmatprep.subr.mxu0 %v431_v48 }
  0x25   :  { %4006 = vmatprep.subr.mxu1 %v433_v28  ;;  %3941 = vmatpush3.msra.mxu0 %v431_v48 }
  0x26   :  { %3890 = vmatmul.mubr.msk.f32.gmra.mxu0 %vm74_vm0, %v46_v31  ;;  %4022 = vmatpush3.msra.mxu1 %v433_v28 }
  0x27   :  { %3892 = vmatprep.mubr.msk.f32.mxu0 %vm74_vm0, %v47_v32  ;;  %4007 = vmatprep.subr.mxu1 %v432_v30 }
  0x28   :  { %4023 = vmatpush3.msra.mxu1 %v432_v30  ;;  %3942 = vmatprep.subr.mxu0 %v430_v49 }
  0x29   :  { %4008 = vmatprep.subr.mxu1 %v431_v48  ;;  %3943 = vmatpush3.msra.mxu0 %v430_v49 }
  0x2a   :  { %3893 = vmatmul.mubr.msk.f32.gmra.mxu0 %vm74_vm0, %v48_v33  ;;  %4024 = vmatpush3.msra.mxu1 %v431_v48 }
  0x2b   :  { %3895 = vmatprep.mubr.msk.f32.mxu0 %vm74_vm0, %v49_v34  ;;  %4009 = vmatprep.subr.mxu1 %v430_v49 }
  0x2c   :  { %4025 = vmatpush3.msra.mxu1 %v430_v49  ;;  %3944 = vmatprep.subr.mxu0 %v429_v50 }
  0x2d   :  { %4010 = vmatprep.subr.mxu1 %v429_v50  ;;  %3945 = vmatpush3.msra.mxu0 %v429_v50 }
  0x2e   :  { %3896 = vmatmul.mubr.msk.f32.gmra.mxu0 %vm74_vm0, %v50_v35  ;;  %4026 = vmatpush3.msra.mxu1 %v429_v50 }
  0x2f   :  { %3898 = vmatprep.mubr.msk.f32.mxu0 %vm74_vm0, %v51_v36  ;;  %3946 = vmatprep.subr.mxu0 %v428_v51 }
  0x30   :  { %4011 = vmatprep.subr.mxu1 %v428_v51  ;;  %3947 = vmatpush3.msra.mxu0 %v428_v51 }
  0x31   :  { %4027 = vmatpush3.msra.mxu1 %v428_v51 }
  0x32   :  { %3899 = vmatmul.mubr.msk.f32.gmra.mxu0 %vm74_vm0, %v52_v37 }
  0x33   :  { %3901 = vmatprep.mubr.msk.f32.mxu0 %vm74_vm0, %v53_v38 }
  0x36   :  { %3902 = vmatmul.mubr.msk.f32.gmra.mxu0 %vm74_vm0, %v54_v39 }
  0x37   :  { %3904 = vmatprep.mubr.msk.f32.mxu0 %vm74_vm0, %v55_v40 }
  0x3a   :  { %3905 = vmatmul.mubr.msk.f32.gmra.mxu0 %vm74_vm0, %v56_v41 }
  0x3b   :  { %3907 = vmatprep.mubr.msk.f32.mxu0 %vm74_vm0, %v57_v42 }
  0x3e   :  { %3908 = vmatmul.mubr.msk.f32.gmra.mxu0 %vm74_vm0, %v58_v43 }
  0x3f   :  { %3910 = vmatprep.mubr.msk.f32.mxu0 %vm74_vm0, %v59_v44 }
  0x42   :  { %3911 = vmatmul.mubr.msk.f32.gmra.mxu0 %vm74_vm0, %v60_v45 }
  0x43   :  { %3913 = vmatprep.mubr.msk.f32.mxu0 %vm74_vm0, %v61_v46 }
  0x46   :  { %3914 = vmatmul.mubr.msk.f32.gmra.mxu0 %vm74_vm0, %v62_v47 }
  0xca   :  { %v3870_v53 = vpop.f32.mrf.mxu0 }
  0xcb   :  { %v243_v54 = vadd.f32 %v3870_v53, %v4534_v52 }
  0xcc   :  { %v237_v55 = vpop.f32.mrf.mxu0 }
  0xcd   :  { %v238_v56 = vadd.f32 %v4534_v52, %v237_v55  ;;  %v397_v59 = vmax.f32 %v243_v54, 0.0 }
  0xce   :  { %v3873_v57 = vpop.f32.mrf.mxu0 }
  0xcf   :  { %v396_v58 = vmax.f32 %v238_v56, 0.0  ;;  %v253_v60 = vadd.f32 %v3873_v57, %v4534_v52 }
  0xd0   :  { %v247_v61 = vpop.f32.mrf.mxu0 }
  0xd1   :  { %v248_v62 = vadd.f32 %v4534_v52, %v247_v61  ;;  %3948 = vmatprep.mubr.f32.mxu0 %v396_v58  ;;  %v399_v1 = vmax.f32 %v253_v60, 0.0 }
  0xd2   :  { %v3876_v63 = vpop.f32.mrf.mxu0  ;;  %3949 = vmatmul.mubr.f32.vlgmr.msra.gmra.mxu0 %v397_v59 }
  0xd3   :  { %v398_v0 = vmax.f32 %v248_v62, 0.0  ;;  %v263_v2 = vadd.f32 %v3876_v63, %v4534_v52 }
  0xd4   :  { %v257_v3 = vpop.f32.mrf.mxu0 }
  0xd5   :  { %v258_v4 = vadd.f32 %v4534_v52, %v257_v3  ;;  %3951 = vmatprep.mubr.f32.mxu0 %v398_v0  ;;  %v401_v7 = vmax.f32 %v263_v2, 0.0 }
  0xd6   :  { %v3879_v5 = vpop.f32.mrf.mxu0  ;;  %3952 = vmatmul.mubr.f32.gmra.mxu0 %v399_v1 }
  0xd7   :  { %v400_v6 = vmax.f32 %v258_v4, 0.0  ;;  %v273_v8 = vadd.f32 %v3879_v5, %v4534_v52 }
  0xd8   :  { %v267_v9 = vpop.f32.mrf.mxu0 }
  0xd9   :  { %3954 = vmatprep.mubr.f32.mxu0 %v400_v6  ;;  %v268_v10 = vadd.f32 %v4534_v52, %v267_v9  ;;  %v403_v13 = vmax.f32 %v273_v8, 0.0 }
  0xda   :  { %v3882_v11 = vpop.f32.mrf.mxu0  ;;  %3955 = vmatmul.mubr.f32.gmra.mxu0 %v401_v7 }
  0xdb   :  { %v402_v12 = vmax.f32 %v268_v10, 0.0  ;;  %v283_v14 = vadd.f32 %v3882_v11, %v4534_v52 }
  0xdc   :  { %v277_v15 = vpop.f32.mrf.mxu0 }
  0xdd   :  { %v278_v16 = vadd.f32 %v4534_v52, %v277_v15  ;;  %3957 = vmatprep.mubr.f32.mxu1 %v402_v12  ;;  %v405_v19 = vmax.f32 %v283_v14, 0.0 }
  0xde   :  { %v3885_v17 = vpop.f32.mrf.mxu0  ;;  %3958 = vmatmul.mubr.f32.vlgmr.msra.gmra.mxu1 %v403_v13 }
  0xdf   :  { %v404_v18 = vmax.f32 %v278_v16, 0.0  ;;  %v293_v20 = vadd.f32 %v3885_v17, %v4534_v52 }
  0xe0   :  { %v287_v21 = vpop.f32.mrf.mxu0 }
  0xe1   :  { %v288_v22 = vadd.f32 %v4534_v52, %v287_v21  ;;  %3960 = vmatprep.mubr.f32.mxu1 %v404_v18  ;;  %v407_v25 = vmax.f32 %v293_v20, 0.0 }
  0xe2   :  { %v3888_v23 = vpop.f32.mrf.mxu0  ;;  %3961 = vmatmul.mubr.f32.gmra.mxu1 %v405_v19 }
  0xe3   :  { %v406_v24 = vmax.f32 %v288_v22, 0.0  ;;  %v303_v26 = vadd.f32 %v3888_v23, %v4534_v52  ;;  %v4571_v22 = vld [vmem:[%s7255_s4] ss:$0 sm:$0xff] }
  0xe4   :  { %v297_v27 = vpop.f32.mrf.mxu0 }
  0xe5   :  { %v298_v28 = vadd.f32 %v4534_v52, %v297_v27  ;;  %3963 = vmatprep.mubr.f32.mxu1 %v406_v24  ;;  %v409_v31 = vmax.f32 %v303_v26, 0.0 }
  0xe6   :  { %v3891_v29 = vpop.f32.mrf.mxu0  ;;  %3964 = vmatmul.mubr.f32.gmra.mxu1 %v407_v25 }
  0xe7   :  { %v408_v30 = vmax.f32 %v298_v28, 0.0  ;;  %v313_v32 = vadd.f32 %v3891_v29, %v4534_v52 }
  0xe8   :  { %v307_v33 = vpop.f32.mrf.mxu0 }
  0xe9   :  { %v308_v34 = vadd.f32 %v4534_v52, %v307_v33  ;;  %3966 = vmatprep.mubr.f32.mxu1 %v408_v30  ;;  %v411_v37 = vmax.f32 %v313_v32, 0.0 }
  0xea   :  { %v3894_v35 = vpop.f32.mrf.mxu0  ;;  %3967 = vmatmul.mubr.f32.gmra.mxu1 %v409_v31 }
  0xeb   :  { %v410_v36 = vmax.f32 %v308_v34, 0.0  ;;  %v323_v38 = vadd.f32 %v3894_v35, %v4534_v52 }
  0xec   :  { %v317_v39 = vpop.f32.mrf.mxu0 }
  0xed   :  { %v318_v40 = vadd.f32 %v4534_v52, %v317_v39  ;;  %3969 = vmatprep.mubr.f32.mxu1 %v410_v36  ;;  %v413_v43 = vmax.f32 %v323_v38, 0.0 }
  0xee   :  { %v3897_v41 = vpop.f32.mrf.mxu0  ;;  %3970 = vmatmul.mubr.f32.gmra.mxu1 %v411_v37 }
  0xef   :  { %v412_v42 = vmax.f32 %v318_v40, 0.0  ;;  %v333_v44 = vadd.f32 %v3897_v41, %v4534_v52 }
  0xf0   :  { %v327_v45 = vpop.f32.mrf.mxu0 }
  0xf1   :  { %v328_v46 = vadd.f32 %v4534_v52, %v327_v45  ;;  %3972 = vmatprep.mubr.f32.mxu1 %v412_v42  ;;  %v415_v49 = vmax.f32 %v333_v44, 0.0 }
  0xf2   :  { %v3900_v47 = vpop.f32.mrf.mxu0  ;;  %3973 = vmatmul.mubr.f32.gmra.mxu1 %v413_v43 }
  0xf3   :  { %v414_v48 = vmax.f32 %v328_v46, 0.0  ;;  %v343_v50 = vadd.f32 %v3900_v47, %v4534_v52 }
  0xf4   :  { %v337_v51 = vpop.f32.mrf.mxu0 }
  0xf5   :  { %v338_v53 = vadd.f32 %v4534_v52, %v337_v51  ;;  %3975 = vmatprep.mubr.f32.mxu1 %v414_v48  ;;  %v417_v56 = vmax.f32 %v343_v50, 0.0 }
  0xf6   :  { %v3903_v54 = vpop.f32.mrf.mxu0  ;;  %3976 = vmatmul.mubr.f32.gmra.mxu1 %v415_v49 }
  0xf7   :  { %v416_v55 = vmax.f32 %v338_v53, 0.0  ;;  %v353_v57 = vadd.f32 %v3903_v54, %v4534_v52 }
  0xf8   :  { %v347_v58 = vpop.f32.mrf.mxu0 }
  0xf9   :  { %v348_v59 = vadd.f32 %v4534_v52, %v347_v58  ;;  %3978 = vmatprep.mubr.f32.mxu1 %v416_v55  ;;  %v419_v62 = vmax.f32 %v353_v57, 0.0 }
  0xfa   :  { %v3906_v60 = vpop.f32.mrf.mxu0  ;;  %3979 = vmatmul.mubr.f32.gmra.mxu1 %v417_v56 }
  0xfb   :  { %v418_v61 = vmax.f32 %v348_v59, 0.0  ;;  %v363_v63 = vadd.f32 %v3906_v60, %v4534_v52 }
  0xfc   :  { %v357_v0 = vpop.f32.mrf.mxu0 }
  0xfd   :  { %v358_v1 = vadd.f32 %v4534_v52, %v357_v0  ;;  %3981 = vmatprep.mubr.f32.mxu1 %v418_v61  ;;  %v421_v5 = vmax.f32 %v363_v63, 0.0 }
  0xfe   :  { %v3909_v2 = vpop.f32.mrf.mxu0  ;;  %3982 = vmatmul.mubr.f32.gmra.mxu1 %v419_v62 }
  0xff   :  { %v420_v3 = vmax.f32 %v358_v1, 0.0  ;;  %v373_v4 = vadd.f32 %v3909_v2, %v4534_v52 }
 0x100   :  { %v367_v6 = vpop.f32.mrf.mxu0 }
 0x101   :  { %v368_v7 = vadd.f32 %v4534_v52, %v367_v6  ;;  %3984 = vmatprep.mubr.f32.mxu1 %v420_v3  ;;  %v423_v8 = vmax.f32 %v373_v4, 0.0 }
 0x102   :  { %v3912_v9 = vpop.f32.mrf.mxu0  ;;  %3985 = vmatmul.mubr.f32.gmra.mxu1 %v421_v5 }
 0x103   :  { %v422_v10 = vmax.f32 %v368_v7, 0.0  ;;  %v383_v11 = vadd.f32 %v3912_v9, %v4534_v52 }
 0x104   :  { %v377_v12 = vpop.f32.mrf.mxu0 }
 0x105   :  { %v378_v13 = vadd.f32 %v4534_v52, %v377_v12  ;;  %3987 = vmatprep.mubr.f32.mxu1 %v422_v10  ;;  %v425_v14 = vmax.f32 %v383_v11, 0.0 }
 0x106   :  { %v3915_v15 = vpop.f32.mrf.mxu0  ;;  %3988 = vmatmul.mubr.f32.gmra.mxu1 %v423_v8 }
 0x107   :  { %v424_v16 = vmax.f32 %v378_v13, 0.0  ;;  %v393_v17 = vadd.f32 %v3915_v15, %v4534_v52 }
 0x108   :  { %v387_v18 = vpop.f32.mrf.mxu0 }
 0x109   :  { %v388_v19 = vadd.f32 %v4534_v52, %v387_v18  ;;  %3990 = vmatprep.mubr.f32.mxu1 %v424_v16  ;;  %v427_v20 = vmax.f32 %v393_v17, 0.0 }
 0x10a   :  { %3991 = vmatmul.mubr.f32.gmra.mxu1 %v425_v14 }
 0x10b   :  { %v426_v21 = vmax.f32 %v388_v19, 0.0 }
 0x10d   :  { %3993 = vmatprep.mubr.f32.mxu1 %v426_v21 }
 0x10e   :  { %3994 = vmatmul.mubr.f32.gmra.mxu1 %v427_v20 }
 0x192   :  { %v3950_v23 = vpop.f32.mrf.mxu0 }
 0x193   :  { %v4574_v24 = vadd.f32 %v3950_v23, %v4571_v22 }
 0x194   :  { %v517_v25 = vpop.f32.mrf.mxu0 }
 0x195   :  { %v709_v26 = vand.u32 2147483647, %v4574_v24  ;;  %v4578_v52 = vadd.f32 %v4571_v22, %v517_v25 }
 0x196   :  { %v3953_v27 = vpop.f32.mrf.mxu0 }
 0x197   :  { %v741_v28 = vsub.f32 0.0, %v709_v26  ;;  %v708_v29 = vand.u32 2147483647, %v4578_v52  ;;  %v4582_v30 = vadd.f32 %v3953_v27, %v4571_v22 }
 0x198   :  { %v527_v31 = vpop.f32.mrf.mxu0 }
 0x199   :  { %v774_v32 = vmul.f32 1.442695, %v741_v28  ;;  %v740_v33 = vsub.f32 0.0, %v708_v29  ;;  %v711_v34 = vand.u32 2147483647, %v4582_v30  ;;  %v4586_v35 = vadd.f32 %v4571_v22, %v527_v31 }
 0x19a   :  { %v3956_v36 = vpop.f32.mrf.mxu0 }
 0x19b   :  { %4033 = vpow2.f32 %v774_v32  ;;  %v772_v37 = vmul.f32 1.442695, %v740_v33  ;;  %v743_v38 = vsub.f32 0.0, %v711_v34  ;;  %v4589_v39 = vadd.f32 %v3956_v36, %v4571_v22 }
 0x19c   :  { %v710_v40 = vand.u32 2147483647, %v4586_v35  ;;  %v537_v41 = vpop.f32.mrf.mxu0  ;;  %v677_v36 = vmax.f32 %v4574_v24, 0.0 }
 0x19d   :  { %4035 = vpow2.f32 %v772_v37  ;;  %v778_v42 = vmul.f32 1.442695, %v743_v38  ;;  %v713_v43 = vand.u32 2147483647, %v4589_v39  ;;  %v4594_v45 = vadd.f32 %v4571_v22, %v537_v41 }
 0x19e   :  { %v742_v44 = vsub.f32 0.0, %v710_v40  ;;  %v3959_v46 = vpop.f32.mrf.mxu1  ;;  %v676_v37 = vmax.f32 %v4578_v52, 0.0  ;;  %v679_v52 = vmax.f32 %v4582_v30, 0.0 }
 0x19f   :  { %4037 = vpow2.f32 %v778_v42  ;;  %v745_v48 = vsub.f32 0.0, %v713_v43  ;;  %v712_v50 = vand.u32 2147483647, %v4594_v45  ;;  %v4598_v53 = vadd.f32 %v3959_v46, %v4571_v22 }
 0x1a0   :  { %v776_v47 = vmul.f32 1.442695, %v742_v44  ;;  %v547_v49 = vpop.f32.mrf.mxu1 }
 0x1a1   :  { %v782_v54 = vmul.f32 1.442695, %v745_v48  ;;  %v4601_v55 = vadd.f32 %v4571_v22, %v547_v49  ;;  %v744_v58 = vsub.f32 0.0, %v712_v50  ;;  %v715_v59 = vand.u32 2147483647, %v4598_v53 }
 0x1a2   :  { %4039 = vpow2.f32 %v776_v47  ;;  %v3962_v51 = vpop.f32.mrf.mxu1  ;;  %v683_v30 = vmax.f32 %v4598_v53, 0.0 }
 0x1a3   :  { %v4604_v57 = vadd.f32 %v3962_v51, %v4571_v22  ;;  %4041 = vpow2.f32 %v782_v54  ;;  %v714_v62 = vand.u32 2147483647, %v4601_v55  ;;  %v780_v2 = vmul.f32 1.442695, %v744_v58 }
 0x1a4   :  { %v557_v56 = vpop.f32.mrf.mxu1  ;;  %v747_v4 = vsub.f32 0.0, %v715_v59  ;;  %v678_v51 = vmax.f32 %v4586_v35, 0.0 }
 0x1a5   :  { %v4608_v60 = vadd.f32 %v4571_v22, %v557_v56  ;;  %v717_v0 = vand.u32 2147483647, %v4604_v57  ;;  %v746_v7 = vsub.f32 0.0, %v714_v62  ;;  %v680_v62 = vmax.f32 %v4594_v45, 0.0 }
 0x1a6   :  { %v786_v11 = vmul.f32 1.442695, %v747_v4  ;;  %v3965_v19 = vpop.f32.mrf.mxu1 }
 0x1a7   :  { %v716_v5 = vand.u32 2147483647, %v4608_v60  ;;  %v749_v9 = vsub.f32 0.0, %v717_v0  ;;  %v784_v13 = vmul.f32 1.442695, %v746_v7  ;;  %v4619_v25 = vadd.f32 %v3965_v19, %v4571_v22 }
 0x1a8   :  { %v4034_v61 = vpop.eup %4033  ;;  %v567_v56 = vpop.f32.mrf.mxu1 }
 0x1a9   :  { %v845_v63 = vadd.f32 1.0, %v4034_v61  ;;  %v748_v12 = vsub.f32 0.0, %v716_v5  ;;  %v848_v14 = vmul.f32 -0.5, %v4034_v61  ;;  %v790_v15 = vmul.f32 1.442695, %v749_v9 }
 0x1aa   :  { %v4036_v1 = vpop.eup %4035  ;;  %v851_v23 = vand.u32 2147483647, %v4034_v61  ;;  %v719_v38 = vand.u32 2147483647, %v4619_v25  ;;  %v4653_v7 = vadd.f32 %v4571_v22, %v567_v56 }
 0x1ab   :  { %4043 = vlog2.f32 %v845_v63  ;;  %v836_v3 = vadd.f32 1.0, %v4036_v1  ;;  %v839_v17 = vmul.f32 -0.5, %v4036_v1  ;;  %v788_v18 = vmul.f32 1.442695, %v748_v12 }
 0x1ac   :  { %v4038_v6 = vpop.eup %4037  ;;  %v849_v21 = vadd.f32 1.0, %v848_v14  ;;  %v842_v29 = vand.u32 2147483647, %v4036_v1  ;;  %vm852_vm1 = vcmp.lt.f32.partialorder %v851_v23, 0.0004427343  ;;  %v685_v12 = vmax.f32 %v4604_v57, 0.0 }
 0x1ad   :  { %4045 = vlog2.f32 %v836_v3  ;;  %v863_v8 = vadd.f32 1.0, %v4038_v6  ;;  %v840_v26 = vadd.f32 1.0, %v839_v17  ;;  %v866_v27 = vmul.f32 -0.5, %v4038_v6 }
 0x1ae   :  { %4047 = vpow2.f32 %v780_v2  ;;  %v850_v33 = vmul.f32 %v4034_v61, %v849_v21  ;;  %vm843_vm2 = vcmp.lt.f32.partialorder %v842_v29, 0.0004427343  ;;  %v869_v48 = vand.u32 2147483647, %v4038_v6 }
 0x1af   :  { %v4613_v10 = vpop.eup %4039  ;;  %4049 = vlog2.f32 %v863_v8  ;;  %v841_v43 = vmul.f32 %v4036_v1, %v840_v26  ;;  %v867_v44 = vadd.f32 1.0, %v866_v27  ;;  %v681_v61 = vmax.f32 %v4589_v39, 0.0 }
 0x1b0   :  { %v854_v16 = vadd.f32 1.0, %v4613_v10  ;;  %4051 = vpow2.f32 %v786_v11  ;;  %v4616_v20 = vpop.eup %4041  ;;  %v857_v59 = vmul.f32 -0.5, %v4613_v10  ;;  %vm4641_vm3 = vcmp.lt.f32.partialorder %v869_v48, 0.0004427343 }
 0x1b1   :  { %4053 = vpow2.f32 %v784_v13  ;;  %v881_v31 = vadd.f32 1.0, %v4616_v20  ;;  %v868_v58 = vmul.f32 %v4038_v6, %v867_v44  ;;  %v751_v2 = vsub.f32 0.0, %v719_v38 }
 0x1b2   :  { %4055 = vpow2.f32 %v790_v15  ;;  %v860_v5 = vand.u32 2147483647, %v4613_v10  ;;  %v884_v6 = vmul.f32 -0.5, %v4616_v20  ;;  %v682_v11 = vmax.f32 %v4601_v55, 0.0 }
 0x1b3   :  { %4057 = vlog2.f32 %v854_v16  ;;  %v858_v14 = vadd.f32 1.0, %v857_v59  ;;  %v684_v16 = vmax.f32 %v4608_v60, 0.0  ;;  %v687_v17 = vmax.f32 %v4619_v25, 0.0 }
 0x1b4   :  { %4059 = vpow2.f32 %v788_v18  ;;  %v887_v23 = vand.u32 2147483647, %v4616_v20  ;;  %v794_v26 = vmul.f32 1.442695, %v751_v2  ;;  %vm4669_vm4 = vcmp.lt.f32.partialorder %v860_v5, 0.0004427343 }
 0x1b5   :  { %4061 = vlog2.f32 %v881_v31 }
 0x1b6   :  { %vm4684_vm5 = vcmp.lt.f32.partialorder %v887_v23, 0.0004427343 }
 0x1b8   :  { %v4044_v28 = vpop.eup %4043 }
 0x1b9   :  { %v847_v32 = vmul.f32 0.6931472, %v4044_v28  ;;  %v885_v28 = vadd.f32 1.0, %v884_v6 }
 0x1ba   :  { %v4046_v34 = vpop.eup %4045 }
 0x1bb   :  { %v4625_v40 = vpop.eup %4047  ;;  %v853_v41 = vsel %vm852_vm1, %v850_v33, %v847_v32  ;;  %v838_v42 = vmul.f32 0.6931472, %v4046_v34 }
 0x1bc   :  { %v4050_v46 = vpop.eup %4049  ;;  %v4627_v47 = vadd.f32 %v853_v41, %v677_v36  ;;  %v872_v54 = vadd.f32 1.0, %v4625_v40  ;;  %v875_v34 = vmul.f32 -0.5, %v4625_v40  ;;  %v859_v41 = vmul.f32 %v4613_v10, %v858_v14 }
 0x1bd   :  { %v844_v49 = vsel %vm843_vm2, %v841_v43, %v838_v42  ;;  %v865_v50 = vmul.f32 0.6931472, %v4050_v46  ;;  %v4637_v63 = vpop.eup %4051  ;;  %v718_v14 = vand.u32 2147483647, %v4653_v7 }
 0x1be   :  { %v4629_v24 = vadd.f32 %v844_v49, %v676_v37  ;;  %v2635_v0 = vmul.f32 %v4627_v47, %v4627_v47  ;;  %v4646_v3 = vpop.eup %4053  ;;  %4063 = vlog2.f32 %v872_v54  ;;  %v899_v15 = vadd.f32 1.0, %v4637_v63  ;;  %v4677_v37 = vpop.f32.mrf.mxu1 }
 0x1bf   :  { %v871_v4 = vsel %vm4641_vm3, %v868_v58, %v865_v50  ;;  %v4655_v8 = vpop.eup %4055  ;;  %v890_v29 = vadd.f32 1.0, %v4646_v3  ;;  %v886_v49 = vmul.f32 %v4616_v20, %v885_v28  ;;  %v878_v50 = vand.u32 2147483647, %v4625_v40 }
 0x1c0   :  { %v2634_v9 = vmul.f32 %v4629_v24, %v4629_v24  ;;  %v4058_v13 = vpop.eup %4057  ;;  %v2672_v19 = vrot.slane %v2635_v0, 4  ;;  %v4666_v21 = vadd.f32 %v871_v4, %v679_v52  ;;  %v917_v36 = vadd.f32 1.0, %v4655_v8  ;;  %v4693_v58 = vpop.f32.mrf.mxu1 }
 0x1c1   :  { %v4664_v18 = vpop.eup %4059  ;;  %v856_v33 = vmul.f32 0.6931472, %v4058_v13  ;;  %v2026_v38 = vrot.slane %v4629_v24, 4  ;;  %4065 = vlog2.f32 %v899_v15  ;;  %v902_v52 = vmul.f32 -0.5, %v4637_v63 }
 0x1c2   :  { %v2666_v32 = vrot.slane %v2634_v9, 4  ;;  %v908_v42 = vadd.f32 1.0, %v4664_v18  ;;  %v2673_v43 = vadd.f32 %v2672_v19, %v2635_v0  ;;  %v2637_v44 = vmul.f32 %v4666_v21, %v4666_v21  ;;  %v4062_v48 = vpop.eup %4061  ;;  %v4711_v27 = vpop.f32.mrf.mxu1 }
 0x1c3   :  { %4067 = vpow2.f32 %v794_v26  ;;  %v862_v54 = vsel %vm4669_vm4, %v859_v41, %v856_v33  ;;  %v876_v56 = vadd.f32 1.0, %v875_v34  ;;  %v2032_v59 = vrot.slane %v4627_v47, 4 }
 0x1c4   :  { %4069 = vlog2.f32 %v890_v29  ;;  %v2667_v10 = vadd.f32 %v2666_v32, %v2634_v9  ;;  %v2027_v0 = vadd.f32 %v2026_v38, %v4629_v24  ;;  %v893_v1 = vmul.f32 -0.5, %v4646_v3 }
 0x1c5   :  { %4071 = vlog2.f32 %v917_v36  ;;  %v2674_v20 = vrot.slane %v2673_v43, 2  ;;  %v2044_v2 = vrot.slane %v4666_v21, 4  ;;  %v2684_v4 = vrot.slane %v2637_v44, 4 }
 0x1c6   :  { %4073 = vlog2.f32 %v908_v42  ;;  %v883_v5 = vmul.f32 0.6931472, %v4062_v48  ;;  %v4701_v6 = vadd.f32 %v862_v54, %v678_v51  ;;  %v905_v9 = vand.u32 2147483647, %v4637_v63 }
 0x1c7   :  { %v920_v13 = vmul.f32 -0.5, %v4655_v8  ;;  %v2668_v15 = vrot.slane %v2667_v10, 2  ;;  %v877_v19 = vmul.f32 %v4625_v40, %v876_v56  ;;  %vm4707_vm6 = vcmp.lt.f32.partialorder %v878_v50, 0.0004427343  ;;  %v587_v56 = vpop.f32.mrf.mxu1 }
 0x1c8   :  { %v903_v26 = vadd.f32 1.0, %v902_v52  ;;  %v2033_v35 = vadd.f32 %v2032_v59, %v4627_v47  ;;  %v2028_v51 = vrot.slane %v2027_v0, 2  ;;  %v894_v29 = vadd.f32 1.0, %v893_v1 }
 0x1c9   :  { %v896_v32 = vand.u32 2147483647, %v4646_v3  ;;  %v2675_v33 = vadd.f32 %v2674_v20, %v2673_v43  ;;  %v2045_v34 = vadd.f32 %v2044_v2, %v4666_v21  ;;  %v2685_v36 = vadd.f32 %v2684_v4, %v2637_v44 }
 0x1ca   :  { %v889_v40 = vsel %vm4684_vm5, %v886_v49, %v883_v5  ;;  %v2038_v38 = vrot.slane %v4701_v6, 4  ;;  %v2636_v41 = vmul.f32 %v4701_v6, %v4701_v6  ;;  %v921_v42 = vadd.f32 1.0, %v920_v13 }
 0x1cb   :  { %v4064_v28 = vpop.eup %4063  ;;  %v923_v48 = vand.u32 2147483647, %v4655_v8  ;;  %v2669_v50 = vadd.f32 %v2668_v15, %v2667_v10  ;;  %v4723_v54 = vmul.f32 %v4637_v63, %v903_v26  ;;  %v911_v43 = vmul.f32 -0.5, %v4664_v18 }
 0x1cc   :  { %v874_v52 = vmul.f32 0.6931472, %v4064_v28  ;;  %v2034_v44 = vrot.slane %v2033_v35, 2  ;;  %v4726_v59 = vadd.f32 %v2028_v51, %v2027_v0  ;;  %v4730_v46 = vadd.f32 %v889_v40, %v681_v61  ;;  %v3974_v28 = vpop.f32.mrf.mxu1 }
 0x1cd   :  { %v750_v49 = vsub.f32 0.0, %v718_v14  ;;  %v2676_v20 = vrot.slane %v2675_v33, 1  ;;  %v2046_v2 = vrot.slane %v2045_v34, 2  ;;  %v2686_v4 = vrot.slane %v2685_v36, 2 }
 0x1ce   :  { %v4066_v1 = vpop.eup %4065  ;;  %v4733_v10 = vmul.f32 %v4646_v3, %v894_v29  ;;  %v2039_v5 = vadd.f32 %v2038_v38, %v4701_v6  ;;  %v2678_v13 = vrot.slane %v2636_v41, 4  ;;  %v922_v0 = vmul.f32 %v4655_v8, %v921_v42 }
 0x1cf   :  { %vm4739_vm7 = vcmp.lt.f32.partialorder %v923_v48, 0.0004427343  ;;  %v2670_v61 = vrot.slane %v2669_v50, 1  ;;  %v880_v14 = vsel %vm4707_vm6, %v877_v19, %v874_v52  ;;  %v912_v26 = vadd.f32 1.0, %v911_v43 }
 0x1d0   :  { %v4735_v63 = vpop.eup %4067  ;;  %v914_v3 = vand.u32 2147483647, %v4664_v18  ;;  %v4746_v29 = vadd.f32 %v2034_v44, %v2033_v35  ;;  %v2639_v38 = vmul.f32 %v4730_v46, %v4730_v46  ;;  %v4752_v48 = vadd.f32 %v2676_v20, %v2675_v33 }
 0x1d1   :  { %v4070_v39 = vpop.eup %4069  ;;  %v4754_v31 = vadd.f32 %v2046_v2, %v2045_v34  ;;  %v4756_v19 = vadd.f32 %v2686_v4, %v2685_v36  ;;  %v935_v23 = vadd.f32 1.0, %v4735_v63  ;;  %v2040_v52 = vrot.slane %v2039_v5, 2 }
 0x1d2   :  { %v4072_v51 = vpop.eup %4071  ;;  %v2679_v43 = vadd.f32 %v2678_v13, %v2636_v41  ;;  %v4761_v35 = vadd.f32 %v880_v14, %v680_v62  ;;  %vm4763_vm8 = vcmp.lt.f32.partialorder %v905_v9, 0.0004427343  ;;  %v792_v8 = vmul.f32 1.442695, %v750_v49  ;;  %v597_v62 = vpop.f32.mrf.mxu1 }
 0x1d3   :  { %v4074_v42 = vpop.eup %4073  ;;  %7450 = vst [vmem:[#allocation2_spill] sm:$0xff] %v4754_v31  ;;  %v4767_v40 = vadd.f32 %v2670_v61, %v2669_v50  ;;  %vm4769_vm9 = vcmp.lt.f32.partialorder %v896_v32, 0.0004427343  ;;  %v919_v34 = vmul.f32 0.6931472, %v4072_v51  ;;  %v4775_v36 = vadd.f32 %v4677_v37, %v4571_v22 }
 0x1d4   :  { %7451 = vst [vmem:[#allocation3_spill] sm:$0xff] %v4761_v35  ;;  %v4779_v45 = vadd.f32 %v4571_v22, %v4693_v58  ;;  %v2696_v9 = vrot.slane %v2639_v38, 4  ;;  %v910_v41 = vmul.f32 0.6931472, %v4074_v42  ;;  %4075 = vpow2.f32 %v792_v8 }
 0x1d5   :  { %v4783_v50 = vadd.f32 %v4711_v27, %v4571_v22  ;;  %v901_v32 = vmul.f32 0.6931472, %v4066_v1  ;;  %v892_v49 = vmul.f32 0.6931472, %v4070_v39  ;;  %4077 = vlog2.f32 %v935_v23  ;;  %v3977_v39 = vpop.f32.mrf.mxu1 }
 0x1d6   :  { %v721_v20 = vand.u32 2147483647, %v4775_v36  ;;  %v2688_v37 = vrot.slane %v4756_v19, 1  ;;  %v4787_v2 = vadd.f32 %v2040_v52, %v2039_v5  ;;  %v913_v58 = vmul.f32 %v4664_v18, %v912_v26 }
 0x1d7   :  { %v720_v4 = vand.u32 2147483647, %v4779_v45  ;;  %v925_v13 = vsel %vm4739_vm7, %v922_v0, %v919_v34  ;;  %vm4793_vm10 = vcmp.lt.f32.partialorder %v914_v3, 0.0004427343  ;;  %v723_v1 = vand.u32 2147483647, %v4783_v50 }
 0x1d8   :  { %7456 = vst [vmem:[#allocation4_spill] sm:$0xff] %v4787_v2  ;;  %v753_v27 = vsub.f32 0.0, %v721_v20  ;;  %v2638_v14 = vmul.f32 %v4761_v35, %v4761_v35  ;;  %v916_v5 = vsel %vm4793_vm10, %v913_v58, %v910_v41  ;;  %v4803_v26 = vadd.f32 %v4571_v22, %v587_v56 }
 0x1d9   :  { %v752_v18 = vsub.f32 0.0, %v720_v4  ;;  %v2680_v15 = vrot.slane %v2679_v43, 2  ;;  %v755_v3 = vsub.f32 0.0, %v723_v1  ;;  %v4806_v51 = vadd.f32 %v3974_v28, %v4571_v22 }
 0x1da   :  { %v798_v0 = vmul.f32 1.442695, %v753_v27  ;;  %v4808_v8 = vadd.f32 %v2696_v9, %v2639_v38  ;;  %v2050_v42 = vrot.slane %v4761_v35, 4  ;;  %v4813_v23 = vadd.f32 %v925_v13, %v685_v12  ;;  %v607_v38 = vpop.f32.mrf.mxu1 }
 0x1db   :  { %v796_v52 = vmul.f32 1.442695, %v752_v18  ;;  %v907_v56 = vsel %vm4763_vm8, %v4723_v54, %v901_v32  ;;  %v4820_v34 = vadd.f32 %v916_v5, %v684_v16  ;;  %v722_v28 = vand.u32 2147483647, %v4803_v26 }
 0x1dc   :  { %4079 = vpow2.f32 %v798_v0  ;;  %v2690_v9 = vrot.slane %v2638_v14, 4  ;;  %v898_v57 = vsel %vm4769_vm9, %v4733_v10, %v892_v49  ;;  %v725_v12 = vand.u32 2147483647, %v4806_v51 }
 0x1dd   :  { %4081 = vpow2.f32 %v796_v52  ;;  %v802_v41 = vmul.f32 1.442695, %v755_v3  ;;  %v754_v20 = vsub.f32 0.0, %v722_v28  ;;  %v4828_v54 = vadd.f32 %v4571_v22, %v597_v62 }
 0x1de   :  { %v4831_v60 = vadd.f32 %v3977_v39, %v4571_v22  ;;  %v2643_v16 = vmul.f32 %v4813_v23, %v4813_v23  ;;  %v938_v44 = vmul.f32 -0.5, %v4735_v63  ;;  %v757_v32 = vsub.f32 0.0, %v725_v12 }
 0x1df   :  { %v4837_v33 = vadd.f32 %v4571_v22, %v607_v38  ;;  %v4839_v10 = vadd.f32 %v2680_v15, %v2679_v43  ;;  %v2642_v49 = vmul.f32 %v4820_v34, %v4820_v34  ;;  %v800_v58 = vmul.f32 1.442695, %v754_v20 }
 0x1e0   :  { %v724_v62 = vand.u32 2147483647, %v4828_v54  ;;  %v2691_v4 = vadd.f32 %v2690_v9, %v2638_v14  ;;  %v4846_v13 = vadd.f32 %v907_v56, %v683_v30  ;;  %v4850_v61 = vadd.f32 %v898_v57, %v682_v11 }
 0x1e1   :  { %v727_v27 = vand.u32 2147483647, %v4831_v60  ;;  %v4853_v1 = vpop.eup %4075  ;;  %4083 = vpow2.f32 %v802_v41  ;;  %v806_v43 = vmul.f32 1.442695, %v757_v32  ;;  %v726_v5 = vand.u32 2147483647, %v4837_v33 }
 0x1e2   :  { %7459 = vst [vmem:[#allocation5_spill] sm:$0xff] %v4846_v13  ;;  %7460 = vst [vmem:[#allocation6_spill] sm:$0xff] %v4850_v61  ;;  %v756_v39 = vsub.f32 0.0, %v724_v62  ;;  %v4078_v18 = vpop.eup %4077  ;;  %v2720_v15 = vrot.slane %v2643_v16, 4  ;;  %v2074_v14 = vrot.slane %v4820_v34, 4  ;;  %v939_v53 = vadd.f32 1.0, %v938_v44 }
 0x1e3   :  { %v926_v30 = vadd.f32 1.0, %v4853_v1  ;;  %v2714_v0 = vrot.slane %v2642_v49, 4  ;;  %4085 = vpow2.f32 %v800_v58  ;;  %v759_v11 = vsub.f32 0.0, %v727_v27 }
 0x1e4   :  { %v804_v55 = vmul.f32 1.442695, %v756_v39  ;;  %v2640_v3 = vmul.f32 %v4850_v61, %v4850_v61  ;;  %v941_v52 = vand.u32 2147483647, %v4735_v63  ;;  %v758_v56 = vsub.f32 0.0, %v726_v5 }
 0x1e5   :  { %4087 = vlog2.f32 %v926_v30  ;;  %v2080_v28 = vrot.slane %v4813_v23, 4  ;;  %v937_v38 = vmul.f32 0.6931472, %v4078_v18  ;;  %v810_v9 = vmul.f32 1.442695, %v759_v11 }
 0x1e6   :  { %4089 = vpow2.f32 %v806_v43  ;;  %v2692_v57 = vrot.slane %v2691_v4, 2  ;;  %v2721_v12 = vadd.f32 %v2720_v15, %v2643_v16  ;;  %v808_v41 = vmul.f32 1.442695, %v758_v56 }
 0x1e7   :  { %4091 = vpow2.f32 %v804_v55  ;;  %v2075_v20 = vadd.f32 %v2074_v14, %v4820_v34  ;;  %v2715_v44 = vadd.f32 %v2714_v0, %v2642_v49  ;;  %v940_v32 = vmul.f32 %v4735_v63, %v939_v53  ;;  %v3980_v55 = vpop.f32.mrf.mxu1 }
 0x1e8   :  { %4093 = vpow2.f32 %v810_v9  ;;  %v2698_v62 = vrot.slane %v4808_v8, 2  ;;  %v4868_v27 = vadd.f32 %v2050_v42, %v4761_v35  ;;  %v2702_v39 = vrot.slane %v2640_v3, 4 }
 0x1e9   :  { %v4864_v58 = vpop.eup %4079  ;;  %vm4870_vm11 = vcmp.lt.f32.partialorder %v941_v52, 0.0004427343  ;;  %v2682_v5 = vrot.slane %v4839_v10, 1  ;;  %v2081_v49 = vadd.f32 %v2080_v28, %v4813_v23  ;;  %v4883_v42 = vmul.f32 %v4846_v13, %v4846_v13 }
 0x1ea   :  { %7461 = vst [vmem:[#allocation7_spill] sm:$0xff] %v4868_v27  ;;  %v4874_v16 = vpop.eup %4081  ;;  %v943_v63 = vsel %vm4870_vm11, %v940_v32, %v937_v38  ;;  %v953_v18 = vadd.f32 1.0, %v4864_v58  ;;  %v2722_v15 = vrot.slane %v2721_v12, 2  ;;  %4095 = vpow2.f32 %v808_v41 }
 0x1eb   :  { %7464 = vst [vmem:[#allocation8_spill] sm:$0xff] %v4883_v42  ;;  %v944_v14 = vadd.f32 1.0, %v4874_v16  ;;  %v4886_v53 = vadd.f32 %v2692_v57, %v2691_v4  ;;  %v2076_v30 = vrot.slane %v2075_v20, 2  ;;  %v2716_v0 = vrot.slane %v2715_v44, 2 }
 0x1ec   :  { %4097 = vlog2.f32 %v953_v18  ;;  %v4888_v11 = vadd.f32 %v2702_v39, %v2640_v3  ;;  %v4892_v52 = vadd.f32 %v943_v63, %v687_v17  ;;  %v929_v56 = vmul.f32 -0.5, %v4853_v1 }
 0x1ed   :  { %7465 = vst [vmem:[#allocation9_spill] sm:$0xff] %v4886_v53  ;;  %4099 = vlog2.f32 %v944_v14  ;;  %v4898_v28 = vadd.f32 %v2688_v37, %v4756_v19  ;;  %v2082_v9 = vrot.slane %v2081_v49, 2  ;;  %v4905_v3 = vadd.f32 %v2682_v5, %v4839_v10 }
 0x1ee   :  { %7466 = vst [vmem:[#allocation10_spill] sm:$0xff] %v4888_v11  ;;  %7467 = vst [vmem:[#allocation11_spill] sm:$0xff] %v4892_v52  ;;  %v4902_v57 = vpop.eup %4083  ;;  %v4908_v25 = vadd.f32 %v2698_v62, %v4808_v8  ;;  %v2723_v17 = vadd.f32 %v2722_v15, %v2721_v12  ;;  %v4911_v41 = vadd.f32 %v3980_v55, %v4571_v22  ;;  %v930_v8 = vadd.f32 1.0, %v929_v56  ;;  %v617_v56 = vpop.f32.mrf.mxu1 }
 0x1ef   :  { %7468 = vst [vmem:[#allocation12_spill] sm:$0xff] %v4898_v28  ;;  %7469 = vst [vmem:[#allocation13_spill] sm:$0xff] %v4905_v3  ;;  %v4915_v32 = vadd.f32 %v2076_v30, %v2075_v20  ;;  %v2717_v39 = vadd.f32 %v2716_v0, %v2715_v44  ;;  %v2645_v10 = vmul.f32 %v4892_v52, %v4892_v52  ;;  %v932_v12 = vand.u32 2147483647, %v4853_v1 }
 0x1f0   :  { %7470 = vst [vmem:[#allocation14_spill] sm:$0xff] %v4908_v25  ;;  %v4917_v43 = vpop.eup %4085  ;;  %v4923_v5 = vadd.f32 %v2082_v9, %v2081_v49  ;;  %v971_v20 = vadd.f32 1.0, %v4902_v57  ;;  %v2724_v14 = vrot.slane %v2723_v17, 1  ;;  %v729_v55 = vand.u32 2147483647, %v4911_v41 }
 0x1f1   :  { %7471 = vst [vmem:[#allocation15_spill] sm:$0xff] %v4915_v32  ;;  %v2718_v9 = vrot.slane %v2717_v39, 1  ;;  %v2092_v63 = vrot.slane %v4892_v52, 4  ;;  %v2732_v38 = vrot.slane %v2645_v10, 4  ;;  %v931_v15 = vmul.f32 %v4853_v1, %v930_v8 }
 0x1f2   :  { %v4088_v62 = vpop.eup %4087  ;;  %vm4940_vm12 = vcmp.lt.f32.partialorder %v932_v12, 0.0004427343  ;;  %v962_v0 = vadd.f32 1.0, %v4917_v43  ;;  %v956_v18 = vmul.f32 -0.5, %v4864_v58  ;;  %4101 = vlog2.f32 %v971_v20 }
 0x1f3   :  { %v4928_v44 = vpop.eup %4089  ;;  %v928_v30 = vmul.f32 0.6931472, %v4088_v62  ;;  %v4948_v28 = vadd.f32 %v4571_v22, %v617_v56  ;;  %v947_v3 = vmul.f32 -0.5, %v4874_v16  ;;  %v761_v8 = vsub.f32 0.0, %v729_v55 }
 0x1f4   :  { %v4932_v19 = vpop.eup %4091  ;;  %v989_v49 = vadd.f32 1.0, %v4928_v44  ;;  %v4956_v53 = vadd.f32 %v2724_v14, %v2723_v17  ;;  %v4958_v25 = vadd.f32 %v2718_v9, %v2717_v39  ;;  %v2093_v2 = vadd.f32 %v2092_v63, %v4892_v52 }
 0x1f5   :  { %v4937_v37 = vpop.eup %4093  ;;  %v934_v4 = vsel %vm4940_vm12, %v931_v15, %v928_v30  ;;  %v980_v1 = vadd.f32 1.0, %v4932_v19  ;;  %v2733_v62 = vadd.f32 %v2732_v38, %v2645_v10  ;;  %4103 = vlog2.f32 %v962_v0 }
 0x1f6   :  { %7474 = vst [vmem:[#allocation16_spill] sm:$0xff] %v4956_v53  ;;  %7475 = vst [vmem:[#allocation17_spill] sm:$0xff] %v4958_v25  ;;  %v1007_v11 = vadd.f32 1.0, %v4937_v37  ;;  %v7476_v55 = vmax.f32 %v4653_v7, 0.0  ;;  %v957_v17 = vadd.f32 1.0, %v956_v18  ;;  %4105 = vlog2.f32 %v989_v49  ;;  %v3983_v18 = vpop.f32.mrf.mxu1 }
 0x1f7   :  { %v4954_v12 = vpop.eup %4095  ;;  %v959_v39 = vand.u32 2147483647, %v4864_v58  ;;  %v948_v14 = vadd.f32 1.0, %v947_v3  ;;  %4107 = vlog2.f32 %v980_v1  ;;  %v814_v9 = vmul.f32 1.442695, %v761_v8 }
 0x1f8   :  { %v4966_v31 = vadd.f32 %v934_v4, %v7476_v55  ;;  %v728_v20 = vand.u32 2147483647, %v4948_v28  ;;  %v950_v38 = vand.u32 2147483647, %v4874_v16  ;;  %4109 = vlog2.f32 %v1007_v11  ;;  %v5025_v15 = vpop.f32.mrf.mxu1 }
 0x1f9   :  { %v4098_v56 = vpop.eup %4097  ;;  %v2094_v10 = vrot.slane %v2093_v2, 2  ;;  %v998_v4 = vadd.f32 1.0, %v4954_v12  ;;  %v2734_v55 = vrot.slane %v2733_v62, 2  ;;  %v958_v49 = vmul.f32 %v4864_v58, %v957_v17 }
 0x1fa   :  { %v4100_v30 = vpop.eup %4099  ;;  %7477 = vst [vmem:[#allocation18_spill] sm:$0xff] %v4966_v31  ;;  %v955_v42 = vmul.f32 0.6931472, %v4098_v56  ;;  %v2644_v3 = vmul.f32 %v4966_v31, %v4966_v31  ;;  %vm4977_vm13 = vcmp.lt.f32.partialorder %v959_v39, 0.0004427343  ;;  %v949_v8 = vmul.f32 %v4874_v16, %v948_v14  ;;  %v3986_v61 = vpop.f32.mrf.mxu1 }
 0x1fb   :  { %v946_v0 = vmul.f32 0.6931472, %v4100_v30  ;;  %v974_v11 = vmul.f32 -0.5, %v4902_v57  ;;  %4111 = vpow2.f32 %v814_v9  ;;  %v760_v56 = vsub.f32 0.0, %v728_v20 }
 0x1fc   :  { %v961_v30 = vsel %vm4977_vm13, %v958_v49, %v955_v42  ;;  %vm4985_vm14 = vcmp.lt.f32.partialorder %v950_v38, 0.0004427343  ;;  %v965_v63 = vmul.f32 -0.5, %v4917_v43  ;;  %v4991_v58 = vadd.f32 %v3983_v18, %v4571_v22 }
 0x1fd   :  { %v952_v17 = vsel %vm4985_vm14, %v949_v8, %v946_v0  ;;  %4113 = vlog2.f32 %v998_v4  ;;  %v4997_v39 = vadd.f32 %v2734_v55, %v2733_v62  ;;  %v2726_v42 = vrot.slane %v2644_v3, 4 }
 0x1fe   :  { %v977_v14 = vand.u32 2147483647, %v4902_v57  ;;  %v812_v9 = vmul.f32 1.442695, %v760_v56  ;;  %v5000_v49 = vadd.f32 %v2094_v10, %v2093_v2  ;;  %v7483_v22 = vmax.f32 %v4775_v36, 0.0 }
 0x1ff   :  { %v4102_v38 = vpop.eup %4101  ;;  %v975_v7 = vadd.f32 1.0, %v974_v11  ;;  %v992_v0 = vmul.f32 -0.5, %v4928_v44  ;;  %v2086_v4 = vrot.slane %v4966_v31, 4  ;;  %v7485_v1 = vmax.f32 %v4779_v45, 0.0 }
 0x200   :  { %7482 = vst [vmem:[#allocation19_spill] sm:$0xff] %v5000_v49  ;;  %v5004_v18 = vadd.f32 %v961_v30, %v7483_v22  ;;  %v966_v55 = vadd.f32 1.0, %v965_v63  ;;  %v968_v8 = vand.u32 2147483647, %v4917_v43  ;;  %v995_v56 = vand.u32 2147483647, %v4928_v44 }
 0x201   :  { %v5010_v62 = vadd.f32 %v952_v17, %v7485_v1  ;;  %v983_v2 = vmul.f32 -0.5, %v4932_v19  ;;  %v1010_v36 = vmul.f32 -0.5, %v4937_v37  ;;  %4115 = vpow2.f32 %v812_v9 }
 0x202   :  { %7484 = vst [vmem:[#allocation20_spill] sm:$0xff] %v5004_v18  ;;  %v4104_v10 = vpop.eup %4103  ;;  %v2736_v11 = vrot.slane %v4997_v39, 1  ;;  %v2727_v30 = vadd.f32 %v2726_v42, %v2644_v3  ;;  %v973_v22 = vmul.f32 0.6931472, %v4102_v38  ;;  %vm5017_vm15 = vcmp.lt.f32.partialorder %v977_v14, 0.0004427343 }
 0x203   :  { %7486 = vst [vmem:[#allocation21_spill] sm:$0xff] %v5010_v62  ;;  %v4106_v45 = vpop.eup %4105  ;;  %v2647_v63 = vmul.f32 %v5004_v18, %v5004_v18  ;;  %v976_v17 = vmul.f32 %v4902_v57, %v975_v7  ;;  %v993_v1 = vadd.f32 1.0, %v992_v0  ;;  %v986_v16 = vand.u32 2147483647, %v4932_v19 }
 0x204   :  { %v4108_v9 = vpop.eup %4107  ;;  %v2087_v49 = vadd.f32 %v2086_v4, %v4966_v31  ;;  %v2646_v3 = vmul.f32 %v5010_v62, %v5010_v62  ;;  %v967_v42 = vmul.f32 %v4917_v43, %v966_v55  ;;  %vm5031_vm0 = vcmp.lt.f32.partialorder %v968_v8, 0.0004427343 }
 0x205   :  { %v4110_v38 = vpop.eup %4109  ;;  %vm5035_vm1 = vcmp.lt.f32.partialorder %v995_v56, 0.0004427343  ;;  %v984_v7 = vadd.f32 1.0, %v983_v2  ;;  %v1011_v0 = vadd.f32 1.0, %v1010_v36  ;;  %v1013_v27 = vand.u32 2147483647, %v4937_v37 }
 0x206   :  { %v2728_v13 = vrot.slane %v2727_v30, 2  ;;  %v979_v4 = vsel %vm5017_vm15, %v976_v17, %v973_v22  ;;  %v964_v25 = vmul.f32 0.6931472, %v4104_v10  ;;  %v1001_v43 = vmul.f32 -0.5, %v4954_v12 }
 0x207   :  { %v2744_v55 = vrot.slane %v2647_v63, 4  ;;  %v991_v8 = vmul.f32 0.6931472, %v4106_v45  ;;  %v994_v31 = vmul.f32 %v4928_v44, %v993_v1  ;;  %vm5044_vm2 = vcmp.lt.f32.partialorder %v986_v16, 0.0004427343 }
 0x208   :  { %v5048_v2 = vpop.eup %4111  ;;  %v2088_v36 = vrot.slane %v2087_v49, 2  ;;  %v2738_v32 = vrot.slane %v2646_v3, 4  ;;  %v982_v53 = vmul.f32 0.6931472, %v4108_v9  ;;  %v1009_v52 = vmul.f32 0.6931472, %v4110_v38 }
 0x209   :  { %v7495_v20 = vmax.f32 %v4783_v50, 0.0  ;;  %v985_v22 = vmul.f32 %v4932_v19, %v984_v7  ;;  %v1012_v45 = vmul.f32 %v4937_v37, %v1011_v0  ;;  %vm5056_vm3 = vcmp.lt.f32.partialorder %v1013_v27, 0.0004427343  ;;  %v637_v27 = vpop.f32.mrf.mxu1 }
 0x20a   :  { %v4114_v16 = vpop.eup %4113  ;;  %v2729_v17 = vadd.f32 %v2728_v13, %v2727_v30  ;;  %v2098_v1 = vrot.slane %v5010_v62, 4  ;;  %v970_v9 = vsel %vm5031_vm0, %v967_v42, %v964_v25  ;;  %v1002_v38 = vadd.f32 1.0, %v1001_v43 }
 0x20b   :  { %v5052_v10 = vadd.f32 %v979_v4, %v7495_v20  ;;  %v2745_v35 = vadd.f32 %v2744_v55, %v2647_v63  ;;  %v997_v50 = vsel %vm5035_vm1, %v994_v31, %v991_v8  ;;  %v1004_v19 = vand.u32 2147483647, %v4954_v12  ;;  %v3989_v55 = vpop.f32.mrf.mxu1 }
 0x20c   :  { %v1025_v37 = vadd.f32 1.0, %v5048_v2  ;;  %v5067_v7 = vadd.f32 %v2088_v36, %v2087_v49  ;;  %v2739_v0 = vadd.f32 %v2738_v32, %v2646_v3  ;;  %v988_v13 = vsel %vm5044_vm2, %v985_v22, %v982_v53 }
 0x20d   :  { %7496 = vst [vmem:[#allocation22_spill] sm:$0xff] %v5052_v10  ;;  %v1015_v30 = vsel %vm5056_vm3, %v1012_v45, %v1009_v52  ;;  %v5074_v25 = vadd.f32 %v2736_v11, %v4997_v39  ;;  %v5078_v31 = vmul.f32 %v5052_v10, %v5052_v10  ;;  %v7502_v63 = vmax.f32 %v4803_v26, 0.0 }
 0x20e   :  { %7499 = vst [vmem:[#allocation23_spill] sm:$0xff] %v5067_v7  ;;  %v1000_v49 = vmul.f32 0.6931472, %v4114_v16  ;;  %v5084_v14 = vpop.eup %4115  ;;  %v2730_v32 = vrot.slane %v2729_v17, 1  ;;  %v5087_v53 = vadd.f32 %v2098_v1, %v5010_v62  ;;  %v7505_v52 = vmax.f32 %v4806_v51, 0.0 }
 0x20f   :  { %7500 = vst [vmem:[#allocation24_spill] sm:$0xff] %v5074_v25  ;;  %7501 = vst [vmem:[#allocation25_spill] sm:$0xff] %v5078_v31  ;;  %v5082_v42 = vadd.f32 %v970_v9, %v7502_v63  ;;  %v1003_v39 = vmul.f32 %v4954_v12, %v1002_v38  ;;  %v2746_v11 = vrot.slane %v2745_v35, 2  ;;  %v7507_v57 = vmax.f32 %v4828_v54, 0.0 }
 0x210   :  { %7504 = vst [vmem:[#allocation27_spill] sm:$0xff] %v5087_v53  ;;  %v5091_v3 = vadd.f32 %v997_v50, %v7505_v52  ;;  %v7508_v26 = vmax.f32 %v4831_v60, 0.0  ;;  %4117 = vlog2.f32 %v1025_v37  ;;  %v2740_v51 = vrot.slane %v2739_v0, 2  ;;  %v647_v50 = vpop.f32.mrf.mxu1 }
 0x211   :  { %7503 = vst [vmem:[#allocation26_spill] sm:$0xff] %v5082_v42  ;;  %v5096_v4 = vadd.f32 %v988_v13, %v7507_v57  ;;  %vm1005_vm4 = vcmp.lt.f32.partialorder %v1004_v19, 0.0004427343  ;;  %v5107_v12 = vmul.f32 %v5082_v42, %v5082_v42  ;;  %v1016_v20 = vadd.f32 1.0, %v5084_v14 }
 0x212   :  { %7506 = vst [vmem:[#allocation28_spill] sm:$0xff] %v5091_v3  ;;  %v5100_v43 = vadd.f32 %v1015_v30, %v7508_v26  ;;  %v1006_v54 = vsel %vm1005_vm4, %v1003_v39, %v1000_v49  ;;  %v5110_v60 = vadd.f32 %v2730_v32, %v2729_v17  ;;  %v2128_v45 = vrot.slane %v5091_v3, 4 }
 0x213   :  { %v2651_v44 = vmul.f32 %v5091_v3, %v5091_v3  ;;  %v5116_v16 = vadd.f32 %v2746_v11, %v2745_v35  ;;  %v2650_v1 = vmul.f32 %v5096_v4, %v5096_v4  ;;  %v5123_v17 = vadd.f32 %v2740_v51, %v2739_v0  ;;  %v5133_v35 = vld [vmem:[%s7255_s4] ss:$0 sm:$0xff]  ;;  %v3992_v51 = vpop.f32.mrf.mxu1 }
 0x214   :  { %7509 = vst [vmem:[#allocation29_spill] sm:$0xff] %v5100_v43  ;;  %7510 = vst [vmem:[#allocation30_spill] sm:$0xff] %v5110_v60  ;;  %v2653_v9 = vmul.f32 %v5100_v43, %v5100_v43  ;;  %v7513_v19 = vmax.f32 %v4837_v33, 0.0  ;;  %v731_v13 = vand.u32 2147483647, %v4991_v58  ;;  %v5137_v30 = vadd.f32 %v5133_v35, %v5025_v15 }
 0x215   :  { %7511 = vst [vmem:[#allocation31_spill] sm:$0xff] %v5116_v16  ;;  %7512 = vst [vmem:[#allocation32_spill] sm:$0xff] %v5123_v17  ;;  %4119 = vlog2.f32 %v1016_v20  ;;  %v5141_v0 = vadd.f32 %v5133_v35, %v3986_v61  ;;  %v5144_v33 = vadd.f32 %v5133_v35, %v637_v27  ;;  %v5147_v49 = vadd.f32 %v2128_v45, %v5091_v3  ;;  %v657_v31 = vpop.f32.mrf.mxu1 }
 0x216   :  { %v5127_v37 = vadd.f32 %v1006_v54, %v7513_v19  ;;  %v2768_v32 = vrot.slane %v2651_v44, 4  ;;  %v2122_v52 = vrot.slane %v5096_v4, 4  ;;  %v730_v39 = vand.u32 2147483647, %v5137_v30 }
 0x217   :  { %v2762_v11 = vrot.slane %v2650_v1, 4  ;;  %v2780_v15 = vrot.slane %v2653_v9, 4  ;;  %v733_v57 = vand.u32 2147483647, %v5141_v0  ;;  %v732_v26 = vand.u32 2147483647, %v5144_v33 }
 0x218   :  { %7514 = vst [vmem:[#allocation33_spill] sm:$0xff] %v5127_v37  ;;  %v2652_v61 = vmul.f32 %v5127_v37, %v5127_v37  ;;  %v1028_v27 = vmul.f32 -0.5, %v5048_v2  ;;  %v763_v54 = vsub.f32 0.0, %v731_v13  ;;  %v5157_v20 = vadd.f32 %v5133_v35, %v3989_v55 }
 0x219   :  { %v762_v45 = vsub.f32 0.0, %v730_v39  ;;  %v765_v19 = vsub.f32 0.0, %v733_v57  ;;  %v764_v36 = vsub.f32 0.0, %v732_v26  ;;  %v5160_v8 = vadd.f32 %v5133_v35, %v647_v50 }
 0x21a   :  { %v2130_v22 = vrot.slane %v5147_v49, 2  ;;  %v2769_v56 = vadd.f32 %v2768_v32, %v2651_v44  ;;  %v2140_v38 = vrot.slane %v5100_v43, 4  ;;  %v735_v63 = vand.u32 2147483647, %v5157_v20 }
 0x21b   :  { %v2763_v25 = vadd.f32 %v2762_v11, %v2650_v1  ;;  %v2781_v60 = vadd.f32 %v2780_v15, %v2653_v9  ;;  %v822_v16 = vmul.f32 1.442695, %v765_v19  ;;  %v820_v13 = vmul.f32 1.442695, %v764_v36 }
 0x21c   :  { %v2774_v7 = vrot.slane %v2652_v61, 4  ;;  %v1031_v39 = vand.u32 2147483647, %v5048_v2  ;;  %v767_v57 = vsub.f32 0.0, %v735_v63  ;;  %v734_v50 = vand.u32 2147483647, %v5160_v8 }
 0x21d   :  { %v4118_v55 = vpop.eup %4117  ;;  %v1029_v26 = vadd.f32 1.0, %v1028_v27  ;;  %v818_v53 = vmul.f32 1.442695, %v763_v54  ;;  %v816_v10 = vmul.f32 1.442695, %v762_v45  ;;  %4121 = vpow2.f32 %v822_v16 }
 0x21e   :  { %4123 = vpow2.f32 %v820_v13  ;;  %v826_v44 = vmul.f32 1.442695, %v767_v57  ;;  %v766_v32 = vsub.f32 0.0, %v734_v50  ;;  %v5168_v1 = vadd.f32 %v5133_v35, %v657_v31 }
 0x21f   :  { %v2123_v36 = vadd.f32 %v2122_v52, %v5096_v4  ;;  %v1027_v9 = vmul.f32 0.6931472, %v4118_v55  ;;  %v1019_v11 = vmul.f32 -0.5, %v5084_v14  ;;  %v5173_v15 = vadd.f32 %v5133_v35, %v3992_v51  ;;  %v3995_v52 = vpop.f32.mrf.mxu1 }
 0x220   :  { %v2770_v63 = vrot.slane %v2769_v56, 2  ;;  %v2764_v19 = vrot.slane %v2763_v25, 2  ;;  %v2134_v27 = vrot.slane %v5127_v37, 4  ;;  %4125 = vpow2.f32 %v826_v44 }
 0x221   :  { %v2782_v16 = vrot.slane %v2781_v60, 2  ;;  %v1030_v54 = vmul.f32 %v5048_v2, %v1029_v26  ;;  %4127 = vpow2.f32 %v816_v10  ;;  %v824_v45 = vmul.f32 1.442695, %v766_v32 }
 0x222   :  { %v4120_v31 = vpop.eup %4119  ;;  %v2775_v13 = vadd.f32 %v2774_v7, %v2652_v61  ;;  %vm5177_vm5 = vcmp.lt.f32.partialorder %v1031_v39, 0.0004427343  ;;  %4129 = vpow2.f32 %v818_v53  ;;  %v736_v51 = vand.u32 2147483647, %v5168_v1  ;;  %v667_v61 = vpop.f32.mrf.mxu1 }
 0x223   :  { %v1033_v55 = vsel %vm5177_vm5, %v1030_v54, %v1027_v9  ;;  %v1020_v57 = vadd.f32 1.0, %v1019_v11  ;;  %4131 = vpow2.f32 %v824_v45  ;;  %v737_v50 = vand.u32 2147483647, %v5173_v15 }
 0x224   :  { %v2124_v44 = vrot.slane %v2123_v36, 2  ;;  %v2141_v2 = vadd.f32 %v2140_v38, %v5100_v43  ;;  %v2135_v10 = vadd.f32 %v2134_v27, %v5127_v37  ;;  %v1022_v7 = vand.u32 2147483647, %v5084_v14 }
 0x225   :  { %v2771_v39 = vadd.f32 %v2770_v63, %v2769_v56  ;;  %v2765_v53 = vadd.f32 %v2764_v19, %v2763_v25  ;;  %v1018_v26 = vmul.f32 0.6931472, %v4120_v31  ;;  %v7517_v32 = vrot.slane %v5107_v12, 4 }
 0x226   :  { %v2783_v11 = vadd.f32 %v2782_v16, %v2781_v60  ;;  %v7519_v54 = vmax.f32 %v4911_v41, 0.0  ;;  %v768_v38 = vsub.f32 0.0, %v736_v51  ;;  %v5199_v27 = vadd.f32 %v2130_v22, %v5147_v49 }
 0x227   :  { %v5192_v9 = vadd.f32 %v7517_v32, %v5107_v12  ;;  %v2776_v3 = vrot.slane %v2775_v13, 2  ;;  %v1021_v56 = vmul.f32 %v5084_v14, %v1020_v57  ;;  %v769_v25 = vsub.f32 0.0, %v737_v50 }
 0x228   :  { %v5196_v45 = vadd.f32 %v1033_v55, %v7519_v54  ;;  %7521 = vst [vmem:[#allocation36_spill] sm:$0xff] %v5199_v27  ;;  %v5202_v63 = vadd.f32 %v2124_v44, %v2123_v36  ;;  %v2142_v19 = vrot.slane %v2141_v2, 2  ;;  %v2136_v31 = vrot.slane %v2135_v10, 2 }
 0x229   :  { %7518 = vst [vmem:[#allocation34_spill] sm:$0xff] %v5192_v9  ;;  %vm5204_vm6 = vcmp.lt.f32.partialorder %v1022_v7, 0.0004427343  ;;  %v2772_v41 = vrot.slane %v2771_v39, 1  ;;  %v2766_v60 = vrot.slane %v2765_v53, 1  ;;  %v5211_v22 = vadd.f32 %v5133_v35, %v3995_v52 }
 0x22a   :  { %7520 = vst [vmem:[#allocation35_spill] sm:$0xff] %v5196_v45  ;;  %7522 = vst [vmem:[#allocation37_spill] sm:$0xff] %v5202_v63  ;;  %v1024_v16 = vsel %vm5204_vm6, %v1021_v56, %v1018_v26  ;;  %v5213_v49 = vpop.eup %4121  ;;  %v2784_v36 = vrot.slane %v2783_v11, 1  ;;  %v2655_v51 = vmul.f32 %v5196_v45, %v5196_v45  ;;  %v828_v55 = vmul.f32 1.442695, %v768_v38 }
 0x22b   :  { %v5218_v57 = vpop.eup %4123  ;;  %v2777_v44 = vadd.f32 %v2776_v3, %v2775_v13  ;;  %v1061_v7 = vadd.f32 1.0, %v5213_v49  ;;  %v830_v26 = vmul.f32 1.442695, %v769_v25  ;;  %v5223_v54 = vadd.f32 %v2142_v19, %v2141_v2 }
 0x22c   :  { %v5225_v52 = vadd.f32 %v2136_v31, %v2135_v10  ;;  %v7527_v56 = vmax.f32 %v4948_v28, 0.0  ;;  %v5233_v14 = vadd.f32 %v2772_v41, %v2771_v39  ;;  %v5235_v50 = vadd.f32 %v2766_v60, %v2765_v53 }
 0x22d   :  { %7525 = vst [vmem:[#allocation38_spill] sm:$0xff] %v5223_v54  ;;  %v5231_v38 = vpop.eup %4125  ;;  %4133 = vlog2.f32 %v1061_v7  ;;  %v739_v3 = vand.u32 2147483647, %v5211_v22  ;;  %v5240_v2 = vadd.f32 %v2784_v36, %v2783_v11  ;;  %v2792_v10 = vrot.slane %v2655_v51, 4 }
 0x22e   :  { %7526 = vst [vmem:[#allocation39_spill] sm:$0xff] %v5225_v52  ;;  %v5229_v12 = vadd.f32 %v1024_v16, %v7527_v56  ;;  %7529 = vst [vmem:[#allocation41_spill] sm:$0xff] %v5233_v14  ;;  %v5238_v13 = vpop.eup %4127  ;;  %v1052_v25 = vadd.f32 1.0, %v5218_v57  ;;  %4135 = vpow2.f32 %v828_v55  ;;  %v2778_v19 = vrot.slane %v2777_v44, 1 }
 0x22f   :  { %7530 = vst [vmem:[#allocation42_spill] sm:$0xff] %v5235_v50  ;;  %7531 = vst [vmem:[#allocation43_spill] sm:$0xff] %v5240_v2  ;;  %v5243_v28 = vpop.eup %4129  ;;  %v1079_v31 = vadd.f32 1.0, %v5231_v38  ;;  %4137 = vpow2.f32 %v830_v26  ;;  %v5247_v39 = vadd.f32 %v5133_v35, %v667_v61  ;;  %v1034_v16 = vadd.f32 1.0, %v5238_v13 }
 0x230   :  { %7528 = vst [vmem:[#allocation40_spill] sm:$0xff] %v5229_v12  ;;  %v5249_v53 = vpop.eup %4131  ;;  %v2654_v11 = vmul.f32 %v5229_v12, %v5229_v12  ;;  %4139 = vlog2.f32 %v1052_v25  ;;  %v771_v55 = vsub.f32 0.0, %v739_v3  ;;  %v2793_v7 = vadd.f32 %v2792_v10, %v2655_v51 }
 0x231   :  { %4141 = vlog2.f32 %v1079_v31  ;;  %v1070_v36 = vadd.f32 1.0, %v5249_v53  ;;  %v1043_v35 = vadd.f32 1.0, %v5243_v28  ;;  %v5260_v56 = vadd.f32 %v2778_v19, %v2777_v44 }
 0x232   :  { %v2146_v41 = vrot.slane %v5229_v12, 4  ;;  %v738_v25 = vand.u32 2147483647, %v5247_v39  ;;  %v2786_v32 = vrot.slane %v2654_v11, 4  ;;  %v834_v26 = vmul.f32 1.442695, %v771_v55 }
 0x233   :  { %7532 = vst [vmem:[#allocation44_spill] sm:$0xff] %v5260_v56  ;;  %4143 = vlog2.f32 %v1070_v36  ;;  %v2794_v44 = vrot.slane %v2793_v7, 2  ;;  %v1046_v61 = vmul.f32 -0.5, %v5243_v28  ;;  %v1064_v31 = vmul.f32 -0.5, %v5213_v49  ;;  %v5281_v55 = vld [vmem:[%s7256_s6] sm:$0xff] }
 0x234   :  { %4145 = vlog2.f32 %v1034_v16  ;;  %v5271_v36 = vadd.f32 %v2146_v41, %v5229_v12  ;;  %v770_v60 = vsub.f32 0.0, %v738_v25  ;;  %v2787_v2 = vadd.f32 %v2786_v32, %v2654_v11 }
 0x235   :  { %4147 = vlog2.f32 %v1043_v35  ;;  %v1067_v51 = vand.u32 2147483647, %v5213_v49  ;;  %v1055_v16 = vmul.f32 -0.5, %v5218_v57  ;;  %v1082_v3 = vmul.f32 -0.5, %v5231_v38 }
 0x236   :  { %7533 = vst [vmem:[#allocation45_spill] sm:$0xff] %v5271_v36  ;;  %v1037_v41 = vmul.f32 -0.5, %v5238_v13  ;;  %4149 = vpow2.f32 %v834_v26  ;;  %v5287_v11 = vadd.f32 %v2794_v44, %v2793_v7  ;;  %v4292_v10 = vmov 1966171168  }
 0x237   :  { %v1198_v56 = vunpack.c.l.s4 %v4292_v10  ;;  %v1200_v52 = vlaneseq  ;;  %v1047_v9 = vadd.f32 1.0, %v1046_v61  ;;  %v1065_v14 = vadd.f32 1.0, %v1064_v31 }
 0x238   :  { %7534 = vst [vmem:[#allocation46_spill] sm:$0xff] %v5287_v11  ;;  %v832_v26 = vmul.f32 1.442695, %v770_v60  ;;  %v2788_v35 = vrot.slane %v2787_v2, 2  ;;  %vm5295_vm7 = vcmp.lt.f32.partialorder %v1067_v51, 0.0004427343 }
 0x239   :  { %v1056_v7 = vadd.f32 1.0, %v1055_v16  ;;  %v1083_v44 = vadd.f32 1.0, %v1082_v3  ;;  %v1038_v11 = vadd.f32 1.0, %v1037_v41  ;;  %v1058_v27 = vand.u32 2147483647, %v5218_v57 }
 0x23a   :  { %v4134_v32 = vpop.eup %4133  ;;  %v1073_v45 = vmul.f32 -0.5, %v5249_v53  ;;  %v1085_v61 = vand.u32 2147483647, %v5231_v38  ;;  %v5303_v31 = vshrl.u32 %v1200_v52, 7  ;;  %v1845_v51 = vand.u32 127, %v1200_v52 }
 0x23b   :  { %v5290_v54 = vpop.eup %4135  ;;  %v1063_v10 = vmul.f32 0.6931472, %v4134_v32  ;;  %v1066_v36 = vmul.f32 %v5213_v49, %v1065_v14  ;;  %v1397_v3 = vadd.f32 1e-08, %v4627_v47  ;;  %v1057_v32 = vmul.f32 %v5218_v57, %v1056_v7 }
 0x23c   :  { %v5293_v12 = vpop.eup %4137  ;;  %v1088_v60 = vadd.f32 1.0, %v5290_v54  ;;  %v1084_v37 = vmul.f32 %v5231_v38, %v1083_v44  ;;  %v5311_v63 = vsub.s32 %v1845_v51, %v5303_v31  ;;  %v1074_v52 = vadd.f32 1.0, %v1073_v45 }
 0x23d   :  { %v4140_v19 = vpop.eup %4139  ;;  %v1097_v42 = vadd.f32 1.0, %v5293_v12  ;;  %v1069_v43 = vsel %vm5295_vm7, %v1066_v36, %v1063_v10  ;;  %4151 = vpow2.f32 %v832_v26  ;;  %v1199_v49 = vunpack.c.0.s8 %v1198_v56 }
 0x23e   :  { %v4142_v17 = vpop.eup %4141  ;;  %v1054_v50 = vmul.f32 0.6931472, %v4140_v19  ;;  %7537 = vst [vmem:[#allocation47_spill] sm:$0xff] %v5311_v63  ;;  %vm5315_vm8 = vcmp.lt.f32.partialorder %v1058_v27, 0.0004427343  ;;  %4153 = vlog2.f32 %v1088_v60  ;;  %v5328_v27 = vadd.f32 %v2788_v35, %v2787_v2 }
 0x23f   :  { %v1081_v16 = vmul.f32 0.6931472, %v4142_v17  ;;  %vm5319_vm9 = vcmp.lt.f32.partialorder %v1085_v61, 0.0004427343  ;;  %v1076_v38 = vand.u32 2147483647, %v5249_v53  ;;  %4155 = vlog2.f32 %v1397_v3 }
 0x240   :  { %v4144_v41 = vpop.eup %4143  ;;  %v1060_v25 = vsel %vm5315_vm8, %v1057_v32, %v1054_v50  ;;  %7542 = vst [vmem:[#allocation48_spill] sm:$0xff] %v5328_v27  ;;  %v1040_v36 = vand.u32 2147483647, %v5238_v13  ;;  %v7543_v26 = vmax.f32 %v5141_v0, 0.0  ;;  %v1100_v44 = vmul.f32 -0.5, %v5293_v12 }
 0x241   :  { %v4146_v14 = vpop.eup %4145  ;;  %v1087_v45 = vsel %vm5319_vm9, %v1084_v37, %v1081_v16  ;;  %v1072_v56 = vmul.f32 0.6931472, %v4144_v41  ;;  %v1075_v61 = vmul.f32 %v5249_v53, %v1074_v52  ;;  %4157 = vlog2.f32 %v1097_v42 }
 0x242   :  { %v4148_v19 = vpop.eup %4147  ;;  %v5333_v7 = vadd.f32 %v1069_v43, %v7543_v26  ;;  %v1036_v10 = vmul.f32 0.6931472, %v4146_v14  ;;  %v5338_v50 = vsub.s32 %v1199_v49, %v5303_v31  ;;  %v7545_v2 = vmax.f32 %v5144_v33, 0.0 }
 0x243   :  { %v5340_v37 = vpop.eup %4149  ;;  %v1045_v60 = vmul.f32 0.6931472, %v4148_v19  ;;  %v7547_v0 = vmax.f32 %v5157_v20, 0.0  ;;  %vm5350_vm10 = vcmp.lt.f32.partialorder %v1076_v38, 0.0004427343  ;;  %v1039_v42 = vmul.f32 %v5238_v13, %v1038_v11 }
 0x244   :  { %7544 = vst [vmem:[#allocation49_spill] sm:$0xff] %v5333_v7  ;;  %v5344_v35 = vadd.f32 %v1060_v25, %v7545_v2  ;;  %v1078_v53 = vsel %vm5350_vm10, %v1075_v61, %v1072_v56  ;;  %v1091_v16 = vmul.f32 -0.5, %v5290_v54  ;;  %v1118_v3 = vmul.f32 -0.5, %v5340_v37 }
 0x245   :  { %v5348_v43 = vadd.f32 %v1087_v45, %v7547_v0  ;;  %v1048_v33 = vmul.f32 %v5243_v28, %v1047_v9  ;;  %v7551_v41 = vand.u32 2147483647, %v5243_v28  ;;  %vm1041_vm12 = vcmp.lt.f32.partialorder %v1040_v36, 0.0004427343 }
 0x246   :  { %7546 = vst [vmem:[#allocation50_spill] sm:$0xff] %v5344_v35  ;;  %v2659_v32 = vmul.f32 %v5333_v7, %v5333_v7  ;;  %v1042_v13 = vsel %vm1041_vm12, %v1039_v42, %v1036_v10  ;;  %v1101_v11 = vadd.f32 1.0, %v1100_v44  ;;  %v1115_v52 = vadd.f32 1.0, %v5340_v37 }
 0x247   :  { %7548 = vst [vmem:[#allocation51_spill] sm:$0xff] %v5348_v43  ;;  %vm5362_vm11 = vcmp.lt.f32.partialorder %v7551_v41, 0.0004427343  ;;  %v5371_v49 = vrot.slane %v5281_v55, %v5338_v50  ;;  %v2658_v28 = vmul.f32 %v5344_v35, %v5344_v35  ;;  %v2661_v14 = vmul.f32 %v5348_v43, %v5348_v43 }
 0x248   :  { %v1051_v9 = vsel %vm5362_vm11, %v1048_v33, %v1045_v60  ;;  %v7554_v17 = vmax.f32 %v5160_v8, 0.0  ;;  %v1092_v19 = vadd.f32 1.0, %v1091_v16  ;;  %v1094_v25 = vand.u32 2147483647, %v5290_v54 }
 0x249   :  { %v1119_v45 = vadd.f32 1.0, %v1118_v3  ;;  %v7555_v56 = vmax.f32 %v5137_v30, 0.0  ;;  %v2176_v26 = vrot.slane %v5333_v7, 4  ;;  %v2816_v44 = vrot.slane %v2659_v32, 4 }
 0x24a   :  { %v5381_v57 = vadd.f32 %v1078_v53, %v7554_v17  ;;  %v1103_v10 = vand.u32 2147483647, %v5293_v12  ;;  %v7557_v61 = vmax.f32 %v4991_v58, 0.0  ;;  %v2170_v60 = vrot.slane %v5344_v35, 4  ;;  %v5398_v0 = vpop.eup %4151 }
 0x24b   :  { %v5387_v36 = vadd.f32 %v1042_v13, %v7555_v56  ;;  %4159 = vlog2.f32 %v1115_v52  ;;  %v1211_v2 = vcombine.high %v5371_v49, %v5371_v49  ;;  %v2810_v30 = vrot.slane %v2658_v28, 4  ;;  %v4154_v16 = vpop.eup %4153 }
 0x24c   :  { %v5393_v8 = vadd.f32 %v1051_v9, %v7557_v61  ;;  %v2828_v51 = vrot.slane %v2661_v14, 4  ;;  %v2660_v42 = vmul.f32 %v5381_v57, %v5381_v57  ;;  %v5403_v53 = vmul.f32 %v5293_v12, %v1101_v11  ;;  %v4156_v20 = vpop.eup %4155 }
 0x24d   :  { %7556 = vst [vmem:[#allocation52_spill] sm:$0xff] %v5387_v36  ;;  %v1093_v58 = vmul.f32 %v5290_v54, %v1092_v19  ;;  %vm5406_vm13 = vcmp.lt.f32.partialorder %v1094_v25, 0.0004427343  ;;  %v5411_v33 = vmul.f32 %v5340_v37, %v1119_v45  ;;  %v1121_v41 = vand.u32 2147483647, %v5340_v37 }
 0x24e   :  { %7558 = vst [vmem:[#allocation53_spill] sm:$0xff] %v5393_v8  ;;  %v2656_v13 = vmul.f32 %v5387_v36, %v5387_v36  ;;  %v2177_v52 = vadd.f32 %v2176_v26, %v5333_v7  ;;  %v2817_v12 = vadd.f32 %v2816_v44, %v2659_v32  ;;  %v2188_v11 = vrot.slane %v5348_v43, 4  ;;  %v4158_v25 = vpop.eup %4157 }
 0x24f   :  { %vm5418_vm14 = vcmp.lt.f32.partialorder %v1103_v10, 0.0004427343  ;;  %v5424_v9 = vmul.f32 %v5393_v8, %v5393_v8  ;;  %v2171_v17 = vadd.f32 %v2170_v60, %v5344_v35  ;;  %v5428_v37 = vrot.slane %v1211_v2, %v5338_v50 }
 0x250   :  { %v5431_v19 = vsub.s32 0, %v5303_v31  ;;  %v2811_v32 = vadd.f32 %v2810_v30, %v2658_v28  ;;  %v2829_v45 = vadd.f32 %v2828_v51, %v2661_v14  ;;  %v2182_v56 = vrot.slane %v5381_v57, 4  ;;  %v1157_v31 = vld [vmem:[%s7257_s5 + $0x8] sm:$0xff] }
 0x251   :  { %7563 = vst [vmem:[#allocation54_spill] sm:$0xff] %v5424_v9  ;;  %v2822_v26 = vrot.slane %v2660_v42, 4  ;;  %v1090_v44 = vmul.f32 0.6931472, %v4154_v16  ;;  %v1106_v10 = vadd.f32 1.0, %v5398_v0  ;;  %v2798_v27 = vrot.slane %v2656_v13, 4 }
 0x252   :  { %v1431_v61 = vmul.f32 0.6931472, %v4156_v20  ;;  %v2178_v60 = vrot.slane %v2177_v52, 2  ;;  %v2818_v63 = vrot.slane %v2817_v12, 2  ;;  %v2189_v2 = vadd.f32 %v2188_v11, %v5348_v43 }
 0x253   :  { %v2172_v28 = vrot.slane %v2171_v17, 2  ;;  %v1099_v14 = vmul.f32 0.6931472, %v4158_v25  ;;  %v1563_v51 = vrot.slane %v5428_v37, %v5431_v19  ;;  %v2812_v16 = vrot.slane %v2811_v32, 2 }
 0x254   :  { %v1493_v30 = vmul.f32 %v1431_v61, %v1157_v31  ;;  %v2830_v8 = vrot.slane %v2829_v45, 2  ;;  %v2183_v20 = vadd.f32 %v2182_v56, %v5381_v57  ;;  %v2823_v38 = vadd.f32 %v2822_v26, %v2660_v42 }
 0x255   :  { %v1096_v35 = vsel %vm5406_vm13, %v1093_v58, %v1090_v44  ;;  %4161 = vlog2.f32 %v1106_v10  ;;  %v2224_v43 = vrot.slane %v1157_v31, 4  ;;  %v5447_v7 = vadd.f32 %v2798_v27, %v2656_v13 }
 0x256   :  { %v1525_v11 = vsub.f32 %v4627_v47, %v1493_v30  ;;  %v5449_v25 = vadd.f32 %v2178_v60, %v2177_v52  ;;  %vm5451_vm15 = vcmp.lt.f32.partialorder %v1121_v41, 0.0004427343  ;;  %v2859_v62 = vmul.f32 %v1157_v31, %v1157_v31  ;;  %v5465_v41 = vld [vmem:[%s7257_s5] sm:$0xff] }
 0x257   :  { %7564 = vst [vmem:[#allocation55_spill] sm:$0xff] %v5447_v7  ;;  %v2819_v56 = vadd.f32 %v2818_v63, %v2817_v12  ;;  %v1105_v42 = vsel %vm5418_vm14, %v5403_v53, %v1099_v14  ;;  %v2225_v3 = vadd.f32 %v2224_v43, %v1157_v31  ;;  %v2813_v44 = vadd.f32 %v2812_v16, %v2811_v32 }
 0x258   :  { %v1717_v58 = vmul.f32 %v1563_v51, %v1525_v11  ;;  %v4160_v26 = vpop.eup %4159  ;;  %v2190_v10 = vrot.slane %v2189_v2, 2  ;;  %v7567_v27 = vmax.f32 %v5168_v1, 0.0  ;;  %v1396_v63 = vadd.f32 1e-08, %v4629_v24 }
 0x259   :  { %v5468_v52 = vadd.f32 %v2172_v28, %v2171_v17  ;;  %v2831_v12 = vadd.f32 %v2830_v8, %v2829_v45  ;;  %v2184_v53 = vrot.slane %v2183_v20, 2  ;;  %v2824_v54 = vrot.slane %v2823_v38, 2 }
 0x25a   :  { %v5460_v13 = vadd.f32 %v1096_v35, %v7567_v27  ;;  %1750 = vadd.xlane.f32.xlu0 %v1717_v58  ;;  %v7568_v43 = vmax.f32 %v5173_v15, 0.0  ;;  %v2226_v1 = vrot.slane %v2225_v3, 2  ;;  %v2896_v35 = vrot.slane %v2859_v62, 4 }
 0x25b   :  { %4163 = vlog2.f32 %v1396_v63  ;;  %v1117_v30 = vmul.f32 0.6931472, %v4160_v26  ;;  %v2218_v51 = vrot.slane %v5465_v41, 4  ;;  %v2820_v17 = vrot.slane %v2819_v56, 1 }
 0x25c   :  { %v5472_v32 = vadd.f32 %v1105_v42, %v7568_v43  ;;  %v2814_v28 = vrot.slane %v2813_v44, 1  ;;  %v2662_v8 = vmul.f32 %v5460_v13, %v5460_v13  ;;  %v2411_v45 = vmul.f32 %v1157_v31, %v4627_v47 }
 0x25d   :  { %v5480_v15 = vadd.f32 %v2190_v10, %v2189_v2  ;;  %v2832_v16 = vrot.slane %v2831_v12, 1  ;;  %v5482_v11 = vadd.f32 %v2184_v53, %v2183_v20  ;;  %v2825_v42 = vadd.f32 %v2824_v54, %v2823_v38 }
 0x25e   :  { %7569 = vst [vmem:[#allocation56_spill] sm:$0xff] %v5472_v32  ;;  %v2663_v26 = vmul.f32 %v5472_v32, %v5472_v32  ;;  %v2227_v27 = vadd.f32 %v2226_v1, %v2225_v3  ;;  %v2897_v63 = vadd.f32 %v2896_v35, %v2859_v62  ;;  %v1123_v43 = vsel %vm5451_vm15, %v5411_v33, %v1117_v30 }
 0x25f   :  { %7570 = vst [vmem:[#allocation57_spill] sm:$0xff] %v5480_v15  ;;  %7571 = vst [vmem:[#allocation58_spill] sm:$0xff] %v5482_v11  ;;  %v1109_v60 = vmul.f32 -0.5, %v5398_v0  ;;  %v2219_v47 = vadd.f32 %v2218_v51, %v5465_v41  ;;  %v2858_v2 = vmul.f32 %v5465_v41, %v5465_v41  ;;  %v5494_v31 = vadd.f32 %v2820_v17, %v2819_v56  ;;  %v7602_v15 = vld [vmem:[#allocation11_spill] sm:$0xff] }
 0x260   :  { %v5496_v38 = vadd.f32 %v2814_v28, %v2813_v44  ;;  %v2834_v20 = vrot.slane %v2662_v8, 4  ;;  %v2448_v10 = vrot.slane %v2411_v45, 4  ;;  %v5498_v53 = vadd.f32 %v2832_v16, %v2831_v12 }
 0x261   :  { %v2826_v3 = vrot.slane %v2825_v42, 1  ;;  %v2840_v54 = vrot.slane %v2663_v26, 4  ;;  %v7573_v1 = vmax.f32 %v5211_v22, 0.0  ;;  %v2228_v30 = vrot.slane %v2227_v27, 1 }
 0x262   :  { %7572 = vst [vmem:[#allocation59_spill] sm:$0xff] %v5498_v53  ;;  %v4162_v61 = vpop.eup %4161  ;;  %v2898_v56 = vrot.slane %v2897_v63, 2  ;;  %v1110_v51 = vadd.f32 1.0, %v1109_v60  ;;  %v2220_v44 = vrot.slane %v2219_v47, 2  ;;  %v2890_v17 = vrot.slane %v2858_v2, 4 }
 0x263   :  { %v5504_v35 = vadd.f32 %v1123_v43, %v7573_v1  ;;  %v1399_v28 = vadd.f32 1e-08, %v4666_v21  ;;  %v2835_v12 = vadd.f32 %v2834_v20, %v2662_v8  ;;  %v1112_v16 = vand.u32 2147483647, %v5398_v0 }
 0x264   :  { %v7575_v62 = vrot.slane %v4746_v29, 1  ;;  %v2449_v36 = vadd.f32 %v2448_v10, %v2411_v45  ;;  %v1108_v58 = vmul.f32 0.6931472, %v4162_v61  ;;  %v5513_v22 = vrot.slane %v5371_v49, %v5338_v50 }
 0x265   :  { %7574 = vst [vmem:[#allocation60_spill] sm:$0xff] %v5504_v35  ;;  %v2410_v60 = vmul.f32 %v5465_v41, %v4629_v24  ;;  %4165 = vlog2.f32 %v1399_v28  ;;  %v5517_v43 = vadd.f32 %v2826_v3, %v2825_v42  ;;  %v2194_v8 = vrot.slane %v5460_v13, 4 }
 0x266   :  { %v2037_v33 = vadd.f32 %v7575_v62, %v4746_v29  ;;  %v2229_v20 = vadd.f32 %v2228_v30, %v2227_v27  ;;  %v2899_v1 = vadd.f32 %v2898_v56, %v2897_v63  ;;  %v2841_v53 = vadd.f32 %v2840_v54, %v2663_v26 }
 0x267   :  { %7576 = vst [vmem:[#allocation61_spill] sm:$0xff] %v5517_v43  ;;  %v1111_v29 = vmul.f32 %v5398_v0, %v1110_v51  ;;  %v2221_v45 = vadd.f32 %v2220_v44, %v2219_v47  ;;  %v2891_v10 = vadd.f32 %v2890_v17, %v2858_v2  ;;  %v2836_v62 = vrot.slane %v2835_v12, 2 }
 0x268   :  { %v4164_v14 = vpop.eup %4163  ;;  %vm5521_vm0 = vcmp.lt.f32.partialorder %v1112_v16, 0.0004427343  ;;  %v2450_v61 = vrot.slane %v2449_v36, 2  ;;  %v3179_v3 = vmul.f32 %v2037_v33, %v2037_v33  ;;  %v1559_v27 = vrot.slane %v5513_v22, %v5431_v19 }
 0x269   :  { %v1429_v11 = vmul.f32 0.6931472, %v4164_v14  ;;  %v1114_v42 = vsel %vm5521_vm0, %v1111_v29, %v1108_v58  ;;  %v2442_v63 = vrot.slane %v2410_v60, 4  ;;  %v2900_v26 = vrot.slane %v2899_v1, 1 }
 0x26a   :  { %v3275_v54 = vmul.f32 %v2229_v20, %v2229_v20  ;;  %v1398_v47 = vadd.f32 1e-08, %v4701_v6  ;;  %v5533_v2 = vmul.f32 %v5504_v35, %v5504_v35  ;;  %v7580_v14 = vrot.slane %v4726_v59, 1 }
 0x26b   :  { %v1492_v0 = vmul.f32 %v1429_v11, %v5465_v41  ;;  %v2222_v58 = vrot.slane %v2221_v45, 1  ;;  %v2892_v56 = vrot.slane %v2891_v10, 2  ;;  %v5541_v51 = vadd.f32 %v2194_v8, %v5460_v13 }
 0x26c   :  { %7579 = vst [vmem:[#allocation62_spill] sm:$0xff] %v5533_v2  ;;  %v5538_v30 = vadd.f32 %v7580_v14, %v4726_v59  ;;  %v2451_v44 = vadd.f32 %v2450_v61, %v2449_v36  ;;  %4167 = vlog2.f32 %v1398_v47  ;;  %v2842_v41 = vrot.slane %v2841_v53, 2  ;;  %v1159_v59 = vld [vmem:[%s7257_s5 + $0x18] sm:$0xff] }
 0x26d   :  { %7581 = vst [vmem:[#allocation63_spill] sm:$0xff] %v5541_v51  ;;  %v1524_v17 = vsub.f32 %v4629_v24, %v1492_v0  ;;  %v5544_v11 = vadd.f32 %v2836_v62, %v2835_v12  ;;  %v7583_v28 = vmax.f32 %v5247_v39, 0.0  ;;  %v3211_v29 = vmul.f32 0.125, %v3179_v3 }
 0x26e   :  { %v2901_v49 = vadd.f32 %v2900_v26, %v2899_v1  ;;  %v3307_v14 = vmul.f32 0.125, %v3275_v54  ;;  %v2443_v43 = vadd.f32 %v2442_v63, %v2410_v60  ;;  %v5554_v24 = vadd.f32 %v2222_v58, %v2221_v45 }
 0x26f   :  { %7582 = vst [vmem:[#allocation64_spill] sm:$0xff] %v5544_v11  ;;  %v5548_v16 = vadd.f32 %v1114_v42, %v7583_v28  ;;  %v1716_v8 = vmul.f32 %v1559_v27, %v1524_v17  ;;  %v2893_v61 = vadd.f32 %v2892_v56, %v2891_v10  ;;  %v3178_v12 = vmul.f32 %v5538_v30, %v5538_v30 }
 0x270   :  { %v2452_v39 = vrot.slane %v2451_v44, 1  ;;  %v3083_v62 = vmul.f32 %v2229_v20, %v2037_v33  ;;  %v1243_v42 = vcombine.high %v5428_v37, %v5428_v37  ;;  %v2236_v3 = vrot.slane %v1159_v59, 4  ;;  %v1158_v33 = vld [vmem:[%s7257_s5 + $0x10] sm:$0xff] }
 0x271   :  { %7584 = vst [vmem:[#allocation65_spill] sm:$0xff] %v5548_v16  ;;  %1748 = vadd.xlane.f32.xlu0 %v1716_v8  ;;  %v5560_v0 = vadd.f32 %v2842_v41, %v2841_v53  ;;  %v3243_v45 = vsub.f32 %v4752_v48, %v3211_v29  ;;  %v2664_v10 = vmul.f32 %v5548_v16, %v5548_v16  ;;  %v2444_v26 = vrot.slane %v2443_v43, 2  ;;  %v5581_v41 = vld [vmem:[%s7257_s5 + $0x48] sm:$0xff] }
 0x272   :  { %v4166_v27 = vpop.eup %4165  ;;  %v3339_v63 = vsub.f32 %v2901_v49, %v3307_v14  ;;  %v1405_v37 = vadd.f32 1e-08, %v4813_v23  ;;  %v2894_v53 = vrot.slane %v2893_v61, 1  ;;  %v3210_v20 = vmul.f32 0.125, %v3178_v12 }
 0x273   :  { %7585 = vst [vmem:[#allocation66_spill] sm:$0xff] %v5560_v0  ;;  %v3274_v54 = vmul.f32 %v5554_v24, %v5554_v24  ;;  %v1435_v47 = vmul.f32 0.6931472, %v4166_v27  ;;  %v5573_v58 = vadd.f32 %v2452_v39, %v2451_v44  ;;  %v5575_v48 = vmul.f32 0.125, %v3083_v62  ;;  %v5587_v39 = vld [vmem:[%s7256_s6 + $0x8] sm:$0xff] }
 0x274   :  { %v1571_v56 = vrot.slane %v1243_v42, %v5431_v19  ;;  %v2237_v17 = vadd.f32 %v2236_v3, %v1159_v59  ;;  %v2861_v29 = vmul.f32 %v1159_v59, %v1159_v59  ;;  %v2230_v49 = vrot.slane %v1158_v33, 4 }
 0x275   :  { %7586 = vst [vmem:[#allocation67_spill] sm:$0xff] %v5573_v58  ;;  %7587 = vst [vmem:[#allocation68_spill] sm:$0xff] %v5575_v48  ;;  %v1495_v28 = vmul.f32 %v1435_v47, %v1159_v59  ;;  %4169 = vlog2.f32 %v1405_v37  ;;  %v2846_v14 = vrot.slane %v2664_v10, 4  ;;  %v3371_v8 = vmul.f32 %v3339_v63, %v3243_v45 }
 0x276   :  { %v2445_v12 = vadd.f32 %v2444_v26, %v2443_v43  ;;  %v2413_v44 = vmul.f32 %v1159_v59, %v4666_v21  ;;  %v2895_v62 = vadd.f32 %v2894_v53, %v2893_v61  ;;  %v3306_v42 = vmul.f32 0.125, %v3274_v54 }
 0x277   :  { %v1527_v3 = vsub.f32 %v4666_v21, %v1495_v28  ;;  %v2272_v27 = vrot.slane %v5581_v41, 4  ;;  %v3242_v47 = vsub.f32 %v4767_v40, %v3210_v20  ;;  %v2238_v60 = vrot.slane %v2237_v17, 2 }
 0x278   :  { %v1241_v45 = vcombine.high %v5513_v22, %v5513_v22  ;;  %v2860_v43 = vmul.f32 %v1158_v33, %v1158_v33  ;;  %v2908_v26 = vrot.slane %v2861_v29, 4  ;;  %v2231_v37 = vadd.f32 %v2230_v49, %v1158_v33 }
 0x279   :  { %v4168_v63 = vpop.eup %4167  ;;  %v1719_v59 = vmul.f32 %v1571_v56, %v1527_v3  ;;  %v5596_v36 = vrot.slane %v5587_v39, %v5338_v50  ;;  %v5598_v61 = vadd.f32 %v2846_v14, %v2664_v10  ;;  %v3403_v21 = vmax.f32 %v3371_v8, 0.0 }
 0x27a   :  { %v2446_v53 = vrot.slane %v2445_v12, 1  ;;  %v1433_v54 = vmul.f32 0.6931472, %v4168_v63  ;;  %v3338_v28 = vsub.f32 %v2895_v62, %v3306_v42  ;;  %v2460_v40 = vrot.slane %v2413_v44, 4 }
 0x27b   :  { %7588 = vst [vmem:[#allocation69_spill] sm:$0xff] %v5598_v61  ;;  %1754 = vadd.xlane.f32.xlu0 %v1719_v59  ;;  %v2273_v20 = vadd.f32 %v2272_v27, %v5581_v41  ;;  %v2867_v22 = vmul.f32 %v5581_v41, %v5581_v41  ;;  %v2239_v56 = vadd.f32 %v2238_v60, %v2237_v17  ;;  %v2902_v1 = vrot.slane %v2860_v43, 4 }
 0x27c   :  { %v1494_v3 = vmul.f32 %v1433_v54, %v1158_v33  ;;  %v1567_v49 = vrot.slane %v1241_v45, %v5431_v19  ;;  %v2909_v11 = vadd.f32 %v2908_v26, %v2861_v29  ;;  %v2232_v0 = vrot.slane %v2231_v37, 2 }
 0x27d   :  { %v1260_v10 = vcombine.high %v5596_v36, %v5596_v36  ;;  %v1401_v14 = vadd.f32 1e-08, %v4730_v46  ;;  %v3435_v8 = vadd.f32 1e-08, %v3403_v21  ;;  %v5609_v62 = vmul.f32 %v5554_v24, %v5538_v30 }
 0x27e   :  { %v1526_v42 = vsub.f32 %v4701_v6, %v1494_v3  ;;  %v2412_v60 = vmul.f32 %v1158_v33, %v4701_v6  ;;  %v2461_v17 = vadd.f32 %v2460_v40, %v2413_v44  ;;  %v2274_v27 = vrot.slane %v2273_v20, 2 }
 0x27f   :  { %7589 = vst [vmem:[#allocation70_spill] sm:$0xff] %v5609_v62  ;;  %v2944_v45 = vrot.slane %v2867_v22, 4  ;;  %4171 = vlog2.f32 %v1401_v14  ;;  %v3370_v29 = vmul.f32 %v3338_v28, %v3242_v47  ;;  %v2240_v63 = vrot.slane %v2239_v56, 1 }
 0x280   :  { %v1718_v59 = vmul.f32 %v1567_v49, %v1526_v42  ;;  %v2903_v26 = vadd.f32 %v2902_v1, %v2860_v43  ;;  %v2910_v2 = vrot.slane %v2909_v11, 2  ;;  %v2233_v21 = vadd.f32 %v2232_v0, %v2231_v37 }
 0x281   :  { %v5615_v51 = vrot.slane %v1260_v10, %v5338_v50  ;;  %4173 = vrsqrt.f32 %v3435_v8  ;;  %v5617_v24 = vadd.f32 %v2446_v53, %v2445_v12  ;;  %v2454_v6 = vrot.slane %v2412_v60, 4  ;;  %v5630_v12 = vld [vmem:[%s7257_s5 + $0x40] sm:$0xff] }
 0x282   :  { %v4170_v30 = vpop.eup %4169  ;;  %1752 = vadd.xlane.f32.xlu0 %v1718_v59  ;;  %v7591_v33 = vcombine.high %v5281_v55, %v5281_v55  ;;  %v2462_v1 = vrot.slane %v2461_v17, 2  ;;  %v2275_v43 = vadd.f32 %v2274_v27, %v2273_v20  ;;  %v2945_v28 = vadd.f32 %v2944_v45, %v2867_v22 }
 0x283   :  { %7590 = vst [vmem:[#allocation71_spill] sm:$0xff] %v5617_v24  ;;  %v1447_v47 = vmul.f32 0.6931472, %v4170_v30  ;;  %v3402_v0 = vmax.f32 %v3370_v29, 0.0  ;;  %v5625_v37 = vadd.f32 %v2240_v63, %v2239_v56  ;;  %v2904_v40 = vrot.slane %v2903_v26, 2 }
 0x284   :  { %v5623_v44 = vrot.slane %v7591_v33, %v5338_v50  ;;  %v1404_v53 = vadd.f32 1e-08, %v4820_v34  ;;  %v2911_v3 = vadd.f32 %v2910_v2, %v2909_v11  ;;  %v2234_v49 = vrot.slane %v2233_v21, 1 }
 0x285   :  { %7592 = vst [vmem:[#allocation72_spill] sm:$0xff] %v5625_v37  ;;  %v1501_v55 = vmul.f32 %v1447_v47, %v5581_v41  ;;  %v1595_v10 = vrot.slane %v5615_v51, %v5431_v19  ;;  %v2455_v20 = vadd.f32 %v2454_v6, %v2412_v60  ;;  %v2084_v22 = vrot.slane %v4923_v5, 1 }
 0x286   :  { %v1212_v56 = vcombine.high %v5623_v44, %v5623_v44  ;;  %4175 = vlog2.f32 %v1404_v53  ;;  %v2276_v8 = vrot.slane %v2275_v43, 1  ;;  %v2946_v42 = vrot.slane %v2945_v28, 2 }
 0x287   :  { %v1533_v14 = vsub.f32 %v4813_v23, %v1501_v55  ;;  %v2266_v27 = vrot.slane %v5630_v12, 4  ;;  %v3277_v2 = vmul.f32 %v5625_v37, %v5625_v37  ;;  %v2905_v11 = vadd.f32 %v2904_v40, %v2903_v26 }
 0x288   :  { %v2419_v45 = vmul.f32 %v5581_v41, %v4813_v23  ;;  %v2866_v60 = vmul.f32 %v5630_v12, %v5630_v12  ;;  %v5647_v29 = vadd.f32 %v2462_v1, %v2461_v17  ;;  %v5649_v63 = vadd.f32 %v2234_v49, %v2233_v21  ;;  %v7595_v41 = vld [vmem:[#allocation3_spill] sm:$0xff] }
 0x289   :  { %v1725_v59 = vmul.f32 %v1595_v10, %v1533_v14  ;;  %v2267_v30 = vadd.f32 %v2266_v27, %v5630_v12  ;;  %v3434_v6 = vadd.f32 1e-08, %v3402_v0  ;;  %v2912_v33 = vrot.slane %v2911_v3, 1 }
 0x28a   :  { %7593 = vst [vmem:[#allocation73_spill] sm:$0xff] %v5647_v29  ;;  %7594 = vst [vmem:[#allocation74_spill] sm:$0xff] %v5649_v63  ;;  %v2456_v47 = vrot.slane %v2455_v20, 2  ;;  %v5653_v53 = vadd.f32 %v2084_v22, %v4923_v5  ;;  %v5655_v26 = vadd.f32 %v2276_v8, %v2275_v43  ;;  %v2947_v40 = vadd.f32 %v2946_v42, %v2945_v28  ;;  %v1161_v5 = vld [vmem:[%s7257_s5 + $0x28] sm:$0xff] }
 0x28b   :  { %1766 = vadd.xlane.f32.xlu1 %v1725_v59  ;;  %v5658_v23 = vrot.slane %v1212_v56, %v5338_v50  ;;  %v1400_v17 = vadd.f32 1e-08, %v7595_v41  ;;  %v5661_v1 = vmul.f32 0.125, %v3277_v2  ;;  %v2906_v49 = vrot.slane %v2905_v11, 1 }
 0x28c   :  { %v4172_v21 = vpop.eup %4171  ;;  %v2496_v55 = vrot.slane %v2419_v45, 4  ;;  %v2938_v0 = vrot.slane %v2866_v60, 4  ;;  %v3276_v10 = vmul.f32 %v5649_v63, %v5649_v63  ;;  %v2268_v28 = vrot.slane %v2267_v30, 2 }
 0x28d   :  { %7596 = vst [vmem:[#allocation3_spill] sm:$0xff] %v5661_v1  ;;  %v1439_v43 = vmul.f32 0.6931472, %v4172_v21  ;;  %4177 = vlog2.f32 %v1400_v17  ;;  %v5668_v22 = vadd.f32 %v2912_v33, %v2911_v3  ;;  %v5670_v56 = vadd.f32 %v2456_v47, %v2455_v20  ;;  %v7608_v1 = vld [vmem:[#allocation18_spill] sm:$0xff] }
 0x28e   :  { %v3187_v14 = vmul.f32 %v5653_v53, %v5653_v53  ;;  %v2863_v8 = vmul.f32 %v1161_v5, %v1161_v5  ;;  %v5674_v42 = vpop.eup %4173  ;;  %v2948_v27 = vrot.slane %v2947_v40, 1  ;;  %v3283_v2 = vmul.f32 %v5655_v26, %v5655_v26 }
 0x28f   :  { %7597 = vst [vmem:[#allocation75_spill] sm:$0xff] %v5668_v22  ;;  %7598 = vst [vmem:[#allocation76_spill] sm:$0xff] %v5670_v56  ;;  %v1497_v59 = vmul.f32 %v1439_v43, %v1161_v5  ;;  %v1579_v21 = vrot.slane %v5658_v23, %v5431_v19  ;;  %4179 = vrsqrt.f32 %v3434_v6  ;;  %v2497_v20 = vadd.f32 %v2496_v55, %v2419_v45 }
 0x290   :  { %7599 = vst [vmem:[#allocation77_spill] sm:$0xff] %v5674_v42  ;;  %v2939_v33 = vadd.f32 %v2938_v0, %v2866_v60  ;;  %v5682_v47 = vadd.f32 %v2906_v49, %v2905_v11  ;;  %v5684_v17 = vmul.f32 0.125, %v3276_v10  ;;  %v2269_v61 = vadd.f32 %v2268_v28, %v2267_v30 }
 0x291   :  { %v1529_v54 = vsub.f32 %v4730_v46, %v1497_v59  ;;  %v2920_v7 = vrot.slane %v2863_v8, 4  ;;  %v5692_v6 = vrot.slane %v5596_v36, %v5338_v50  ;;  %v2949_v45 = vadd.f32 %v2948_v27, %v2947_v40  ;;  %v7603_v27 = vld [vmem:[#allocation16_spill] sm:$0xff] }
 0x292   :  { %7600 = vst [vmem:[#allocation78_spill] sm:$0xff] %v5682_v47  ;;  %7601 = vst [vmem:[#allocation79_spill] sm:$0xff] %v5684_v17  ;;  %v3219_v60 = vmul.f32 0.125, %v3187_v14  ;;  %v3315_v11 = vmul.f32 0.125, %v3283_v2  ;;  %v2498_v55 = vrot.slane %v2497_v20, 2  ;;  %v2418_v30 = vmul.f32 %v5630_v12, %v4820_v34 }
 0x293   :  { %v4176_v3 = vpop.eup %4175  ;;  %v1721_v49 = vmul.f32 %v1579_v21, %v1529_v54  ;;  %v2940_v10 = vrot.slane %v2939_v33, 2  ;;  %v2248_v59 = vrot.slane %v1161_v5, 4  ;;  %v2270_v43 = vrot.slane %v2269_v61, 1 }
 0x294   :  { %v1445_v0 = vmul.f32 0.6931472, %v4176_v3  ;;  %v1407_v36 = vadd.f32 1e-08, %v7602_v15  ;;  %v5700_v9 = vmul.f32 %v1161_v5, %v4730_v46  ;;  %v2921_v40 = vadd.f32 %v2920_v7, %v2863_v8  ;;  %v7604_v3 = vld [vmem:[#allocation15_spill] sm:$0xff]  ;;  %v1160_v7 = vld [vmem:[%s7257_s5 + $0x20] sm:$0xff] }
 0x295   :  { %1758 = vadd.xlane.f32.xlu0 %v1721_v49  ;;  %v1591_v14 = vrot.slane %v5692_v6, %v5431_v19  ;;  %v3251_v2 = vsub.f32 %v7603_v27, %v3219_v60  ;;  %v3347_v21 = vsub.f32 %v2949_v45, %v3315_v11  ;;  %v7605_v28 = vrot.slane %v7604_v3, 1  ;;  %v7606_v60 = vld [vmem:[#allocation6_spill] sm:$0xff] }
 0x296   :  { %v1500_v54 = vmul.f32 %v1445_v0, %v5630_v12  ;;  %4181 = vlog2.f32 %v1407_v36  ;;  %v2499_v49 = vadd.f32 %v2498_v55, %v2497_v20  ;;  %v2490_v35 = vrot.slane %v2418_v30, 4 }
 0x297   :  { %v5709_v56 = vadd.f32 %v7605_v28, %v7604_v3  ;;  %v2941_v37 = vadd.f32 %v2940_v10, %v2939_v33  ;;  %v5715_v12 = vadd.f32 %v2270_v43, %v2269_v61  ;;  %v5719_v8 = vrot.slane %v5623_v44, %v5338_v50  ;;  %v1167_v61 = vld [vmem:[%s7257_s5 + $0x58] sm:$0xff] }
 0x298   :  { %v1532_v29 = vsub.f32 %v4820_v34, %v1500_v54  ;;  %v2862_v45 = vmul.f32 %v1160_v7, %v1160_v7  ;;  %v1402_v11 = vadd.f32 1e-08, %v7606_v60  ;;  %v2249_v28 = vadd.f32 %v2248_v59, %v1161_v5 }
 0x299   :  { %v2922_v34 = vrot.slane %v2921_v40, 2  ;;  %v3379_v33 = vmul.f32 %v3347_v21, %v3251_v2  ;;  %v3186_v10 = vmul.f32 %v5709_v56, %v5709_v56  ;;  %v2500_v44 = vrot.slane %v2499_v49, 1 }
 0x29a   :  { %v4178_v0 = vpop.eup %4177  ;;  %v1724_v55 = vmul.f32 %v1591_v14, %v1532_v29  ;;  %4183 = vlog2.f32 %v1402_v11  ;;  %v2491_v43 = vadd.f32 %v2490_v35, %v2418_v30  ;;  %v2942_v54 = vrot.slane %v2941_v37, 1 }
 0x29b   :  { %v1437_v36 = vmul.f32 0.6931472, %v4178_v0  ;;  %v2242_v27 = vrot.slane %v1160_v7, 4  ;;  %v3282_v29 = vmul.f32 %v5715_v12, %v5715_v12  ;;  %v1575_v14 = vrot.slane %v5719_v8, %v5431_v19 }
 0x29c   :  { %1764 = vadd.xlane.f32.xlu1 %v1724_v55  ;;  %v5728_v5 = vpop.eup %4179  ;;  %v2914_v2 = vrot.slane %v2862_v45, 4  ;;  %v3091_v21 = vmul.f32 %v5655_v26, %v5653_v53  ;;  %v2250_v3 = vrot.slane %v2249_v28, 2  ;;  %v2284_v11 = vrot.slane %v1167_v61, 4 }
 0x29d   :  { %7607 = vst [vmem:[#allocation11_spill] sm:$0xff] %v5728_v5  ;;  %v1496_v59 = vmul.f32 %v1437_v36, %v1160_v7  ;;  %v2869_v0 = vmul.f32 %v1167_v61, %v1167_v61  ;;  %v3411_v35 = vmax.f32 %v3379_v33, 0.0  ;;  %v2923_v30 = vadd.f32 %v2922_v34, %v2921_v40 }
 0x29e   :  { %v3218_v55 = vmul.f32 0.125, %v3186_v10  ;;  %v2492_v63 = vrot.slane %v2491_v43, 2  ;;  %v2943_v16 = vadd.f32 %v2942_v54, %v2941_v37  ;;  %v2243_v42 = vadd.f32 %v2242_v27, %v1160_v7 }
 0x29f   :  { %v1528_v20 = vsub.f32 %v7595_v41, %v1496_v59  ;;  %v2414_v36 = vmul.f32 %v1160_v7, %v7595_v41  ;;  %v3314_v5 = vmul.f32 0.125, %v3282_v29  ;;  %v2915_v48 = vadd.f32 %v2914_v2, %v2862_v45 }
 0x2a0   :  { %v1406_v22 = vadd.f32 1e-08, %v7608_v1  ;;  %v5739_v17 = vadd.f32 %v2500_v44, %v2499_v49  ;;  %v5741_v53 = vmul.f32 0.125, %v3091_v21  ;;  %v2285_v26 = vadd.f32 %v2284_v11, %v1167_v61 }
 0x2a1   :  { %v1720_v58 = vmul.f32 %v1575_v14, %v1528_v20  ;;  %v2956_v33 = vrot.slane %v2869_v0, 4  ;;  %v5743_v40 = vadd.f32 %v2250_v3, %v2249_v28  ;;  %v2924_v34 = vrot.slane %v2923_v30, 1  ;;  %v7611_v20 = vld [vmem:[#allocation17_spill] sm:$0xff] }
 0x2a2   :  { %7609 = vst [vmem:[#allocation16_spill] sm:$0xff] %v5739_v17  ;;  %7610 = vst [vmem:[#allocation15_spill] sm:$0xff] %v5741_v53  ;;  %v1292_v37 = vcombine.high %v5615_v51, %v5615_v51  ;;  %4185 = vlog2.f32 %v1406_v22  ;;  %v2493_v7 = vadd.f32 %v2492_v63, %v2491_v43  ;;  %v3250_v45 = vsub.f32 %v7611_v20, %v3218_v55  ;;  %v7627_v53 = vld [vmem:[#allocation37_spill] sm:$0xff] }
 0x2a3   :  { %1756 = vadd.xlane.f32.xlu0 %v1720_v58  ;;  %v4182_v41 = vpop.eup %4181  ;;  %v2244_v10 = vrot.slane %v2243_v42, 2  ;;  %v2466_v54 = vrot.slane %v2414_v36, 4  ;;  %v3443_v49 = vadd.f32 1e-08, %v3411_v35  ;;  %v3346_v44 = vsub.f32 %v2943_v16, %v3314_v5 }
 0x2a4   :  { %v2916_v27 = vrot.slane %v2915_v48, 2  ;;  %v1451_v29 = vmul.f32 0.6931472, %v4182_v41  ;;  %v2286_v59 = vrot.slane %v2285_v26, 2  ;;  %v2421_v28 = vmul.f32 %v1167_v61, %v7602_v15 }
 0x2a5   :  { %v2957_v14 = vadd.f32 %v2956_v33, %v2869_v0  ;;  %v1409_v58 = vadd.f32 1e-08, %v5004_v18  ;;  %v5750_v2 = vadd.f32 %v2924_v34, %v2923_v30  ;;  %v1603_v22 = vrot.slane %v1292_v37, %v5431_v19 }
 0x2a6   :  { %v1503_v51 = vmul.f32 %v1451_v29, %v1167_v61  ;;  %v1242_v63 = vcombine.high %v5719_v8, %v5719_v8  ;;  %v2494_v21 = vrot.slane %v2493_v7, 1  ;;  %v5755_v3 = vadd.f32 %v2244_v10, %v2243_v42  ;;  %v5763_v8 = vld [vmem:[%s7257_s5 + $0x30] sm:$0xff] }
 0x2a7   :  { %7612 = vst [vmem:[#allocation6_spill] sm:$0xff] %v5750_v2  ;;  %v4184_v43 = vpop.eup %4183  ;;  %v5757_v16 = vadd.f32 %v2466_v54, %v2414_v36  ;;  %4187 = vlog2.f32 %v1409_v58  ;;  %v3378_v5 = vmul.f32 %v3346_v44, %v3250_v45  ;;  %v2917_v11 = vadd.f32 %v2916_v27, %v2915_v48 }
 0x2a8   :  { %v1535_v0 = vsub.f32 %v7602_v15, %v1503_v51  ;;  %v1441_v35 = vmul.f32 0.6931472, %v4184_v43  ;;  %4189 = vrsqrt.f32 %v3443_v49  ;;  %v2287_v30 = vadd.f32 %v2286_v59, %v2285_v26  ;;  %v1166_v15 = vld [vmem:[%s7257_s5 + $0x50] sm:$0xff] }
 0x2a9   :  { %7613 = vst [vmem:[#allocation18_spill] sm:$0xff] %v5757_v16  ;;  %v2508_v61 = vrot.slane %v2421_v28, 4  ;;  %v2958_v55 = vrot.slane %v2957_v14, 2  ;;  %v1583_v36 = vrot.slane %v1242_v63, %v5431_v19  ;;  %v2864_v48 = vmul.f32 %v5763_v8, %v5763_v8 }
 0x2aa   :  { %v1727_v33 = vmul.f32 %v1603_v22, %v1535_v0  ;;  %v1498_v42 = vmul.f32 %v1441_v35, %v5763_v8  ;;  %v5772_v26 = vadd.f32 %v2494_v21, %v2493_v7  ;;  %v5776_v34 = vmul.f32 %v5715_v12, %v5709_v56  ;;  %v5790_v56 = vld [vmem:[%s7257_s5 + $0x80] sm:$0xff] }
 0x2ab   :  { %v7616_v41 = vcombine.high %v5587_v39, %v5587_v39  ;;  %v3410_v45 = vmax.f32 %v3378_v5, 0.0  ;;  %v2918_v54 = vrot.slane %v2917_v11, 1  ;;  %v2288_v12 = vrot.slane %v2287_v30, 1 }
 0x2ac   :  { %7614 = vst [vmem:[#allocation17_spill] sm:$0xff] %v5772_v26  ;;  %7615 = vst [vmem:[#allocation80_spill] sm:$0xff] %v5776_v34  ;;  %1770 = vadd.xlane.f32.xlu1 %v1727_v33  ;;  %v1530_v7 = vsub.f32 %v7606_v60, %v1498_v42  ;;  %v2509_v49 = vadd.f32 %v2508_v61, %v2421_v28  ;;  %v2959_v44 = vadd.f32 %v2958_v55, %v2957_v14  ;;  %vm1974_vm1 = vcmask 1041409  }
 0x2ad   :  { %v5783_v20 = vrot.slane %v7616_v41, %v5338_v50  ;;  %v2278_v27 = vrot.slane %v1166_v15, 4  ;;  %v2926_v39 = vrot.slane %v2864_v48, 4  ;;  %v1290_v59 = vcombine.high %v5692_v6, %v5692_v6 }
 0x2ae   :  { %v1722_v29 = vmul.f32 %v1583_v36, %v1530_v7  ;;  %v1412_v58 = vadd.f32 1e-08, %v5096_v4  ;;  %v2420_v22 = vmul.f32 %v1166_v15, %v7608_v1  ;;  %v2868_v63 = vmul.f32 %v1166_v15, %v1166_v15 }
 0x2af   :  { %v4186_v51 = vpop.eup %4185  ;;  %v1261_v43 = vcombine.high %v5783_v20, %v5783_v20  ;;  %v2314_v21 = vrot.slane %v5790_v56, 4  ;;  %v3442_v5 = vadd.f32 1e-08, %v3410_v45  ;;  %v5799_v28 = vadd.f32 %v2918_v54, %v2917_v11 }
 0x2b0   :  { %1760 = vadd.xlane.f32.xlu0 %v1722_v29  ;;  %v1449_v14 = vmul.f32 0.6931472, %v4186_v51  ;;  %4191 = vlog2.f32 %v1412_v58  ;;  %v5801_v0 = vadd.f32 %v2288_v12, %v2287_v30  ;;  %v2279_v6 = vadd.f32 %v2278_v27, %v1166_v15  ;;  %v7619_v29 = vld [vmem:[#allocation21_spill] sm:$0xff] }
 0x2b1   :  { %7617 = vst [vmem:[#allocation81_spill] sm:$0xff] %v5799_v28  ;;  %v2315_v35 = vadd.f32 %v2314_v21, %v5790_v56  ;;  %v2874_v61 = vmul.f32 %v5790_v56, %v5790_v56  ;;  %v2254_v55 = vrot.slane %v5763_v8, 4  ;;  %v2927_v33 = vadd.f32 %v2926_v39, %v2864_v48  ;;  %v7635_v28 = vld [vmem:[#allocation33_spill] sm:$0xff] }
 0x2b2   :  { %7618 = vst [vmem:[#allocation82_spill] sm:$0xff] %v5801_v0  ;;  %v1502_v42 = vmul.f32 %v1449_v14, %v1166_v15  ;;  %v1599_v36 = vrot.slane %v1290_v59, %v5431_v19  ;;  %v2960_v41 = vrot.slane %v2959_v44, 1  ;;  %v2502_v11 = vrot.slane %v2420_v22, 4 }
 0x2b3   :  { %v2950_v45 = vrot.slane %v2868_v63, 4  ;;  %v5809_v54 = vrot.slane %v1261_v43, %v5338_v50  ;;  %v2316_v12 = vrot.slane %v2315_v35, 2  ;;  %v2986_v27 = vrot.slane %v2874_v61, 4 }
 0x2b4   :  { %v4188_v30 = vpop.eup %4187  ;;  %v1534_v7 = vsub.f32 %v7608_v1, %v1502_v42  ;;  %v1408_v58 = vadd.f32 1e-08, %v7619_v29  ;;  %v2510_v51 = vrot.slane %v2509_v49, 2  ;;  %v3285_v48 = vmul.f32 %v5801_v0, %v5801_v0  ;;  %v1169_v1 = vld [vmem:[%s7257_s5 + $0x68] sm:$0xff] }
 0x2b5   :  { %v2280_v15 = vrot.slane %v2279_v6, 2  ;;  %v1455_v39 = vmul.f32 0.6931472, %v4188_v30  ;;  %v5815_v59 = vpop.eup %4189  ;;  %v5819_v21 = vmul.f32 %v5763_v8, %v7606_v60  ;;  %v2928_v43 = vrot.slane %v2927_v33, 2  ;;  %v5829_v30 = vld [vmem:[%s7256_s6 + $0x10] sm:$0xff] }
 0x2b6   :  { %7620 = vst [vmem:[#allocation21_spill] sm:$0xff] %v5815_v59  ;;  %v1726_v14 = vmul.f32 %v1599_v36, %v1534_v7  ;;  %4193 = vlog2.f32 %v1408_v58  ;;  %v2503_v42 = vadd.f32 %v2502_v11, %v2420_v22  ;;  %v2951_v37 = vadd.f32 %v2950_v45, %v2868_v63 }
 0x2b7   :  { %v1505_v10 = vmul.f32 %v1455_v39, %v1169_v1  ;;  %v1611_v0 = vrot.slane %v5809_v54, %v5431_v19  ;;  %v5831_v59 = vadd.f32 %v2960_v41, %v2959_v44  ;;  %v5834_v36 = vadd.f32 %v2254_v55, %v5763_v8 }
 0x2b8   :  { %1768 = vadd.xlane.f32.xlu1 %v1726_v14  ;;  %v2317_v7 = vadd.f32 %v2316_v12, %v2315_v35  ;;  %v2987_v17 = vadd.f32 %v2986_v27, %v2874_v61  ;;  %v5836_v58 = vmul.f32 0.125, %v3285_v48  ;;  %v2281_v22 = vadd.f32 %v2280_v15, %v2279_v6 }
 0x2b9   :  { %7621 = vst [vmem:[#allocation83_spill] sm:$0xff] %v5831_v59  ;;  %v1537_v63 = vsub.f32 %v5004_v18, %v1505_v10  ;;  %v2296_v11 = vrot.slane %v1169_v1, 4  ;;  %4195 = vrsqrt.f32 %v3442_v5  ;;  %v5839_v45 = vadd.f32 %v2928_v43, %v2927_v33 }
 0x2ba   :  { %7622 = vst [vmem:[#allocation84_spill] sm:$0xff] %v5836_v58  ;;  %v2871_v39 = vmul.f32 %v1169_v1, %v1169_v1  ;;  %v5843_v44 = vrot.slane %v5829_v30, %v5338_v50  ;;  %v5845_v41 = vadd.f32 %v2510_v51, %v2509_v49  ;;  %v2504_v8 = vrot.slane %v2503_v42, 2  ;;  %v7625_v49 = vld [vmem:[#allocation29_spill] sm:$0xff] }
 0x2bb   :  { %7623 = vst [vmem:[#allocation85_spill] sm:$0xff] %v5839_v45  ;;  %v2952_v55 = vrot.slane %v2951_v37, 2  ;;  %v1729_v35 = vmul.f32 %v1611_v0, %v1537_v63  ;;  %v2318_v10 = vrot.slane %v2317_v7, 1  ;;  %v2988_v5 = vrot.slane %v2987_v17, 2 }
 0x2bc   :  { %7624 = vst [vmem:[#allocation86_spill] sm:$0xff] %v5845_v41  ;;  %v5850_v6 = vrot.slane %v5843_v44, %v5338_v50  ;;  %v2282_v27 = vrot.slane %v2281_v22, 1  ;;  %v5854_v48 = vadd.f32 %v2296_v11, %v1169_v1  ;;  %v1415_v51 = vadd.f32 1e-08, %v7625_v49 }
 0x2bd   :  { %v4192_v33 = vpop.eup %4191  ;;  %1774 = vadd.xlane.f32.xlu1 %v1729_v35  ;;  %v2968_v15 = vrot.slane %v2871_v39, 4  ;;  %v2426_v14 = vmul.f32 %v5790_v56, %v5096_v4  ;;  %v5860_v63 = vadd.f32 %v2504_v8, %v2503_v42  ;;  %v2953_v61 = vadd.f32 %v2952_v55, %v2951_v37  ;;  %v1168_v42 = vld [vmem:[%s7257_s5 + $0x60] sm:$0xff] }
 0x2be   :  { %v1461_v43 = vmul.f32 0.6931472, %v4192_v33  ;;  %v7628_v26 = vrot.slane %v7627_v53, 1  ;;  %4197 = vlog2.f32 %v1415_v51  ;;  %v1623_v35 = vrot.slane %v5850_v6, %v5431_v19 }
 0x2bf   :  { %7626 = vst [vmem:[#allocation29_spill] sm:$0xff] %v5860_v63  ;;  %v5870_v0 = vadd.f32 %v2318_v10, %v2317_v7  ;;  %v2989_v33 = vadd.f32 %v2988_v5, %v2987_v17  ;;  %v5875_v8 = vadd.f32 %v2282_v27, %v2281_v22  ;;  %v2298_v37 = vrot.slane %v5854_v48, 2  ;;  %v7631_v27 = vld [vmem:[#allocation26_spill] sm:$0xff] }
 0x2c0   :  { %v5865_v12 = vadd.f32 %v7628_v26, %v7627_v53  ;;  %v1508_v11 = vmul.f32 %v1461_v43, %v5790_v56  ;;  %v5879_v53 = vmul.f32 %v1169_v1, %v5004_v18  ;;  %v2870_v26 = vmul.f32 %v1168_v42, %v1168_v42 }
 0x2c1   :  { %7629 = vst [vmem:[#allocation37_spill] sm:$0xff] %v5875_v8  ;;  %v2969_v55 = vadd.f32 %v2968_v15, %v2871_v39  ;;  %v2538_v51 = vrot.slane %v2426_v14, 4  ;;  %v5884_v7 = vrot.slane %v5783_v20, %v5338_v50  ;;  %v2954_v5 = vrot.slane %v2953_v61, 1  ;;  %v1175_v20 = vld [vmem:[%s7257_s5 + $0x98] sm:$0xff] }
 0x2c2   :  { %7630 = vst [vmem:[#allocation87_spill] sm:$0xff] %v5879_v53  ;;  %v1540_v56 = vsub.f32 %v5096_v4, %v1508_v11  ;;  %v3194_v22 = vmul.f32 %v5865_v12, %v5865_v12  ;;  %v1410_v43 = vadd.f32 1e-08, %v7631_v27  ;;  %v2990_v58 = vrot.slane %v2989_v33, 1 }
 0x2c3   :  { %v4194_v17 = vpop.eup %4193  ;;  %v3290_v39 = vmul.f32 %v5870_v0, %v5870_v0  ;;  %v3284_v15 = vmul.f32 %v5875_v8, %v5875_v8  ;;  %v2962_v11 = vrot.slane %v2870_v26, 4  ;;  %v1309_v10 = vcombine.high %v5843_v44, %v5843_v44 }
 0x2c4   :  { %v1732_v1 = vmul.f32 %v1623_v35, %v1540_v56  ;;  %v1453_v4 = vmul.f32 0.6931472, %v4194_v17  ;;  %4199 = vlog2.f32 %v1410_v43  ;;  %v2970_v63 = vrot.slane %v2969_v55, 2 }
 0x2c5   :  { %v2539_v59 = vadd.f32 %v2538_v51, %v2426_v14  ;;  %v1607_v56 = vrot.slane %v5884_v7, %v5431_v19  ;;  %v3226_v8 = vmul.f32 0.125, %v3194_v22  ;;  %v2332_v18 = vrot.slane %v1175_v20, 4  ;;  %v7636_v22 = vld [vmem:[#allocation42_spill] sm:$0xff] }
 0x2c6   :  { %1780 = vadd.xlane.f32.xlu0 %v1732_v1  ;;  %v1504_v35 = vmul.f32 %v1453_v4, %v1168_v42  ;;  %v5901_v17 = vpop.eup %4195  ;;  %v2991_v16 = vadd.f32 %v2990_v58, %v2989_v33  ;;  %v3322_v2 = vmul.f32 0.125, %v3290_v39  ;;  %v2290_v43 = vrot.slane %v1168_v42, 4 }
 0x2c7   :  { %7632 = vst [vmem:[#allocation88_spill] sm:$0xff] %v5901_v17  ;;  %v5907_v14 = vadd.f32 %v2954_v5, %v2953_v61  ;;  %v5909_v51 = vmul.f32 0.125, %v3284_v15  ;;  %v2963_v1 = vadd.f32 %v2962_v11, %v2870_v26  ;;  %v5912_v4 = vrot.slane %v1309_v10, %v5338_v50 }
 0x2c8   :  { %v1536_v44 = vsub.f32 %v7619_v29, %v1504_v35  ;;  %v2971_v17 = vadd.f32 %v2970_v63, %v2969_v55  ;;  %v2540_v34 = vrot.slane %v2539_v59, 2  ;;  %v1414_v41 = vadd.f32 1e-08, %v7635_v28 }
 0x2c9   :  { %7633 = vst [vmem:[#allocation89_spill] sm:$0xff] %v5907_v14  ;;  %7634 = vst [vmem:[#allocation90_spill] sm:$0xff] %v5909_v51  ;;  %v3258_v47 = vsub.f32 %v7636_v22, %v3226_v8  ;;  %v1341_v58 = vcombine.high %v5912_v4, %v5912_v4  ;;  %v2333_v33 = vadd.f32 %v2332_v18, %v1175_v20  ;;  %v2964_v10 = vrot.slane %v2963_v1, 2 }
 0x2ca   :  { %v1728_v53 = vmul.f32 %v1607_v56, %v1536_v44  ;;  %v2877_v39 = vmul.f32 %v1175_v20, %v1175_v20  ;;  %v3354_v5 = vsub.f32 %v2991_v16, %v3322_v2  ;;  %v2291_v15 = vadd.f32 %v2290_v43, %v1168_v42  ;;  %v5928_v2 = vld [vmem:[%s7257_s5 + $0x90] sm:$0xff] }
 0x2cb   :  { %v4198_v61 = vpop.eup %4197  ;;  %v2422_v26 = vmul.f32 %v1168_v42, %v7619_v29  ;;  %4201 = vlog2.f32 %v1414_v41  ;;  %v5922_v55 = vadd.f32 %v2298_v37, %v5854_v48  ;;  %v2972_v11 = vrot.slane %v2971_v17, 1  ;;  %v7638_v16 = vld [vmem:[#allocation28_spill] sm:$0xff]  ;;  %v5935_v48 = vld [vmem:[%s7257_s5 + $0x88] sm:$0xff] }
 0x2cc   :  { %1772 = vadd.xlane.f32.xlu1 %v1728_v53  ;;  %v1467_v8 = vmul.f32 0.6931472, %v4198_v61  ;;  %v2541_v35 = vadd.f32 %v2540_v34, %v2539_v59  ;;  %v2429_v18 = vmul.f32 %v1175_v20, %v7625_v49  ;;  %v1413_v29 = vadd.f32 1e-08, %v7638_v16 }
 0x2cd   :  { %7637 = vst [vmem:[#allocation33_spill] sm:$0xff] %v5922_v55  ;;  %v1635_v42 = vrot.slane %v1341_v58, %v5431_v19  ;;  %v2334_v53 = vrot.slane %v2333_v33, 2  ;;  %v3004_v56 = vrot.slane %v2877_v39, 4  ;;  %v3386_v34 = vmul.f32 %v3354_v5, %v3258_v47 }
 0x2ce   :  { %v1511_v41 = vmul.f32 %v1467_v8, %v1175_v20  ;;  %v2292_v59 = vrot.slane %v2291_v15, 2  ;;  %v2514_v37 = vrot.slane %v2422_v26, 4  ;;  %4203 = vlog2.f32 %v1413_v29 }
 0x2cf   :  { %v2965_v44 = vadd.f32 %v2964_v10, %v2963_v1  ;;  %v1291_v22 = vcombine.high %v5884_v7, %v5884_v7  ;;  %v2326_v20 = vrot.slane %v5928_v2, 4  ;;  %v5941_v61 = vadd.f32 %v2972_v11, %v2971_v17  ;;  %v5955_v17 = vld [vmem:[%s7257_s5 + $0x70] sm:$0xff] }
 0x2d0   :  { %v1543_v43 = vsub.f32 %v7625_v49, %v1511_v41  ;;  %v2542_v8 = vrot.slane %v2541_v35, 1  ;;  %v2556_v63 = vrot.slane %v2429_v18, 4  ;;  %v2320_v51 = vrot.slane %v5935_v48, 4 }
 0x2d1   :  { %v4200_v58 = vpop.eup %4199  ;;  %7639 = vst [vmem:[#allocation42_spill] sm:$0xff] %v5941_v61  ;;  %v2335_v47 = vadd.f32 %v2334_v53, %v2333_v33  ;;  %v3005_v5 = vadd.f32 %v3004_v56, %v2877_v39  ;;  %v5946_v1 = vmul.f32 %v5870_v0, %v5865_v12  ;;  %v3418_v49 = vmax.f32 %v3386_v34, 0.0 }
 0x2d2   :  { %v1735_v14 = vmul.f32 %v1635_v42, %v1543_v43  ;;  %v1457_v55 = vmul.f32 0.6931472, %v4200_v58  ;;  %v5948_v10 = vadd.f32 %v2292_v59, %v2291_v15  ;;  %v5950_v7 = vadd.f32 %v2514_v37, %v2422_v26 }
 0x2d3   :  { %7640 = vst [vmem:[#allocation28_spill] sm:$0xff] %v5946_v1  ;;  %v2966_v11 = vrot.slane %v2965_v44, 1  ;;  %v1615_v39 = vrot.slane %v1291_v22, %v5431_v19  ;;  %v2327_v29 = vadd.f32 %v2326_v20, %v5928_v2  ;;  %v5960_v12 = vadd.f32 %v2542_v8, %v2541_v35 }
 0x2d4   :  { %7641 = vst [vmem:[#allocation91_spill] sm:$0xff] %v5948_v10  ;;  %7642 = vst [vmem:[#allocation92_spill] sm:$0xff] %v5950_v7  ;;  %1786 = vadd.xlane.f32.xlu0 %v1735_v14  ;;  %v1506_v33 = vmul.f32 %v1457_v55, %v5955_v17  ;;  %v2557_v0 = vadd.f32 %v2556_v63, %v2429_v18  ;;  %v2321_v15 = vadd.f32 %v2320_v51, %v5935_v48  ;;  %vm1976_vm2 = vcmask 1042434  }
 0x2d5   :  { %7643 = vst [vmem:[#allocation93_spill] sm:$0xff] %v5960_v12  ;;  %v2875_v26 = vmul.f32 %v5935_v48, %v5935_v48  ;;  %v2336_v41 = vrot.slane %v2335_v47, 1  ;;  %v3006_v42 = vrot.slane %v3005_v5, 2  ;;  %v2872_v14 = vmul.f32 %v5955_v17, %v5955_v17 }
 0x2d6   :  { %v1538_v53 = vsub.f32 %v7631_v27, %v1506_v33  ;;  %v3450_v55 = vadd.f32 1e-08, %v3418_v49  ;;  %v1339_v35 = vcombine.high %v5850_v6, %v5850_v6  ;;  %v2876_v63 = vmul.f32 %v5928_v2, %v5928_v2  ;;  %v7646_v6 = vld [vmem:[#allocation35_spill] sm:$0xff] }
 0x2d7   :  { %v5974_v34 = vadd.f32 %v2966_v11, %v2965_v44  ;;  %v2328_v37 = vrot.slane %v2327_v29, 2  ;;  %v2558_v43 = vrot.slane %v2557_v0, 2  ;;  %v2322_v20 = vrot.slane %v2321_v15, 2 }
 0x2d8   :  { %v4202_v51 = vpop.eup %4201  ;;  %v1730_v59 = vmul.f32 %v1615_v39, %v1538_v53  ;;  %v2992_v58 = vrot.slane %v2875_v26, 4  ;;  %v5976_v8 = vadd.f32 %v2336_v41, %v2335_v47  ;;  %v3007_v49 = vadd.f32 %v3006_v42, %v3005_v5 }
 0x2d9   :  { %7644 = vst [vmem:[#allocation94_spill] sm:$0xff] %v5974_v34  ;;  %v1465_v22 = vmul.f32 0.6931472, %v4202_v51  ;;  %v2974_v33 = vrot.slane %v2872_v14, 4  ;;  %v1417_v56 = vadd.f32 1e-08, %v7646_v6  ;;  %4205 = vrsqrt.f32 %v3450_v55 }
 0x2da   :  { %7645 = vst [vmem:[#allocation95_spill] sm:$0xff] %v5976_v8  ;;  %1776 = vadd.xlane.f32.xlu1 %v1730_v59  ;;  %v1631_v18 = vrot.slane %v1339_v35, %v5431_v19  ;;  %v2998_v44 = vrot.slane %v2876_v63, 4  ;;  %v2302_v39 = vrot.slane %v5955_v17, 4  ;;  %v2329_v53 = vadd.f32 %v2328_v37, %v2327_v29 }
 0x2db   :  { %v1510_v12 = vmul.f32 %v1465_v22, %v5928_v2  ;;  %v4204_v11 = vpop.eup %4203  ;;  %v2428_v51 = vmul.f32 %v5928_v2, %v7635_v28  ;;  %4207 = vlog2.f32 %v1417_v56  ;;  %v2323_v41 = vadd.f32 %v2322_v20, %v2321_v15 }
 0x2dc   :  { %v1463_v5 = vmul.f32 0.6931472, %v4204_v11  ;;  %v2993_v42 = vadd.f32 %v2992_v58, %v2875_v26  ;;  %v3008_v59 = vrot.slane %v3007_v49, 1  ;;  %v3293_v55 = vmul.f32 %v5976_v8, %v5976_v8 }
 0x2dd   :  { %v1542_v47 = vsub.f32 %v7635_v28, %v1510_v12  ;;  %v2975_v22 = vadd.f32 %v2974_v33, %v2872_v14  ;;  %v1627_v35 = vrot.slane %v5912_v4, %v5431_v19  ;;  %v2999_v61 = vadd.f32 %v2998_v44, %v2876_v63  ;;  %v7649_v14 = vld [vmem:[#allocation49_spill] sm:$0xff] }
 0x2de   :  { %v1509_v29 = vmul.f32 %v1463_v5, %v5935_v48  ;;  %v2427_v2 = vmul.f32 %v5935_v48, %v7638_v16  ;;  %v5993_v28 = vadd.f32 %v2302_v39, %v5955_v17  ;;  %v2550_v12 = vrot.slane %v2428_v51, 4  ;;  %v6006_v48 = vld [vmem:[%s7257_s5 + $0xc8] sm:$0xff] }
 0x2df   :  { %v1734_v1 = vmul.f32 %v1631_v18, %v1542_v47  ;;  %v7648_v15 = vcombine.high %v5829_v30, %v5829_v30  ;;  %v1421_v56 = vadd.f32 1e-08, %v7649_v14  ;;  %v2330_v4 = vrot.slane %v2329_v53, 1  ;;  %v7653_v47 = vld [vmem:[#allocation36_spill] sm:$0xff] }
 0x2e0   :  { %7647 = vst [vmem:[#allocation96_spill] sm:$0xff] %v5993_v28  ;;  %v1541_v63 = vsub.f32 %v7638_v16, %v1509_v29  ;;  %v2324_v18 = vrot.slane %v2323_v41, 1  ;;  %v2994_v37 = vrot.slane %v2993_v42, 2  ;;  %v6008_v20 = vadd.f32 %v3008_v59, %v3007_v49  ;;  %v6017_v16 = vld [vmem:[%s7256_s6 + $0x18] sm:$0xff] }
 0x2e1   :  { %v5999_v26 = vrot.slane %v7648_v15, %v5338_v50  ;;  %1784 = vadd.xlane.f32.xlu0 %v1734_v1  ;;  %v6010_v58 = vmul.f32 0.125, %v3293_v55  ;;  %v2976_v30 = vrot.slane %v2975_v22, 2  ;;  %4209 = vlog2.f32 %v1421_v56 }
 0x2e2   :  { %7650 = vst [vmem:[#allocation49_spill] sm:$0xff] %v6008_v20  ;;  %v6012_v33 = vadd.f32 %v2558_v43, %v2557_v0  ;;  %v3000_v44 = vrot.slane %v2999_v61, 2  ;;  %v1733_v11 = vmul.f32 %v1627_v35, %v1541_v63  ;;  %v2544_v1 = vrot.slane %v2427_v2, 4 }
 0x2e3   :  { %7651 = vst [vmem:[#allocation97_spill] sm:$0xff] %v6010_v58  ;;  %v2551_v39 = vadd.f32 %v2550_v12, %v2428_v51  ;;  %v7654_v5 = vrot.slane %v7653_v47, 1  ;;  %v1310_v59 = vcombine.high %v5999_v26, %v5999_v26  ;;  %v2368_v0 = vrot.slane %v6006_v48, 4 }
 0x2e4   :  { %7652 = vst [vmem:[#allocation98_spill] sm:$0xff] %v6012_v33  ;;  %v6029_v43 = vmul.f32 %v5955_v17, %v7631_v27  ;;  %v6031_v55 = vadd.f32 %v2330_v4, %v2329_v53  ;;  %v6033_v35 = vadd.f32 %v2324_v18, %v2323_v41  ;;  %v2995_v29 = vadd.f32 %v2994_v37, %v2993_v42  ;;  %v7658_v41 = vld [vmem:[#allocation40_spill] sm:$0xff] }
 0x2e5   :  { %v6022_v49 = vadd.f32 %v7654_v5, %v7653_v47  ;;  %1782 = vadd.xlane.f32.xlu1 %v1733_v11  ;;  %v6038_v15 = vadd.f32 %v2976_v30, %v2975_v22  ;;  %v6042_v56 = vrot.slane %v6017_v16, %v5338_v50  ;;  %v3001_v63 = vadd.f32 %v3000_v44, %v2999_v61  ;;  %v6054_v22 = vld [vmem:[%s7257_s5 + $0xa8] sm:$0xff] }
 0x2e6   :  { %7655 = vst [vmem:[#allocation36_spill] sm:$0xff] %v6029_v43  ;;  %7656 = vst [vmem:[#allocation99_spill] sm:$0xff] %v6031_v55  ;;  %v2545_v17 = vadd.f32 %v2544_v1, %v2427_v2  ;;  %v2883_v53 = vmul.f32 %v6006_v48, %v6006_v48  ;;  %v1416_v4 = vadd.f32 1e-08, %v7658_v41  ;;  %v6047_v42 = vpop.eup %4205  ;;  %v2552_v18 = vrot.slane %v2551_v39, 2 }
 0x2e7   :  { %7657 = vst [vmem:[#allocation100_spill] sm:$0xff] %v6038_v15  ;;  %7659 = vst [vmem:[#allocation40_spill] sm:$0xff] %v6047_v42  ;;  %v3195_v37 = vmul.f32 %v6022_v49, %v6022_v49  ;;  %v6057_v30 = vrot.slane %v1310_v59, %v5338_v50  ;;  %v2369_v61 = vadd.f32 %v2368_v0, %v6006_v48  ;;  %v2996_v11 = vrot.slane %v2995_v29, 1 }
 0x2e8   :  { %v4208_v2 = vpop.eup %4207  ;;  %v3292_v44 = vmul.f32 %v6031_v55, %v6031_v55  ;;  %v3291_v1 = vmul.f32 %v6033_v35, %v6033_v35  ;;  %v2879_v47 = vmul.f32 %v6054_v22, %v6054_v22  ;;  %v1358_v51 = vcombine.high %v6042_v56, %v6042_v56 }
 0x2e9   :  { %v1471_v5 = vmul.f32 0.6931472, %v4208_v2  ;;  %v2435_v59 = vmul.f32 %v6006_v48, %v7649_v14  ;;  %4211 = vlog2.f32 %v1416_v4  ;;  %v3002_v12 = vrot.slane %v3001_v63, 1 }
 0x2ea   :  { %v2546_v33 = vrot.slane %v2545_v17, 2  ;;  %v3040_v8 = vrot.slane %v2883_v53, 4  ;;  %v6071_v55 = vadd.f32 %v2552_v18, %v2551_v39  ;;  %v1643_v58 = vrot.slane %v6057_v30, %v5431_v19 }
 0x2eb   :  { %v1513_v42 = vmul.f32 %v1471_v5, %v6054_v22  ;;  %v2370_v2 = vrot.slane %v2369_v61, 2  ;;  %v2997_v20 = vadd.f32 %v2996_v11, %v2995_v29  ;;  %v3227_v34 = vmul.f32 0.125, %v3195_v37 }
 0x2ec   :  { %7660 = vst [vmem:[#allocation101_spill] sm:$0xff] %v6071_v55  ;;  %v3323_v7 = vmul.f32 0.125, %v3291_v1  ;;  %v3016_v10 = vrot.slane %v2879_v47, 4  ;;  %v6076_v43 = vmul.f32 0.125, %v3292_v44  ;;  %v6080_v0 = vrot.slane %v1358_v51, %v5338_v50  ;;  %v7663_v44 = vld [vmem:[#allocation41_spill] sm:$0xff] }
 0x2ed   :  { %v1545_v4 = vsub.f32 %v7646_v6, %v1513_v42  ;;  %v2592_v15 = vrot.slane %v2435_v59, 4  ;;  %v6082_v18 = vadd.f32 %v3002_v12, %v3001_v63  ;;  %v2547_v5 = vadd.f32 %v2546_v33, %v2545_v17  ;;  %v7665_v63 = vld [vmem:[#allocation22_spill] sm:$0xff] }
 0x2ee   :  { %7661 = vst [vmem:[#allocation102_spill] sm:$0xff] %v6076_v43  ;;  %v4210_v39 = vpop.eup %4209  ;;  %v2344_v28 = vrot.slane %v6054_v22, 4  ;;  %v3041_v27 = vadd.f32 %v3040_v8, %v2883_v53  ;;  %v2371_v1 = vadd.f32 %v2370_v2, %v2369_v61  ;;  %v3259_v24 = vsub.f32 %v7663_v44, %v3227_v34  ;;  %v7666_v53 = vld [vmem:[#allocation52_spill] sm:$0xff] }
 0x2ef   :  { %7662 = vst [vmem:[#allocation103_spill] sm:$0xff] %v6082_v18  ;;  %v1737_v37 = vmul.f32 %v1643_v58, %v1545_v4  ;;  %v1479_v11 = vmul.f32 0.6931472, %v4210_v39  ;;  %v3355_v62 = vsub.f32 %v2997_v20, %v3323_v7  ;;  %v3017_v42 = vadd.f32 %v3016_v10, %v2879_v47  ;;  %v1176_v58 = vld [vmem:[%s7257_s5 + $0xa0] sm:$0xff] }
 0x2f0   :  { %v7664_v51 = vrot.slane %v5449_v25, 1  ;;  %v1659_v33 = vrot.slane %v6080_v0, %v5431_v19  ;;  %v2593_v8 = vadd.f32 %v2592_v15, %v2435_v59  ;;  %v1411_v17 = vadd.f32 1e-08, %v7665_v63 }
 0x2f1   :  { %1790 = vadd.xlane.f32.xlu0 %v1737_v37  ;;  %v1517_v12 = vmul.f32 %v1479_v11, %v6006_v48  ;;  %v2548_v7 = vrot.slane %v2547_v5, 1  ;;  %v2345_v34 = vadd.f32 %v2344_v28, %v6054_v22  ;;  %v2372_v48 = vrot.slane %v2371_v1, 1 }
 0x2f2   :  { %v2181_v45 = vadd.f32 %v7664_v51, %v5449_v25  ;;  %v3042_v25 = vrot.slane %v3041_v27, 2  ;;  %4213 = vlog2.f32 %v1411_v17  ;;  %v1418_v61 = vadd.f32 1e-08, %v7666_v53 }
 0x2f3   :  { %v1549_v20 = vsub.f32 %v7649_v14, %v1517_v12  ;;  %v3387_v15 = vmul.f32 %v3355_v62, %v3259_v24  ;;  %v6104_v59 = vrot.slane %v5999_v26, %v5338_v50  ;;  %v2338_v2 = vrot.slane %v1176_v58, 4  ;;  %v7669_v12 = vld [vmem:[#allocation51_spill] sm:$0xff] }
 0x2f4   :  { %v3203_v47 = vmul.f32 %v2181_v45, %v2181_v45  ;;  %v3018_v4 = vrot.slane %v3017_v42, 2  ;;  %v2594_v37 = vrot.slane %v2593_v8, 2  ;;  %4215 = vlog2.f32 %v1418_v61 }
 0x2f5   :  { %v1741_v39 = vmul.f32 %v1659_v33, %v1549_v20  ;;  %v6106_v28 = vadd.f32 %v2548_v7, %v2547_v5  ;;  %v3099_v14 = vmul.f32 %v6033_v35, %v6022_v49  ;;  %v2346_v44 = vrot.slane %v2345_v34, 2 }
 0x2f6   :  { %v4212_v11 = vpop.eup %4211  ;;  %v6112_v62 = vmul.f32 %v6054_v22, %v7646_v6  ;;  %v2373_v24 = vadd.f32 %v2372_v48, %v2371_v1  ;;  %v3043_v51 = vadd.f32 %v3042_v25, %v3041_v27  ;;  %v1423_v17 = vadd.f32 1e-08, %v7669_v12 }
 0x2f7   :  { %7667 = vst [vmem:[#allocation41_spill] sm:$0xff] %v6106_v28  ;;  %1798 = vadd.xlane.f32.xlu1 %v1741_v39  ;;  %v1469_v26 = vmul.f32 0.6931472, %v4212_v11  ;;  %v3419_v33 = vmax.f32 %v3387_v15, 0.0  ;;  %v6115_v20 = vmul.f32 0.125, %v3203_v47  ;;  %v2339_v61 = vadd.f32 %v2338_v2, %v1176_v58 }
 0x2f8   :  { %7668 = vst [vmem:[#allocation22_spill] sm:$0xff] %v6112_v62  ;;  %v2878_v5 = vmul.f32 %v1176_v58, %v1176_v58  ;;  %v3019_v7 = vadd.f32 %v3018_v4, %v3017_v42  ;;  %v2595_v29 = vadd.f32 %v2594_v37, %v2593_v8  ;;  %v1639_v49 = vrot.slane %v6104_v59, %v5431_v19  ;;  %v6129_v42 = vld [vmem:[%s7257_s5 + $0xc0] sm:$0xff]  ;;  %v7728_v62 = vld [vmem:[#allocation75_spill] sm:$0xff] }
 0x2f9   :  { %v1512_v10 = vmul.f32 %v1469_v26, %v1176_v58  ;;  %v6119_v35 = vmul.f32 0.125, %v3099_v14  ;;  %v6121_v22 = vadd.f32 %v2346_v44, %v2345_v34  ;;  %v2430_v27 = vmul.f32 %v1176_v58, %v7658_v41  ;;  %v7672_v4 = vld [vmem:[#allocation50_spill] sm:$0xff] }
 0x2fa   :  { %4217 = vlog2.f32 %v1423_v17  ;;  %v3044_v25 = vrot.slane %v3043_v51, 1  ;;  %v3299_v48 = vmul.f32 %v2373_v24, %v2373_v24  ;;  %v3451_v8 = vadd.f32 1e-08, %v3419_v33 }
 0x2fb   :  { %7670 = vst [vmem:[#allocation51_spill] sm:$0xff] %v6119_v35  ;;  %7671 = vst [vmem:[#allocation104_spill] sm:$0xff] %v6121_v22  ;;  %v1544_v15 = vsub.f32 %v7658_v41, %v1512_v10  ;;  %v2340_v47 = vrot.slane %v2339_v61, 2  ;;  %v3010_v2 = vrot.slane %v2878_v5, 4  ;;  %v1420_v34 = vadd.f32 1e-08, %v7672_v4 }
 0x2fc   :  { %v3020_v39 = vrot.slane %v3019_v7, 1  ;;  %v2596_v37 = vrot.slane %v2595_v29, 1  ;;  %v3267_v58 = vsub.f32 %v5494_v31, %v6115_v20  ;;  %v3107_v14 = vmul.f32 %v2373_v24, %v2181_v45  ;;  %v7729_v22 = vld [vmem:[#allocation3_spill] sm:$0xff] }
 0x2fd   :  { %v1736_v11 = vmul.f32 %v1639_v49, %v1544_v15  ;;  %v2562_v44 = vrot.slane %v2430_v27, 4  ;;  %4219 = vlog2.f32 %v1420_v34  ;;  %v2362_v41 = vrot.slane %v6129_v42, 4 }
 0x2fe   :  { %v3045_v10 = vadd.f32 %v3044_v25, %v3043_v51  ;;  %v3331_v26 = vmul.f32 0.125, %v3299_v48  ;;  %v1293_v17 = vcombine.high %v5809_v54, %v5809_v54  ;;  %v2882_v33 = vmul.f32 %v6129_v42, %v6129_v42  ;;  %v6151_v54 = vld [vmem:[%s7257_s5 + $0xd8] sm:$0xff] }
 0x2ff   :  { %1788 = vadd.xlane.f32.xlu0 %v1736_v11  ;;  %v4214_v1 = vpop.eup %4213  ;;  %v6139_v55 = vadd.f32 %v2340_v47, %v2339_v61  ;;  %v3011_v28 = vadd.f32 %v3010_v2, %v2878_v5  ;;  %v1340_v31 = vcombine.high %v6104_v59, %v6104_v59  ;;  %v2363_v45 = vadd.f32 %v2362_v41, %v6129_v42  ;;  %v6160_v59 = vld [vmem:[%s7257_s5 + $0x78] sm:$0xff] }
 0x300   :  { %4221 = vrsqrt.f32 %v3451_v8  ;;  %v6144_v24 = vadd.f32 %v3020_v39, %v3019_v7  ;;  %v6146_v51 = vadd.f32 %v2596_v37, %v2595_v29  ;;  %v1459_v20 = vmul.f32 0.6931472, %v4214_v1 }
 0x301   :  { %7673 = vst [vmem:[#allocation50_spill] sm:$0xff] %v6139_v55  ;;  %v4216_v49 = vpop.eup %4215  ;;  %v6153_v61 = vmul.f32 0.125, %v3107_v14  ;;  %v6155_v5 = vadd.f32 %v2562_v44, %v2430_v27  ;;  %v2364_v7 = vrot.slane %v2363_v45, 2  ;;  %v3034_v25 = vrot.slane %v2882_v33, 4  ;;  %v6168_v27 = vld [vmem:[%s7257_s5 + $0xb0] sm:$0xff] }
 0x302   :  { %7674 = vst [vmem:[#allocation105_spill] sm:$0xff] %v6144_v24  ;;  %7675 = vst [vmem:[#allocation106_spill] sm:$0xff] %v6146_v51  ;;  %v3363_v29 = vsub.f32 %v3045_v10, %v3331_v26  ;;  %v1507_v1 = vmul.f32 %v1459_v20, %v6160_v59  ;;  %v1619_v48 = vrot.slane %v1293_v17, %v5431_v19  ;;  %v1473_v15 = vmul.f32 0.6931472, %v4216_v49 }
 0x303   :  { %7676 = vst [vmem:[#allocation107_spill] sm:$0xff] %v6153_v61  ;;  %7677 = vst [vmem:[#allocation108_spill] sm:$0xff] %v6155_v5  ;;  %v3012_v47 = vrot.slane %v3011_v28, 2  ;;  %v1647_v2 = vrot.slane %v1340_v31, %v5431_v19  ;;  %v2380_v34 = vrot.slane %v6151_v54, 4  ;;  %v2885_v11 = vmul.f32 %v6151_v54, %v6151_v54 }
 0x304   :  { %v1539_v39 = vsub.f32 %v7665_v63, %v1507_v1  ;;  %v1514_v37 = vmul.f32 %v1473_v15, %v6168_v27  ;;  %v3035_v14 = vadd.f32 %v3034_v25, %v2882_v33  ;;  %v2873_v41 = vmul.f32 %v6160_v59, %v6160_v59 }
 0x305   :  { %v1390_v10 = vcombine.high %v6080_v0, %v6080_v0  ;;  %v2365_v26 = vadd.f32 %v2364_v7, %v2363_v45  ;;  %v3395_v31 = vmul.f32 %v3363_v29, %v3267_v58  ;;  %v3013_v15 = vadd.f32 %v3012_v47, %v3011_v28 }
 0x306   :  { %v1731_v20 = vmul.f32 %v1619_v48, %v1539_v39  ;;  %v1546_v1 = vsub.f32 %v7666_v53, %v1514_v37  ;;  %v2381_v33 = vadd.f32 %v2380_v34, %v6151_v54  ;;  %v6186_v25 = vrot.slane %v6042_v56, %v5338_v50 }
 0x307   :  { %v4218_v17 = vpop.eup %4217  ;;  %v3052_v51 = vrot.slane %v2885_v11, 4  ;;  %v3036_v0 = vrot.slane %v3035_v14, 2  ;;  %v1422_v45 = vadd.f32 1e-08, %v5381_v57  ;;  %v2980_v58 = vrot.slane %v2873_v41, 4 }
 0x308   :  { %v1483_v8 = vmul.f32 0.6931472, %v4218_v17  ;;  %1778 = vadd.xlane.f32.xlu1 %v1731_v20  ;;  %v1738_v44 = vmul.f32 %v1647_v2, %v1546_v1  ;;  %v1667_v29 = vrot.slane %v1390_v10, %v5431_v19  ;;  %v2366_v48 = vrot.slane %v2365_v26, 1 }
 0x309   :  { %v3427_v47 = vmax.f32 %v3395_v31, 0.0  ;;  %v2350_v34 = vrot.slane %v6168_v27, 4  ;;  %v2880_v56 = vmul.f32 %v6168_v27, %v6168_v27  ;;  %4223 = vlog2.f32 %v1422_v45 }
 0x30a   :  { %v1519_v7 = vmul.f32 %v1483_v8, %v6151_v54  ;;  %v4220_v28 = vpop.eup %4219  ;;  %1792 = vadd.xlane.f32.xlu0 %v1738_v44  ;;  %v2382_v39 = vrot.slane %v2381_v33, 2  ;;  %v2434_v17 = vmul.f32 %v6129_v42, %v7672_v4  ;;  %v3053_v8 = vadd.f32 %v3052_v51, %v2885_v11 }
 0x30b   :  { %v1477_v37 = vmul.f32 0.6931472, %v4220_v28  ;;  %v1655_v10 = vrot.slane %v6186_v25, %v5431_v19  ;;  %v7678_v31 = vrot.slane %v5468_v52, 1  ;;  %v3037_v1 = vadd.f32 %v3036_v0, %v3035_v14  ;;  %v7680_v28 = vld [vmem:[#allocation5_spill] sm:$0xff] }
 0x30c   :  { %v1551_v2 = vsub.f32 %v7669_v12, %v1519_v7  ;;  %v6207_v7 = vadd.f32 %v2366_v48, %v2365_v26  ;;  %v1403_v61 = vadd.f32 1e-08, %v7680_v28  ;;  %v3014_v5 = vrot.slane %v3013_v15, 1 }
 0x30d   :  { %v6202_v20 = vadd.f32 %v7678_v31, %v5468_v52  ;;  %v6204_v49 = vpop.eup %4221  ;;  %v1516_v45 = vmul.f32 %v1477_v37, %v6129_v42  ;;  %v2981_v51 = vadd.f32 %v2980_v58, %v2873_v41  ;;  %v6212_v11 = vmul.f32 %v6168_v27, %v7666_v53  ;;  %v1182_v52 = vld [vmem:[%s7257_s5 + $0xd0] sm:$0xff] }
 0x30e   :  { %7679 = vst [vmem:[#allocation109_spill] sm:$0xff] %v6204_v49  ;;  %v1743_v44 = vmul.f32 %v1667_v29, %v1551_v2  ;;  %v3022_v35 = vrot.slane %v2880_v56, 4  ;;  %v2383_v14 = vadd.f32 %v2382_v39, %v2381_v33  ;;  %v2586_v42 = vrot.slane %v2434_v17, 4 }
 0x30f   :  { %7681 = vst [vmem:[#allocation5_spill] sm:$0xff] %v6212_v11  ;;  %v1548_v0 = vsub.f32 %v7672_v4, %v1516_v45  ;;  %4225 = vlog2.f32 %v1403_v61  ;;  %v2437_v26 = vmul.f32 %v6151_v54, %v7669_v12  ;;  %v3054_v29 = vrot.slane %v3053_v8, 2 }
 0x310   :  { %1802 = vadd.xlane.f32.xlu1 %v1743_v44  ;;  %v3038_v41 = vrot.slane %v3037_v1, 1  ;;  %v3202_v58 = vmul.f32 %v6202_v20, %v6202_v20  ;;  %v3298_v2 = vmul.f32 %v6207_v7, %v6207_v7  ;;  %v2374_v37 = vrot.slane %v1182_v52, 4 }
 0x311   :  { %v1740_v48 = vmul.f32 %v1655_v10, %v1548_v0  ;;  %v1425_v33 = vadd.f32 1e-08, %v5472_v32  ;;  %v3459_v39 = vadd.f32 1e-08, %v3427_v47  ;;  %v6225_v31 = vadd.f32 %v3014_v5, %v3013_v15 }
 0x312   :  { %v2982_v4 = vrot.slane %v2981_v51, 2  ;;  %v6228_v61 = vadd.f32 %v2350_v34, %v6168_v27  ;;  %v2384_v12 = vrot.slane %v2383_v14, 1  ;;  %v2587_v54 = vadd.f32 %v2586_v42, %v2434_v17 }
 0x313   :  { %7682 = vst [vmem:[#allocation110_spill] sm:$0xff] %v6225_v31  ;;  %1796 = vadd.xlane.f32.xlu0 %v1740_v48  ;;  %v1343_v44 = vcombine.high %v6017_v16, %v6017_v16  ;;  %4227 = vlog2.f32 %v1425_v33  ;;  %v3023_v10 = vadd.f32 %v3022_v35, %v2880_v56  ;;  %v2604_v45 = vrot.slane %v2437_v26, 4 }
 0x314   :  { %7683 = vst [vmem:[#allocation111_spill] sm:$0xff] %v6228_v61  ;;  %v3234_v0 = vmul.f32 0.125, %v3202_v58  ;;  %v2436_v49 = vmul.f32 %v1182_v52, %v5381_v57  ;;  %v3055_v24 = vadd.f32 %v3054_v29, %v3053_v8  ;;  %v3039_v47 = vadd.f32 %v3038_v41, %v3037_v1 }
 0x315   :  { %v3330_v5 = vmul.f32 0.125, %v3298_v2  ;;  %v2375_v15 = vadd.f32 %v2374_v37, %v1182_v52  ;;  %4229 = vrsqrt.f32 %v3459_v39  ;;  %v1388_v34 = vcombine.high %v6186_v25, %v6186_v25 }
 0x316   :  { %v2884_v17 = vmul.f32 %v1182_v52, %v1182_v52  ;;  %v4224_v42 = vpop.eup %4223  ;;  %v6236_v48 = vadd.f32 %v2982_v4, %v2981_v51  ;;  %v6238_v16 = vadd.f32 %v2384_v12, %v2383_v14  ;;  %v2588_v35 = vrot.slane %v2587_v54, 2  ;;  %v7685_v4 = vld [vmem:[#allocation53_spill] sm:$0xff] }
 0x317   :  { %v6241_v56 = vrot.slane %v1343_v44, %v5338_v50  ;;  %v3024_v8 = vrot.slane %v3023_v10, 2  ;;  %v2605_v1 = vadd.f32 %v2604_v45, %v2437_v26  ;;  %v1481_v29 = vmul.f32 0.6931472, %v4224_v42 }
 0x318   :  { %7684 = vst [vmem:[#allocation112_spill] sm:$0xff] %v6238_v16  ;;  %v2598_v41 = vrot.slane %v2436_v49, 4  ;;  %v3056_v58 = vrot.slane %v3055_v24, 1  ;;  %v3266_v2 = vsub.f32 %v5496_v38, %v3234_v0  ;;  %v3362_v37 = vsub.f32 %v3039_v47, %v3330_v5 }
 0x319   :  { %v2376_v33 = vrot.slane %v2375_v15, 2  ;;  %v1518_v25 = vmul.f32 %v1481_v29, %v1182_v52  ;;  %v1663_v39 = vrot.slane %v1388_v34, %v5431_v19  ;;  %v3046_v51 = vrot.slane %v2884_v17, 4  ;;  %v1185_v52 = vld [vmem:[%s7257_s5 + $0xe8] sm:$0xff] }
 0x31a   :  { %v1419_v14 = vadd.f32 1e-08, %v7685_v4  ;;  %v3301_v12 = vmul.f32 %v6238_v16, %v6238_v16  ;;  %v2589_v44 = vadd.f32 %v2588_v35, %v2587_v54  ;;  %v1244_v26 = vcombine.high %v5658_v23, %v5658_v23  ;;  %v6260_v23 = vld [vmem:[%s7257_s5 + $0x38] sm:$0xff] }
 0x31b   :  { %v1359_v45 = vcombine.high %v6241_v56, %v6241_v56  ;;  %v1550_v38 = vsub.f32 %v5381_v57, %v1518_v25  ;;  %v2599_v0 = vadd.f32 %v2598_v41, %v2436_v49  ;;  %v1424_v47 = vadd.f32 1e-08, %v5460_v13 }
 0x31c   :  { %v4226_v42 = vpop.eup %4225  ;;  %4231 = vlog2.f32 %v1419_v14  ;;  %v3394_v5 = vmul.f32 %v3362_v37, %v3266_v2  ;;  %v2377_v34 = vadd.f32 %v2376_v33, %v2375_v15  ;;  %v2887_v35 = vmul.f32 %v1185_v52, %v1185_v52 }
 0x31d   :  { %v1443_v54 = vmul.f32 0.6931472, %v4226_v42  ;;  %v1742_v29 = vmul.f32 %v1663_v39, %v1550_v38  ;;  %v3047_v27 = vadd.f32 %v3046_v51, %v2884_v17  ;;  %v2865_v57 = vmul.f32 %v6260_v23, %v6260_v23 }
 0x31e   :  { %4233 = vlog2.f32 %v1424_v47  ;;  %v6264_v49 = vadd.f32 %v3024_v8, %v3023_v10  ;;  %v1587_v2 = vrot.slane %v1244_v26, %v5431_v19  ;;  %v6269_v15 = vrot.slane %v1359_v45, %v5338_v50 }
 0x31f   :  { %v1499_v41 = vmul.f32 %v1443_v54, %v6260_v23  ;;  %v2606_v33 = vrot.slane %v2605_v1, 2  ;;  %v6271_v25 = vadd.f32 %v3056_v58, %v3055_v24  ;;  %v6273_v14 = vmul.f32 0.125, %v3301_v12  ;;  %1800 = vadd.xlane.f32.xlu1 %v1742_v29 }
 0x320   :  { %7686 = vst [vmem:[#allocation113_spill] sm:$0xff] %v6264_v49  ;;  %v4228_v37 = vpop.eup %4227  ;;  %v2600_v17 = vrot.slane %v2599_v0, 2  ;;  %v3426_v39 = vmax.f32 %v3394_v5, 0.0  ;;  %v3064_v8 = vrot.slane %v2887_v35, 4  ;;  %v2590_v42 = vrot.slane %v2589_v44, 1 }
 0x321   :  { %7687 = vst [vmem:[#allocation114_spill] sm:$0xff] %v6271_v25  ;;  %7688 = vst [vmem:[#allocation115_spill] sm:$0xff] %v6273_v14  ;;  %v1531_v51 = vsub.f32 %v7680_v28, %v1499_v41  ;;  %v1487_v10 = vmul.f32 0.6931472, %v4228_v37  ;;  %v2378_v38 = vrot.slane %v2377_v34, 1  ;;  %v3048_v47 = vrot.slane %v3047_v27, 2 }
 0x322   :  { %v2932_v26 = vrot.slane %v2865_v57, 4  ;;  %v6276_v54 = vpop.eup %4229  ;;  %v1675_v24 = vrot.slane %v6269_v15, %v5431_v19  ;;  %v2392_v58 = vrot.slane %v1185_v52, 4  ;;  %v6281_v29 = vadd.f32 %v2606_v33, %v2605_v1 }
 0x323   :  { %7689 = vst [vmem:[#allocation116_spill] sm:$0xff] %v6276_v54  ;;  %v1723_v45 = vmul.f32 %v1587_v2, %v1531_v51  ;;  %v1521_v16 = vmul.f32 %v1487_v10, %v1185_v52  ;;  %v6285_v41 = vadd.f32 %v2600_v17, %v2599_v0  ;;  %v6289_v37 = vmul.f32 %v6207_v7, %v6202_v20  ;;  %v6299_v0 = vld [vmem:[%s7257_s5 + $0xb8] sm:$0xff] }
 0x324   :  { %7690 = vst [vmem:[#allocation117_spill] sm:$0xff] %v6281_v29  ;;  %v3458_v54 = vadd.f32 1e-08, %v3426_v39  ;;  %v3065_v51 = vadd.f32 %v3064_v8, %v2887_v35  ;;  %v6292_v10 = vadd.f32 %v2590_v42, %v2589_v44  ;;  %v6294_v31 = vadd.f32 %v2378_v38, %v2377_v34  ;;  %7695 = vst [vmem:[#allocation122_spill] sm:$0xff] %v6299_v0 }
 0x325   :  { %7691 = vst [vmem:[#allocation118_spill] sm:$0xff] %v6285_v41  ;;  %7692 = vst [vmem:[#allocation119_spill] sm:$0xff] %v6289_v37  ;;  %1762 = vadd.xlane.f32.xlu0 %v1723_v45  ;;  %v1553_v2 = vsub.f32 %v5472_v32, %v1521_v16  ;;  %v3049_v1 = vadd.f32 %v3048_v47, %v3047_v27  ;;  %v2933_v33 = vadd.f32 %v2932_v26, %v2865_v57  ;;  %vm1978_vm3 = vcmask 1043459  }
 0x326   :  { %7693 = vst [vmem:[#allocation120_spill] sm:$0xff] %v6292_v10  ;;  %7694 = vst [vmem:[#allocation121_spill] sm:$0xff] %v6294_v31  ;;  %v2393_v5 = vadd.f32 %v2392_v58, %v1185_v52  ;;  %v1342_v20 = vcombine.high %v6057_v30, %v6057_v30  ;;  %v2881_v7 = vmul.f32 %v6299_v0, %v6299_v0  ;;  %v2260_v44 = vrot.slane %v6260_v23, 4 }
 0x327   :  { %v1745_v17 = vmul.f32 %v1675_v24, %v1553_v2  ;;  %v6308_v27 = vmul.f32 %v1185_v52, %v5472_v32  ;;  %v6312_v34 = vrot.slane %v6241_v56, %v5338_v50  ;;  %4235 = vrsqrt.f32 %v3458_v54  ;;  %v1184_v52 = vld [vmem:[%s7257_s5 + $0xe0] sm:$0xff] }
 0x328   :  { %v3066_v57 = vrot.slane %v3065_v51, 2  ;;  %v2062_v30 = vrot.slane %v7606_v60, 4  ;;  %v2068_v39 = vrot.slane %v7680_v28, 4  ;;  %v3050_v8 = vrot.slane %v3049_v1, 1 }
 0x329   :  { %7696 = vst [vmem:[#allocation123_spill] sm:$0xff] %v6308_v27  ;;  %v4232_v35 = vpop.eup %4231  ;;  %1806 = vadd.xlane.f32.xlu1 %v1745_v17  ;;  %v3300_v42 = vmul.f32 %v6294_v31, %v6294_v31  ;;  %v2934_v38 = vrot.slane %v2933_v33, 2  ;;  %v2394_v56 = vrot.slane %v2393_v5, 2  ;;  %v1651_v26 = vrot.slane %v1342_v20, %v5431_v19 }
 0x32a   :  { %v1475_v47 = vmul.f32 0.6931472, %v4232_v35  ;;  %v3028_v54 = vrot.slane %v2881_v7, 4  ;;  %v2886_v45 = vmul.f32 %v1184_v52, %v1184_v52  ;;  %v1671_v2 = vrot.slane %v6312_v34, %v5431_v19 }
 0x32b   :  { %v4234_v50 = vpop.eup %4233  ;;  %v7697_v17 = vrot.slane %v4730_v46, 4  ;;  %v3067_v16 = vadd.f32 %v3066_v57, %v3065_v51  ;;  %v2386_v12 = vrot.slane %v1184_v52, 4  ;;  %v2063_v41 = vadd.f32 %v2062_v30, %v7606_v60 }
 0x32c   :  { %v1515_v24 = vmul.f32 %v1475_v47, %v6299_v0  ;;  %v1485_v58 = vmul.f32 0.6931472, %v4234_v50  ;;  %v2069_v29 = vadd.f32 %v2068_v39, %v7680_v28  ;;  %v2438_v14 = vmul.f32 %v1184_v52, %v5460_v13 }
 0x32d   :  { %v2057_v35 = vadd.f32 %v7697_v17, %v4730_v46  ;;  %v2261_v47 = vadd.f32 %v2260_v44, %v6260_v23  ;;  %v6333_v50 = vadd.f32 %v3050_v8, %v3049_v1  ;;  %v6335_v25 = vmul.f32 0.125, %v3300_v42 }
 0x32e   :  { %v1547_v20 = vsub.f32 %v7685_v4, %v1515_v24  ;;  %v1520_v31 = vmul.f32 %v1485_v58, %v1184_v52  ;;  %v3058_v46 = vrot.slane %v2886_v45, 4  ;;  %v6338_v57 = vadd.f32 %v3028_v54, %v2881_v7 }
 0x32f   :  { %7698 = vst [vmem:[#allocation124_spill] sm:$0xff] %v6333_v50  ;;  %7699 = vst [vmem:[#allocation125_spill] sm:$0xff] %v6335_v25  ;;  %v2058_v30 = vrot.slane %v2057_v35, 2  ;;  %v2935_v39 = vadd.f32 %v2934_v38, %v2933_v33  ;;  %v6341_v24 = vadd.f32 %v2386_v12, %v1184_v52  ;;  %v2064_v58 = vrot.slane %v2063_v41, 2  ;;  %v7723_v25 = vld [vmem:[#allocation12_spill] sm:$0xff] }
 0x330   :  { %v1739_v51 = vmul.f32 %v1651_v26, %v1547_v20  ;;  %v1552_v60 = vsub.f32 %v5460_v13, %v1520_v31  ;;  %v2070_v17 = vrot.slane %v2069_v29, 2  ;;  %v3068_v37 = vrot.slane %v3067_v16, 1  ;;  %v7701_v31 = vld [vmem:[#allocation7_spill] sm:$0xff]  ;;  %v7704_v20 = vld [vmem:[#allocation8_spill] sm:$0xff]  ;;  %v7716_v13 = vld [vmem:[#allocation14_spill] sm:$0xff] }
 0x331   :  { %v2610_v44 = vrot.slane %v2438_v14, 4  ;;  %v2262_v8 = vrot.slane %v2261_v47, 2  ;;  %v6345_v10 = vadd.f32 %v2394_v56, %v2393_v5  ;;  %v6348_v26 = vadd.f32 %v3058_v46, %v2886_v45 }
 0x332   :  { %1794 = vadd.xlane.f32.xlu0 %v1739_v51  ;;  %v1744_v1 = vmul.f32 %v1671_v2, %v1552_v60  ;;  %v7702_v12 = vrot.slane %v7701_v31, 2  ;;  %v2059_v38 = vadd.f32 %v2058_v30, %v2057_v35  ;;  %v7703_v52 = vrot.slane %v5834_v36, 2 }
 0x333   :  { %7700 = vst [vmem:[#allocation126_spill] sm:$0xff] %v6345_v10  ;;  %v2065_v5 = vadd.f32 %v2064_v58, %v2063_v41  ;;  %v2071_v56 = vadd.f32 %v2070_v17, %v2069_v29  ;;  %v7705_v45 = vrot.slane %v7704_v20, 4  ;;  %v6363_v60 = vadd.f32 %v3068_v37, %v3067_v16  ;;  %v7712_v29 = vld [vmem:[#allocation10_spill] sm:$0xff] }
 0x334   :  { %1804 = vadd.xlane.f32.xlu1 %v1744_v1  ;;  %v2053_v33 = vadd.f32 %v7702_v12, %v7701_v31  ;;  %v2257_v54 = vadd.f32 %v7703_v52, %v5834_v36  ;;  %v6361_v51 = vpop.eup %4235  ;;  %v6365_v1 = vadd.f32 %v2610_v44, %v2438_v14  ;;  %v7709_v31 = vld [vmem:[#allocation2_spill] sm:$0xff]  ;;  %v2263_v30 = vadd.f32 %v2262_v8, %v2261_v47  ;;  %v7710_v36 = vld [vmem:[#allocation4_spill] sm:$0xff] }
 0x335   :  { %v2709_v46 = vadd.f32 %v7705_v45, %v7704_v20  ;;  %7706 = vst [vmem:[#allocation7_spill] sm:$0xff] %v6361_v51  ;;  %7707 = vst [vmem:[#allocation8_spill] sm:$0xff] %v6363_v60  ;;  %v2048_v35 = vrot.slane %v7709_v31, 1  ;;  %v7711_v52 = vrot.slane %v7710_v36, 1  ;;  %v7713_v58 = vrot.slane %v7712_v29, 2 }
 0x336   :  { %7708 = vst [vmem:[#allocation127_spill] sm:$0xff] %v6365_v1  ;;  %v2054_v45 = vrot.slane %v2053_v33, 1  ;;  %v2060_v37 = vrot.slane %v2059_v38, 1  ;;  %v2252_v14 = vrot.slane %v5743_v40, 1  ;;  %v2258_v16 = vrot.slane %v2257_v54, 1 }
 0x337   :  { %v6372_v41 = vadd.f32 %v7711_v52, %v7710_v36  ;;  %v2705_v17 = vadd.f32 %v7713_v58, %v7712_v29  ;;  %v2710_v20 = vrot.slane %v2709_v46, 2  ;;  %v2066_v44 = vrot.slane %v2065_v5, 1 }
 0x338   :  { %v2072_v42 = vrot.slane %v2071_v56, 1  ;;  %v2417_v47 = vmul.f32 %v6260_v23, %v7680_v28  ;;  %v6381_v7 = vadd.f32 %v2048_v35, %v7709_v31  ;;  %v2264_v36 = vrot.slane %v2263_v30, 1 }
 0x339   :  { %v2711_v8 = vadd.f32 %v2710_v20, %v2709_v46  ;;  %v7714_v52 = vrot.slane %v5700_v9, 4  ;;  %v2478_v58 = vrot.slane %v5819_v21, 4  ;;  %v7715_v2 = vrot.slane %v5755_v3, 1 }
 0x33a   :  { %v2700_v51 = vrot.slane %v7716_v13, 1  ;;  %v2706_v28 = vrot.slane %v2705_v17, 1  ;;  %v2936_v23 = vrot.slane %v2935_v39, 1  ;;  %v6395_v46 = vadd.f32 %v2054_v45, %v2053_v33  ;;  %v7717_v45 = vld [vmem:[#allocation9_spill] sm:$0xff] }
 0x33b   :  { %v6386_v29 = vadd.f32 %v7714_v52, %v5700_v9  ;;  %v6392_v12 = vadd.f32 %v7715_v2, %v5755_v3  ;;  %v6398_v31 = vadd.f32 %v2252_v14, %v5743_v40  ;;  %v6400_v35 = vadd.f32 %v2258_v16, %v2257_v54 }
 0x33c   :  { %v2712_v9 = vrot.slane %v2711_v8, 1  ;;  %v6402_v20 = vadd.f32 %v2060_v37, %v2059_v38  ;;  %v6404_v52 = vadd.f32 %v2066_v44, %v2065_v5  ;;  %v6406_v60 = vadd.f32 %v2072_v42, %v2071_v56  ;;  %v7719_v37 = vld [vmem:[#allocation85_spill] sm:$0xff] }
 0x33d   :  { %v2484_v3 = vrot.slane %v2417_v47, 4  ;;  %v6408_v2 = vadd.f32 %v2264_v36, %v2263_v30  ;;  %v6412_v33 = vadd.f32 %v2478_v58, %v5819_v21  ;;  %v7718_v40 = vrot.slane %v7717_v45, 1  ;;  %v7721_v30 = vld [vmem:[#allocation70_spill] sm:$0xff] }
 0x33e   :  { %v2701_v14 = vadd.f32 %v2700_v51, %v7716_v13  ;;  %v2707_v38 = vadd.f32 %v2706_v28, %v2705_v17  ;;  %v7720_v5 = vrot.slane %v7719_v37, 1  ;;  %v2937_v56 = vadd.f32 %v2936_v23, %v2935_v39 }
 0x33f   :  { %v2695_v54 = vadd.f32 %v7718_v40, %v7717_v45  ;;  %v2713_v16 = vadd.f32 %v2712_v9, %v2711_v8  ;;  %v3114_v44 = vmul.f32 0.125, %v7721_v30  ;;  %v3180_v36 = vmul.f32 %v6372_v41, %v6372_v41 }
 0x340   :  { %v2931_v42 = vadd.f32 %v7720_v5, %v7719_v37  ;;  %v3181_v21 = vmul.f32 %v6381_v7, %v6381_v7  ;;  %v3182_v58 = vmul.f32 %v6395_v46, %v6395_v46  ;;  %v3183_v13 = vmul.f32 %v6402_v20, %v6402_v20  ;;  %v7722_v5 = vld [vmem:[#allocation13_spill] sm:$0xff] }
 0x341   :  { %v3184_v51 = vmul.f32 %v6404_v52, %v6404_v52  ;;  %v3185_v39 = vmul.f32 %v6406_v60, %v6406_v60  ;;  %v3212_v17 = vmul.f32 0.125, %v3180_v36  ;;  %v3278_v28 = vmul.f32 %v6392_v12, %v6392_v12 }
 0x342   :  { %v3213_v8 = vmul.f32 0.125, %v3181_v21  ;;  %v3279_v23 = vmul.f32 %v6398_v31, %v6398_v31  ;;  %v3214_v9 = vmul.f32 0.125, %v3182_v58  ;;  %v3215_v45 = vmul.f32 0.125, %v3183_v13 }
 0x343   :  { %v3216_v40 = vmul.f32 0.125, %v3184_v51  ;;  %v3217_v37 = vmul.f32 0.125, %v3185_v39  ;;  %v3244_v30 = vsub.f32 %v7722_v5, %v3212_v17  ;;  %v3280_v27 = vmul.f32 %v6400_v35, %v6400_v35  ;;  %v7724_v39 = vld [vmem:[#allocation71_spill] sm:$0xff]  ;;  %v7725_v17 = vld [vmem:[#allocation78_spill] sm:$0xff] }
 0x344   :  { %v3245_v50 = vsub.f32 %v7723_v25, %v3213_v8  ;;  %v3281_v36 = vmul.f32 %v6408_v2, %v6408_v2  ;;  %v3246_v21 = vsub.f32 %v2695_v54, %v3214_v9  ;;  %v3247_v10 = vsub.f32 %v2701_v14, %v3215_v45  ;;  %v7726_v5 = vld [vmem:[#allocation79_spill] sm:$0xff]  ;;  %v6454_v54 = vld [vmem:[%s7258_s7] sm:$0xff]  ;;  %v7731_v14 = vld [vmem:[#allocation81_spill] sm:$0xff] }
 0x345   :  { %v3248_v32 = vsub.f32 %v2707_v38, %v3216_v40  ;;  %v3249_v43 = vsub.f32 %v2713_v16, %v3217_v37  ;;  %v3310_v18 = vmul.f32 0.125, %v3278_v28  ;;  %v3311_v49 = vmul.f32 0.125, %v3279_v23  ;;  %v7732_v38 = vld [vmem:[#allocation6_spill] sm:$0xff]  ;;  %v7734_v28 = vld [vmem:[#allocation67_spill] sm:$0xff] }
 0x346   :  { %v3312_v58 = vmul.f32 0.125, %v3280_v27  ;;  %v3313_v13 = vmul.f32 0.125, %v3281_v36  ;;  %v2485_v51 = vadd.f32 %v2484_v3, %v2417_v47  ;;  %v3146_v55 = vsub.f32 %v7724_v39, %v3114_v44  ;;  %v7733_v44 = vld [vmem:[#allocation68_spill] sm:$0xff]  ;;  %v7735_v40 = vld [vmem:[#allocation11_spill] sm:$0xff]  ;;  %v7736_v39 = vld [vmem:[#allocation77_spill] sm:$0xff] }
 0x347   :  { %v7727_v25 = vsub.f32 %v7725_v17, %v7726_v5  ;;  %v7730_v11 = vsub.f32 %v7728_v62, %v7729_v22  ;;  %v3342_v27 = vsub.f32 %v7731_v14, %v3310_v18  ;;  %v3343_v47 = vsub.f32 %v7732_v38, %v3311_v49  ;;  %v7740_v38 = vld [vmem:[#allocation18_spill] sm:$0xff] }
 0x348   :  { %v3344_v3 = vsub.f32 %v2931_v42, %v3312_v58  ;;  %v3345_v16 = vsub.f32 %v2937_v56, %v3313_v13  ;;  %v3147_v23 = vsub.f32 %v7734_v28, %v7733_v44  ;;  %v3498_v62 = vmul.f32 %v7735_v40, %v3146_v55  ;;  %v7743_v44 = vld [vmem:[#allocation65_spill] sm:$0xff] }
 0x349   :  { %v3372_v8 = vmul.f32 %v7727_v25, %v3244_v30  ;;  %v3373_v61 = vmul.f32 %v7730_v11, %v3245_v50  ;;  %v3374_v22 = vmul.f32 %v3342_v27, %v3246_v21  ;;  %v3375_v11 = vmul.f32 %v3343_v47, %v3247_v10 }
 0x34a   :  { %v3376_v50 = vmul.f32 %v3344_v3, %v3248_v32  ;;  %v3377_v37 = vmul.f32 %v3345_v16, %v3249_v43  ;;  %v3499_v17 = vmul.f32 %v7736_v39, %v3147_v23  ;;  %v3534_v18 = vrot.slane %v6454_v54, 1  ;;  %v6482_v23 = vpop.xlane.xlu0 %1750 }
 0x34b   :  { %v3404_v9 = vmax.f32 %v3372_v8, 0.0  ;;  %v3405_v45 = vmax.f32 %v3373_v61, 0.0  ;;  %v3406_v49 = vmax.f32 %v3374_v22, 0.0  ;;  %v3407_v42 = vmax.f32 %v3375_v11, 0.0  ;;  %v7745_v22 = vld [vmem:[#allocation72_spill] sm:$0xff] }
 0x34c   :  { %v3408_v56 = vmax.f32 %v3376_v50, 0.0  ;;  %v3409_v58 = vmax.f32 %v3377_v37, 0.0  ;;  %v7737_v13 = vrot.slane %v6338_v57, 2  ;;  %v2480_v55 = vrot.slane %v6412_v33, 2  ;;  %v7746_v50 = vld [vmem:[#allocation60_spill] sm:$0xff] }
 0x34d   :  { %v3436_v30 = vadd.f32 1e-08, %v3404_v9  ;;  %v3437_v36 = vadd.f32 1e-08, %v3405_v45  ;;  %v2486_v10 = vrot.slane %v2485_v51, 2  ;;  %v7739_v5 = vrot.slane %v6348_v26, 2 }
 0x34e   :  { %v6466_v61 = vadd.f32 %v7737_v13, %v6338_v57  ;;  %v3438_v32 = vadd.f32 1e-08, %v3406_v49  ;;  %v3439_v43 = vadd.f32 1e-08, %v3407_v42  ;;  %v3440_v21 = vadd.f32 1e-08, %v3408_v56  ;;  %v6507_v42 = vpop.xlane.xlu0 %1748 }
 0x34f   :  { %4237 = vrsqrt.f32 %v3436_v30  ;;  %v6472_v25 = vadd.f32 %v7739_v5, %v6348_v26  ;;  %v3441_v8 = vadd.f32 1e-08, %v3409_v58  ;;  %v3594_v14 = vmul.f32 %v3498_v62, %v6454_v54  ;;  %v7744_v9 = vld [vmem:[#allocation74_spill] sm:$0xff] }
 0x350   :  { %7738 = vst [vmem:[#allocation2_spill] sm:$0xff] %v6466_v61  ;;  %4239 = vrsqrt.f32 %v3437_v36  ;;  %v3595_v27 = vmul.f32 %v3534_v18, %v3499_v17  ;;  %v7741_v57 = vrot.slane %v7740_v38, 2  ;;  %v7742_v3 = vrot.slane %v6386_v29, 2 }
 0x351   :  { %4241 = vrsqrt.f32 %v3438_v32  ;;  %v1426_v28 = vadd.f32 1e-08, %v7743_v44  ;;  %v2481_v26 = vadd.f32 %v2480_v55, %v6412_v33  ;;  %v3084_v45 = vmul.f32 %v7744_v9, %v6372_v41  ;;  %v7747_v41 = vld [vmem:[#allocation73_spill] sm:$0xff] }
 0x352   :  { %v2469_v47 = vadd.f32 %v7741_v57, %v7740_v38  ;;  %v2475_v16 = vadd.f32 %v7742_v3, %v6386_v29  ;;  %4243 = vrsqrt.f32 %v3439_v43  ;;  %v3658_v40 = vrot.slane %v3595_v27, 7 }
 0x353   :  { %v2487_v62 = vadd.f32 %v2486_v10, %v2485_v51  ;;  %v3085_v11 = vmul.f32 %v7745_v22, %v6381_v7  ;;  %4245 = vrsqrt.f32 %v3440_v21  ;;  %v1427_v37 = vadd.f32 1e-08, %v7746_v50 }
 0x354   :  { %v3086_v29 = vmul.f32 %v6392_v12, %v6395_v46  ;;  %v3087_v30 = vmul.f32 %v6398_v31, %v6402_v20  ;;  %4247 = vrsqrt.f32 %v3441_v8  ;;  %v6495_v33 = vsel %vm1974_vm1, %v3658_v40, %v3594_v14 }
 0x355   :  { %v2464_v36 = vrot.slane %v7747_v41, 1  ;;  %v2470_v39 = vrot.slane %v2469_v47, 1  ;;  %v3088_v51 = vmul.f32 %v6400_v35, %v6404_v52  ;;  %4249 = vlog2.f32 %v1426_v28  ;;  %v7750_v52 = vld [vmem:[#allocation76_spill] sm:$0xff] }
 0x356   :  { %v2476_v7 = vrot.slane %v2475_v16, 1  ;;  %v3089_v17 = vmul.f32 %v6408_v2, %v6406_v60  ;;  %v3116_v18 = vmul.f32 0.125, %v3084_v45  ;;  %4251 = vlog2.f32 %v1427_v37 }
 0x357   :  { %v7748_v12 = vrot.slane %v6341_v24, 2  ;;  %v2482_v31 = vrot.slane %v2481_v26, 1  ;;  %v2488_v20 = vrot.slane %v2487_v62, 1  ;;  %v3117_v49 = vmul.f32 0.125, %v3085_v11  ;;  %v7752_v11 = vld [vmem:[#allocation26_spill] sm:$0xff] }
 0x358   :  { %v7751_v56 = vrot.slane %v7750_v52, 1  ;;  %v3118_v2 = vmul.f32 0.125, %v3086_v29  ;;  %v3119_v58 = vmul.f32 0.125, %v3087_v30  ;;  %v3062_v13 = vrot.slane %v6472_v25, 1 }
 0x359   :  { %v6505_v46 = vadd.f32 %v7748_v12, %v6341_v24  ;;  %v2465_v24 = vadd.f32 %v2464_v36, %v7747_v41  ;;  %v2471_v55 = vadd.f32 %v2470_v39, %v2469_v47  ;;  %v3120_v10 = vmul.f32 0.125, %v3088_v51 }
 0x35a   :  { %v2459_v60 = vadd.f32 %v7751_v56, %v7750_v52  ;;  %vm1980_vm4 = vcmask 1044484   ;;  %v2477_v32 = vadd.f32 %v2476_v7, %v2475_v16  ;;  %v3121_v43 = vmul.f32 0.125, %v3089_v17 }
 0x35b   :  { %7749 = vst [vmem:[#allocation4_spill] sm:$0xff] %v6505_v46  ;;  %v3535_v5 = vrot.slane %v6454_v54, 2  ;;  %vm1982_vm5 = vcmask 1045509   ;;  %v2483_v14 = vadd.f32 %v2482_v31, %v2481_v26  ;;  %v2489_v27 = vadd.f32 %v2488_v20, %v2487_v62  ;;  %v6521_v26 = vpop.xlane.xlu0 %1754 }
 0x35c   :  { %v3148_v21 = vsub.f32 %v2459_v60, %v3116_v18  ;;  %v4238_v8 = vpop.eup %4237  ;;  %v3149_v38 = vsub.f32 %v2465_v24, %v3117_v49  ;;  %v3536_v57 = vrot.slane %v6454_v54, 3  ;;  %vm1984_vm6 = vcmask 1046534   ;;  %v7753_v49 = vld [vmem:[#allocation20_spill] sm:$0xff]  ;;  %v6531_v60 = vpop.xlane.xlu1 %1766 }
 0x35d   :  { %v4240_v3 = vpop.eup %4239  ;;  %v3150_v28 = vsub.f32 %v2471_v55, %v3118_v2  ;;  %v3151_v9 = vsub.f32 %v2477_v32, %v3119_v58  ;;  %v1389_v47 = vcombine.high %v6312_v34, %v6312_v34  ;;  %vm1986_vm7 = vcmask 1047559  }
 0x35e   :  { %v3500_v45 = vmul.f32 %v4238_v8, %v3148_v21  ;;  %v3152_v16 = vsub.f32 %v2483_v14, %v3120_v10  ;;  %v3501_v40 = vmul.f32 %v4240_v3, %v3149_v38  ;;  %v3537_v22 = vrot.slane %v6454_v54, 4  ;;  %v4242_v62 = vpop.eup %4241 }
 0x35f   :  { %v2110_v37 = vrot.slane %v7752_v11, 4  ;;  %v3153_v29 = vsub.f32 %v2489_v27, %v3121_v43  ;;  %v3538_v30 = vrot.slane %v6454_v54, 5  ;;  %v2116_v36 = vrot.slane %v7665_v63, 4  ;;  %v4244_v39 = vpop.eup %4243  ;;  %v6538_v3 = vpop.xlane.xlu0 %1752 }
 0x360   :  { %v3596_v41 = vmul.f32 %v3535_v5, %v3500_v45  ;;  %v3502_v51 = vmul.f32 %v4242_v62, %v3150_v28  ;;  %v3539_v34 = vrot.slane %v6454_v54, 6  ;;  %v3540_v7 = vrot.slane %v6454_v54, 7  ;;  %v4246_v18 = vpop.eup %4245  ;;  %v6543_v45 = vld [vmem:[%s7257_s5 + $0xf0] sm:$0xff] }
 0x361   :  { %v3597_v17 = vmul.f32 %v3536_v57, %v3501_v40  ;;  %v3503_v12 = vmul.f32 %v4244_v39, %v3151_v9  ;;  %v1679_v20 = vrot.slane %v1389_v47, %v5431_v19  ;;  %v7754_v52 = vrot.slane %v7753_v49, 4  ;;  %v4248_v2 = vpop.eup %4247  ;;  %v6563_v39 = vpop.xlane.xlu1 %1764 }
 0x362   :  { %v3660_v31 = vrot.slane %v3596_v41, 6  ;;  %v3504_v58 = vmul.f32 %v4246_v18, %v3152_v16  ;;  %v3598_v24 = vmul.f32 %v3537_v22, %v3502_v51  ;;  %v2111_v10 = vadd.f32 %v2110_v37, %v7752_v11  ;;  %v4250_v32 = vpop.eup %4249  ;;  %v6553_v37 = vld [vmem:[%s7257_s5 + $0xf8] sm:$0xff] }
 0x363   :  { %v2105_v56 = vadd.f32 %v7754_v52, %v7753_v49  ;;  %v3662_v55 = vrot.slane %v3597_v17, 5  ;;  %v3505_v54 = vmul.f32 %v4248_v2, %v3153_v29  ;;  %v3599_v43 = vmul.f32 %v3538_v30, %v3503_v12  ;;  %v4252_v8 = vpop.eup %4251  ;;  %7756 = vst [vmem:[#allocation10_spill] sm:$0xff] %v6553_v37 }
 0x364   :  { %v3661_v21 = vsel %vm1976_vm2, %v3660_v31, %v6495_v33  ;;  %v2117_v5 = vadd.f32 %v2116_v36, %v7665_v63  ;;  %v3600_v14 = vmul.f32 %v3539_v34, %v3504_v58  ;;  %v3664_v38 = vrot.slane %v3598_v24, 4  ;;  %v7757_v58 = vld [vmem:[#allocation27_spill] sm:$0xff] }
 0x365   :  { %v3663_v27 = vsel %vm1978_vm3, %v3662_v55, %v3661_v21  ;;  %v1489_v57 = vmul.f32 0.6931472, %v4250_v32  ;;  %v3601_v28 = vmul.f32 %v3540_v7, %v3505_v54  ;;  %v3666_v9 = vrot.slane %v3599_v43, 3  ;;  %v6574_v32 = vpop.xlane.xlu0 %1758  ;;  %v7761_v21 = vld [vmem:[#allocation19_spill] sm:$0xff] }
 0x366   :  { %v1491_v47 = vmul.f32 0.6931472, %v4252_v8  ;;  %v7755_v33 = vrot.slane %v6160_v59, 4  ;;  %v3665_v40 = vsel %vm1980_vm4, %v3664_v38, %v3663_v27  ;;  %v3668_v22 = vrot.slane %v3600_v14, 2  ;;  %7759 = vst [vmem:[#allocation14_spill] sm:$0xff] %v6574_v32  ;;  %v7762_v38 = vld [vmem:[#allocation96_spill] sm:$0xff] }
 0x367   :  { %v1522_v11 = vmul.f32 %v1489_v57, %v6543_v45  ;;  %v1391_v62 = vcombine.high %v6269_v15, %v6269_v15  ;;  %v3667_v29 = vsel %vm1982_vm5, %v3666_v9, %v3665_v40  ;;  %v3670_v30 = vrot.slane %v3601_v28, 1  ;;  %v7766_v40 = vld [vmem:[#allocation25_spill] sm:$0xff] }
 0x368   :  { %v2309_v16 = vadd.f32 %v7755_v33, %v6160_v59  ;;  %v6560_v41 = vmul.f32 %v6543_v45, %v6543_v45  ;;  %v1523_v36 = vmul.f32 %v1491_v47, %v6553_v37  ;;  %v3669_v51 = vsel %vm1984_vm6, %v3668_v22, %v3667_v29 }
 0x369   :  { %v1554_v34 = vsub.f32 %v7743_v44, %v1522_v11  ;;  %v2106_v7 = vrot.slane %v2105_v56, 2  ;;  %v2112_v17 = vrot.slane %v2111_v10, 2  ;;  %v3671_v15 = vsel %vm1986_vm7, %v3670_v30, %v3669_v51  ;;  %v7771_v30 = vld [vmem:[#allocation36_spill] sm:$0xff]  ;;  %v7772_v51 = vld [vmem:[#allocation33_spill] sm:$0xff] }
 0x36a   :  { %v2118_v12 = vrot.slane %v2117_v5, 2  ;;  %v2310_v31 = vrot.slane %v2309_v16, 2  ;;  %3718 = vadd.xlane.f32.xlu0 %v3671_v15  ;;  %v1555_v52 = vsub.f32 %v7746_v50, %v1523_v36  ;;  %v1683_v2 = vrot.slane %v1391_v62, %v5431_v19  ;;  %v7791_v50 = vld [vmem:[#allocation24_spill] sm:$0xff] }
 0x36b   :  { %v1746_v49 = vmul.f32 %v1679_v20, %v1554_v34  ;;  %v7758_v24 = vrot.slane %v7757_v58, 2  ;;  %v6579_v54 = vadd.f32 %v3062_v13, %v6472_v25  ;;  %v6584_v20 = vmul.f32 %v6553_v37, %v6553_v37  ;;  %v7764_v25 = vld [vmem:[#allocation23_spill] sm:$0xff] }
 0x36c   :  { %v2425_v19 = vmul.f32 %v6160_v59, %v7665_v63  ;;  %v2096_v8 = vrot.slane %v7761_v21, 1  ;;  %v2107_v14 = vadd.f32 %v2106_v7, %v2105_v56  ;;  %v2113_v27 = vadd.f32 %v2112_v17, %v2111_v10  ;;  %v6600_v59 = vpop.xlane.xlu1 %1770  ;;  %v7769_v10 = vld [vmem:[#allocation87_spill] sm:$0xff]  ;;  %v7773_v17 = vld [vmem:[#allocation34_spill] sm:$0xff] }
 0x36d   :  { %v2101_v55 = vadd.f32 %v7758_v24, %v7757_v58  ;;  %7760 = vst [vmem:[#allocation9_spill] sm:$0xff] %v6579_v54  ;;  %1808 = vadd.xlane.f32.xlu1 %v1746_v49  ;;  %v7763_v57 = vrot.slane %v7762_v38, 2  ;;  %v7765_v13 = vrot.slane %v7764_v25, 1  ;;  %v2119_v47 = vadd.f32 %v2118_v12, %v2117_v5  ;;  %7768 = vst [vmem:[#allocation85_spill] sm:$0xff] %v6600_v59  ;;  %v7776_v24 = vld [vmem:[#allocation91_spill] sm:$0xff]  ;;  %v7790_v54 = vld [vmem:[#allocation30_spill] sm:$0xff] }
 0x36e   :  { %v2311_v33 = vadd.f32 %v2310_v31, %v2309_v16  ;;  %v7767_v22 = vrot.slane %v7766_v40, 4  ;;  %v1747_v11 = vmul.f32 %v1683_v2, %v1555_v52  ;;  %v7770_v62 = vrot.slane %v7769_v10, 4  ;;  %v6613_v2 = vpop.xlane.xlu0 %1756 }
 0x36f   :  { %v2305_v28 = vadd.f32 %v7763_v57, %v7762_v38  ;;  %v6595_v9 = vadd.f32 %v7765_v13, %v7764_v25  ;;  %v2102_v56 = vrot.slane %v2101_v55, 1  ;;  %v2526_v36 = vrot.slane %v7771_v30, 4  ;;  %7775 = vst [vmem:[#allocation70_spill] sm:$0xff] %v6613_v2 }
 0x370   :  { %v2757_v63 = vadd.f32 %v7767_v22, %v7766_v40  ;;  %v2521_v29 = vadd.f32 %v7770_v62, %v7769_v10  ;;  %v2300_v34 = vrot.slane %v7772_v51, 1  ;;  %v2532_v7 = vrot.slane %v2425_v19, 4  ;;  %v6630_v35 = vpop.xlane.xlu1 %1768 }
 0x371   :  { %v7774_v5 = vrot.slane %v7773_v17, 2  ;;  %1810 = vadd.xlane.f32.xlu1 %v1747_v11  ;;  %v6611_v12 = vadd.f32 %v2096_v8, %v7761_v21  ;;  %v2108_v31 = vrot.slane %v2107_v14, 1  ;;  %v2114_v49 = vrot.slane %v2113_v27, 1  ;;  %v7778_v21 = vld [vmem:[#allocation31_spill] sm:$0xff] }
 0x372   :  { %v2758_v15 = vrot.slane %v2757_v63, 2  ;;  %v2306_v52 = vrot.slane %v2305_v28, 1  ;;  %v2120_v58 = vrot.slane %v2119_v47, 1  ;;  %v7777_v38 = vrot.slane %v7776_v24, 1 }
 0x373   :  { %v2753_v16 = vadd.f32 %v7774_v5, %v7773_v17  ;;  %v2312_v25 = vrot.slane %v2311_v33, 1  ;;  %v6620_v40 = vadd.f32 %v2102_v56, %v2101_v55  ;;  %v2522_v22 = vrot.slane %v2521_v29, 2 }
 0x374   :  { %v6618_v57 = vadd.f32 %v7777_v38, %v7776_v24  ;;  %v2759_v13 = vadd.f32 %v2758_v15, %v2757_v63  ;;  %v2527_v11 = vadd.f32 %v2526_v36, %v7771_v30  ;;  %v2748_v8 = vrot.slane %v7778_v21, 1 }
 0x375   :  { %v6625_v10 = vadd.f32 %v2300_v34, %v7772_v51  ;;  %v6627_v62 = vadd.f32 %v2532_v7, %v2425_v19  ;;  %v2754_v17 = vrot.slane %v2753_v16, 1  ;;  %v2984_v5 = vrot.slane %v6236_v48, 1  ;;  %v7779_v51 = vld [vmem:[#allocation86_spill] sm:$0xff]  ;;  %v7780_v19 = vld [vmem:[#allocation92_spill] sm:$0xff] }
 0x376   :  { %v6632_v24 = vadd.f32 %v2108_v31, %v2107_v14  ;;  %v6634_v63 = vadd.f32 %v2114_v49, %v2113_v27  ;;  %v6636_v55 = vadd.f32 %v2306_v52, %v2305_v28  ;;  %v2760_v56 = vrot.slane %v2759_v13, 1  ;;  %v7782_v31 = vld [vmem:[#allocation32_spill] sm:$0xff] }
 0x377   :  { %v6638_v30 = vadd.f32 %v2120_v58, %v2119_v47  ;;  %v6640_v36 = vadd.f32 %v2312_v25, %v2311_v33  ;;  %v7781_v7 = vrot.slane %v7780_v19, 2  ;;  %v6648_v38 = vadd.f32 %v2522_v22, %v2521_v29  ;;  %v6654_v47 = vpop.xlane.xlu0 %1760  ;;  %v7785_v58 = vld [vmem:[#allocation100_spill] sm:$0xff] }
 0x378   :  { %v2528_v14 = vrot.slane %v2527_v11, 2  ;;  %v7783_v27 = vrot.slane %v7782_v31, 1  ;;  %v2749_v49 = vadd.f32 %v2748_v8, %v7778_v21  ;;  %7784 = vst [vmem:[#allocation13_spill] sm:$0xff] %v6654_v47  ;;  %v2534_v33 = vrot.slane %v6627_v62, 2  ;;  %v7787_v22 = vld [vmem:[#allocation80_spill] sm:$0xff] }
 0x379   :  { %v6646_v15 = vadd.f32 %v7781_v7, %v7780_v19  ;;  %v2755_v52 = vadd.f32 %v2754_v17, %v2753_v16  ;;  %v7786_v25 = vrot.slane %v7785_v58, 1  ;;  %v2985_v19 = vadd.f32 %v2984_v5, %v6236_v48 }
 0x37a   :  { %v2743_v28 = vadd.f32 %v7783_v27, %v7782_v31  ;;  %v2761_v29 = vadd.f32 %v2760_v56, %v2759_v13  ;;  %v3122_v7 = vmul.f32 0.125, %v7787_v22  ;;  %v3188_v43 = vmul.f32 %v6595_v9, %v6595_v9  ;;  %v6674_v13 = vpop.xlane.xlu1 %1774 }
 0x37b   :  { %v2979_v18 = vadd.f32 %v7786_v25, %v7785_v58  ;;  %v3189_v21 = vmul.f32 %v6611_v12, %v6611_v12  ;;  %v3190_v8 = vmul.f32 %v6620_v40, %v6620_v40  ;;  %v3191_v16 = vmul.f32 %v6632_v24, %v6632_v24  ;;  %7788 = vst [vmem:[#allocation12_spill] sm:$0xff] %v6674_v13  ;;  %v6680_v58 = vpop.xlane.xlu0 %1780  ;;  %v7797_v13 = vld [vmem:[#allocation84_spill] sm:$0xff] }
 0x37c   :  { %v3192_v17 = vmul.f32 %v6634_v63, %v6634_v63  ;;  %v3193_v48 = vmul.f32 %v6638_v30, %v6638_v30  ;;  %v3220_v5 = vmul.f32 0.125, %v3188_v43  ;;  %v3286_v31 = vmul.f32 %v6618_v57, %v6618_v57  ;;  %7789 = vst [vmem:[#allocation71_spill] sm:$0xff] %v6680_v58  ;;  %v7796_v58 = vld [vmem:[#allocation83_spill] sm:$0xff] }
 0x37d   :  { %v3221_v56 = vmul.f32 0.125, %v3189_v21  ;;  %v3287_v27 = vmul.f32 %v6625_v10, %v6625_v10  ;;  %v3222_v25 = vmul.f32 0.125, %v3190_v8  ;;  %v3223_v22 = vmul.f32 0.125, %v3191_v16 }
 0x37e   :  { %v3224_v34 = vmul.f32 0.125, %v3192_v17  ;;  %v3225_v1 = vmul.f32 0.125, %v3193_v48  ;;  %v3252_v46 = vsub.f32 %v7790_v54, %v3220_v5  ;;  %v3288_v43 = vmul.f32 %v6636_v55, %v6636_v55  ;;  %v7792_v48 = vld [vmem:[#allocation17_spill] sm:$0xff] }
 0x37f   :  { %v3253_v61 = vsub.f32 %v7791_v50, %v3221_v56  ;;  %v3289_v21 = vmul.f32 %v6640_v36, %v6640_v36  ;;  %v3254_v32 = vsub.f32 %v2743_v28, %v3222_v25  ;;  %v3255_v37 = vsub.f32 %v2749_v49, %v3223_v22  ;;  %v7793_v5 = vld [vmem:[#allocation89_spill] sm:$0xff]  ;;  %v7794_v50 = vld [vmem:[#allocation90_spill] sm:$0xff]  ;;  %v6697_v28 = vpop.xlane.xlu1 %1772 }
 0x380   :  { %v3256_v47 = vsub.f32 %v2755_v52, %v3224_v34  ;;  %v3257_v0 = vsub.f32 %v2761_v29, %v3225_v1  ;;  %v3318_v6 = vmul.f32 0.125, %v3286_v31  ;;  %v3319_v4 = vmul.f32 0.125, %v3287_v27  ;;  %v6702_v1 = vld [vmem:[%s7258_s7 + $0x8] sm:$0xff]  ;;  %v7799_v34 = vld [vmem:[#allocation94_spill] sm:$0xff]  ;;  %v7802_v31 = vld [vmem:[#allocation16_spill] sm:$0xff] }
 0x381   :  { %v3320_v8 = vmul.f32 0.125, %v3288_v43  ;;  %v3321_v16 = vmul.f32 0.125, %v3289_v21  ;;  %v6688_v17 = vadd.f32 %v2528_v14, %v2527_v11  ;;  %v3154_v54 = vsub.f32 %v7792_v48, %v3122_v7  ;;  %v7800_v14 = vld [vmem:[#allocation42_spill] sm:$0xff]  ;;  %v6706_v7 = vpop.xlane.xlu0 %1786 }
 0x382   :  { %v7795_v56 = vsub.f32 %v7793_v5, %v7794_v50  ;;  %v7798_v59 = vsub.f32 %v7796_v58, %v7797_v13  ;;  %v3350_v11 = vsub.f32 %v7799_v34, %v3318_v6  ;;  %v3351_v49 = vsub.f32 %v7800_v14, %v3319_v4  ;;  %v7804_v6 = vld [vmem:[#allocation21_spill] sm:$0xff] }
 0x383   :  { %v3352_v52 = vsub.f32 %v2979_v18, %v3320_v8  ;;  %v3353_v29 = vsub.f32 %v2985_v19, %v3321_v16  ;;  %v3541_v4 = vrot.slane %v6702_v1, 1  ;;  %v3094_v14 = vmul.f32 %v6618_v57, %v6620_v40 }
 0x384   :  { %v3380_v53 = vmul.f32 %v7795_v56, %v3252_v46  ;;  %v3381_v2 = vmul.f32 %v7798_v59, %v3253_v61  ;;  %v7801_v46 = vld [vmem:[#allocation15_spill] sm:$0xff]  ;;  %v7803_v59 = vld [vmem:[#allocation88_spill] sm:$0xff]  ;;  %v3382_v25 = vmul.f32 %v3350_v11, %v3254_v32  ;;  %v3383_v22 = vmul.f32 %v3351_v49, %v3255_v37  ;;  %v7806_v32 = vld [vmem:[#allocation82_spill] sm:$0xff] }
 0x385   :  { %v3155_v27 = vsub.f32 %v7802_v31, %v7801_v46  ;;  %v3506_v58 = vmul.f32 %v7803_v59, %v3154_v54  ;;  %v3384_v43 = vmul.f32 %v3352_v52, %v3256_v47  ;;  %v3385_v21 = vmul.f32 %v3353_v29, %v3257_v0  ;;  %v6718_v0 = vpop.xlane.xlu1 %1776  ;;  %v6720_v11 = vpop.xlane.xlu0 %1784 }
 0x386   :  { %v3412_v13 = vmax.f32 %v3380_v53, 0.0  ;;  %v3413_v61 = vmax.f32 %v3381_v2, 0.0  ;;  %v3414_v18 = vmax.f32 %v3382_v25, 0.0  ;;  %v3415_v19 = vmax.f32 %v3383_v22, 0.0  ;;  %v7805_v53 = vld [vmem:[#allocation37_spill] sm:$0xff] }
 0x387   :  { %v3507_v50 = vmul.f32 %v7804_v6, %v3155_v27  ;;  %v3416_v8 = vmax.f32 %v3384_v43, 0.0  ;;  %v3417_v16 = vmax.f32 %v3385_v21, 0.0  ;;  %v2535_v56 = vadd.f32 %v2534_v33, %v6627_v62 }
 0x388   :  { %v3444_v48 = vadd.f32 1e-08, %v3412_v13  ;;  %v3445_v5 = vadd.f32 1e-08, %v3413_v61  ;;  %v3092_v2 = vmul.f32 %v7805_v53, %v6595_v9  ;;  %v3093_v37 = vmul.f32 %v7806_v32, %v6611_v12 }
 0x389   :  { %v3446_v47 = vadd.f32 1e-08, %v3414_v18  ;;  %v3447_v54 = vadd.f32 1e-08, %v3415_v19  ;;  %v3448_v34 = vadd.f32 1e-08, %v3416_v8  ;;  %v3602_v62 = vmul.f32 %v3506_v58, %v6702_v1  ;;  %v6744_v59 = vpop.xlane.xlu0 %1790 }
 0x38a   :  { %4253 = vrsqrt.f32 %v3444_v48  ;;  %v3449_v49 = vadd.f32 1e-08, %v3417_v16  ;;  %v3603_v33 = vmul.f32 %v3541_v4, %v3507_v50  ;;  %v2518_v9 = vrot.slane %v6646_v15, 1  ;;  %v7807_v58 = vld [vmem:[#allocation29_spill] sm:$0xff] }
 0x38b   :  { %4255 = vrsqrt.f32 %v3445_v5  ;;  %v3095_v12 = vmul.f32 %v6625_v10, %v6632_v24  ;;  %v3096_v52 = vmul.f32 %v6636_v55, %v6634_v63  ;;  %v2524_v29 = vrot.slane %v6648_v38, 1  ;;  %v6737_v24 = vpop.xlane.xlu1 %1782 }
 0x38c   :  { %4257 = vrsqrt.f32 %v3446_v47  ;;  %v3097_v46 = vmul.f32 %v6640_v36, %v6638_v30  ;;  %v3672_v57 = vrot.slane %v3603_v33, 7  ;;  %v2530_v40 = vrot.slane %v6688_v17, 1 }
 0x38d   :  { %4259 = vrsqrt.f32 %v3447_v54  ;;  %v2536_v31 = vrot.slane %v2535_v56, 1  ;;  %v3124_v27 = vmul.f32 0.125, %v3092_v2  ;;  %v3125_v13 = vmul.f32 0.125, %v3093_v37  ;;  %v7811_v37 = vld [vmem:[#allocation47_spill] sm:$0xff] }
 0x38e   :  { %4261 = vrsqrt.f32 %v3448_v34  ;;  %v3126_v61 = vmul.f32 0.125, %v3094_v14  ;;  %v6735_v10 = vsel %vm1974_vm1, %v3672_v57, %v3602_v62  ;;  %v2398_v63 = vrot.slane %v6543_v45, 4  ;;  %v6778_v62 = vpop.xlane.xlu0 %1788 }
 0x38f   :  { %4263 = vrsqrt.f32 %v3449_v49  ;;  %v6742_v55 = vmul.f32 %v6543_v45, %v7743_v44  ;;  %v3127_v30 = vmul.f32 0.125, %v3095_v12  ;;  %v3128_v36 = vmul.f32 0.125, %v3096_v52 }
 0x390   :  { %v7808_v25 = vrot.slane %v7807_v58, 1  ;;  %v7809_v43 = vrot.slane %v7779_v51, 1  ;;  %v2519_v48 = vadd.f32 %v2518_v9, %v6646_v15  ;;  %v3129_v5 = vmul.f32 0.125, %v3097_v46 }
 0x391   :  { %v7810_v6 = vrot.slane %v6560_v41, 4  ;;  %v3076_v4 = vrot.slane %v6584_v20, 4  ;;  %v2525_v18 = vadd.f32 %v2524_v29, %v6648_v38  ;;  %v2531_v19 = vadd.f32 %v2530_v40, %v6688_v17  ;;  %v6769_v17 = vpop.xlane.xlu1 %1798  ;;  %v7812_v40 = vld [vmem:[#allocation70_spill] sm:$0xff] }
 0x392   :  { %v2507_v22 = vadd.f32 %v7808_v25, %v7807_v58  ;;  %v2513_v21 = vadd.f32 %v7809_v43, %v7779_v51  ;;  %v2537_v8 = vadd.f32 %v2536_v31, %v2535_v56  ;;  %v3158_v2 = vsub.f32 %v2519_v48, %v3126_v61  ;;  %v7813_v58 = vld [vmem:[#allocation85_spill] sm:$0xff] }
 0x393   :  { %v6756_v50 = vadd.f32 %v7810_v6, %v6560_v41  ;;  %v3159_v32 = vsub.f32 %v2525_v18, %v3127_v30  ;;  %v3160_v51 = vsub.f32 %v2531_v19, %v3128_v36  ;;  %v1849_v15 = vrot.slane %v6507_v42, %v7811_v37 }
 0x394   :  { %v3156_v16 = vsub.f32 %v2507_v22, %v3124_v27  ;;  %v3157_v53 = vsub.f32 %v2513_v21, %v3125_v13  ;;  %v1881_v47 = vrot.slane %v6563_v39, %v7811_v37  ;;  %v3161_v41 = vsub.f32 %v2537_v8, %v3129_v5  ;;  %v7814_v21 = vld [vmem:[#allocation12_spill] sm:$0xff] }
 0x395   :  { %v3542_v54 = vrot.slane %v6702_v1, 2  ;;  %v3543_v34 = vrot.slane %v6702_v1, 3  ;;  %v1889_v38 = vrot.slane %v6630_v35, %v7811_v37  ;;  %v3544_v14 = vrot.slane %v6702_v1, 4  ;;  %v1779_v6 = vpop.xlane.xlu1 %1778 }
 0x396   :  { %v1853_v49 = vrot.slane %v6482_v23, %v7811_v37  ;;  %v1857_v42 = vrot.slane %v6538_v3, %v7811_v37  ;;  %v1885_v39 = vrot.slane %v6531_v60, %v7811_v37  ;;  %v3545_v35 = vrot.slane %v6702_v1, 5 }
 0x397   :  { %v4254_v56 = vpop.eup %4253  ;;  %v3546_v12 = vrot.slane %v6702_v1, 6  ;;  %v3547_v52 = vrot.slane %v6702_v1, 7  ;;  %v1861_v23 = vrot.slane %v6521_v26, %v7811_v37  ;;  %v1865_v31 = vrot.slane %v7812_v40, %v7811_v37  ;;  %v7818_v40 = vld [vmem:[#allocation35_spill] sm:$0xff] }
 0x398   :  { %v4256_v33 = vpop.eup %4255  ;;  %v3508_v9 = vmul.f32 %v4254_v56, %v3156_v16  ;;  %v1975_v46 = vsel %vm1974_vm1, %v1853_v49, %v1849_v15  ;;  %v1988_v3 = vsel %vm1974_vm1, %v1885_v39, %v1881_v47  ;;  %v1897_v13 = vrot.slane %v6697_v28, %v7811_v37 }
 0x399   :  { %v3509_v29 = vmul.f32 %v4256_v33, %v3157_v53  ;;  %v4258_v57 = vpop.eup %4257  ;;  %v1989_v27 = vsel %vm1976_vm2, %v1889_v38, %v1988_v3  ;;  %v1977_v36 = vsel %vm1976_vm2, %v1857_v42, %v1975_v46  ;;  %v1893_v26 = vrot.slane %v7813_v58, %v7811_v37  ;;  %v6800_v53 = vpop.xlane.xlu0 %1792  ;;  %v7816_v42 = vld [vmem:[#allocation52_spill] sm:$0xff] }
 0x39a   :  { %v3604_v60 = vmul.f32 %v3542_v54, %v3508_v9  ;;  %v4260_v61 = vpop.eup %4259  ;;  %v3510_v1 = vmul.f32 %v4258_v57, %v3158_v2  ;;  %v1901_v48 = vrot.slane %v7814_v21, %v7811_v37  ;;  %v1905_v5 = vrot.slane %v6718_v0, %v7811_v37  ;;  %v7817_v9 = vld [vmem:[#allocation53_spill] sm:$0xff] }
 0x39b   :  { %v3605_v30 = vmul.f32 %v3543_v34, %v3509_v29  ;;  %v4262_v25 = vpop.eup %4261  ;;  %v3511_v22 = vmul.f32 %v4260_v61, %v3159_v32  ;;  %v1990_v16 = vsel %vm1978_vm3, %v1893_v26, %v1989_v27  ;;  %v1909_v38 = vrot.slane %v1779_v6, %v7811_v37 }
 0x39c   :  { %v3674_v43 = vrot.slane %v3604_v60, 6  ;;  %v4264_v18 = vpop.eup %4263  ;;  %v3512_v28 = vmul.f32 %v4262_v25, %v3160_v51  ;;  %v3606_v19 = vmul.f32 %v3544_v14, %v3510_v1  ;;  %v1991_v47 = vsel %vm1980_vm4, %v1897_v13, %v1990_v16  ;;  %v7815_v14 = vld [vmem:[#allocation71_spill] sm:$0xff]  ;;  %v7823_v16 = vld [vmem:[#allocation10_spill] sm:$0xff] }
 0x39d   :  { %v3676_v8 = vrot.slane %v3605_v30, 5  ;;  %v3513_v2 = vmul.f32 %v4264_v18, %v3161_v41  ;;  %v3607_v15 = vmul.f32 %v3545_v35, %v3511_v22  ;;  %v1913_v49 = vrot.slane %v7815_v14, %v7811_v37  ;;  %v1797_v60 = vpop.xlane.xlu0 %1796  ;;  %v4290_v22 = vld [vmem:[%s7257_s5 + $0xb8] sm:$0xff] }
 0x39e   :  { %v3675_v32 = vsel %vm1976_vm2, %v3674_v43, %v6735_v10  ;;  %v3608_v54 = vmul.f32 %v3546_v12, %v3512_v28  ;;  %v3678_v0 = vrot.slane %v3606_v19, 4  ;;  %v2158_v39 = vrot.slane %v7816_v42, 4  ;;  %v7820_v43 = vld [vmem:[#allocation122_spill] sm:$0xff]  ;;  %v7822_v18 = vld [vmem:[#allocation13_spill] sm:$0xff] }
 0x39f   :  { %v3677_v34 = vsel %vm1978_vm3, %v3676_v8, %v3675_v32  ;;  %v3609_v51 = vmul.f32 %v3547_v52, %v3513_v2  ;;  %v3680_v56 = vrot.slane %v3607_v15, 3  ;;  %v1992_v10 = vsel %vm1982_vm5, %v1901_v48, %v1991_v47 }
 0x3a0   :  { %v3679_v41 = vsel %vm1980_vm4, %v3678_v0, %v3677_v34  ;;  %v3682_v33 = vrot.slane %v3608_v54, 2  ;;  %v2164_v35 = vrot.slane %v7817_v9, 4  ;;  %v1917_v46 = vrot.slane %v6737_v24, %v7811_v37 }
 0x3a1   :  { %v3681_v12 = vsel %vm1982_vm5, %v3680_v56, %v3679_v41  ;;  %v3684_v29 = vrot.slane %v3609_v51, 1  ;;  %v1993_v52 = vsel %vm1984_vm6, %v1905_v5, %v1992_v10  ;;  %vm2013_vm8 = vcmask 64512  }
 0x3a2   :  { %v3683_v3 = vsel %vm1984_vm6, %v3682_v33, %v3681_v12  ;;  %v1994_v57 = vsel %vm1986_vm7, %v1909_v38, %v1993_v52  ;;  %v7819_v27 = vrot.slane %v7818_v40, 4  ;;  %v1949_v1 = vrot.slane %v6769_v17, %v7811_v37  ;;  %v7825_v38 = vld [vmem:[#allocation45_spill] sm:$0xff]  ;;  %v7828_v33 = vld [vmem:[#allocation111_spill] sm:$0xff] }
 0x3a3   :  { %v3685_v61 = vsel %vm1986_vm7, %v3684_v29, %v3683_v3  ;;  %v1945_v30 = vrot.slane %v1797_v60, %v7811_v37  ;;  %v2159_v24 = vadd.f32 %v2158_v39, %v7816_v42  ;;  %v6830_v58 = vadd.f32 %v2398_v63, %v6543_v45  ;;  %v7830_v29 = vld [vmem:[#allocation54_spill] sm:$0xff] }
 0x3a4   :  { %v2153_v13 = vadd.f32 %v7819_v27, %v7818_v40  ;;  %v3072_v26 = vrot.slane %v6756_v50, 2  ;;  %3720 = vadd.xlane.f32.xlu1 %v3685_v61  ;;  %v2165_v25 = vadd.f32 %v2164_v35, %v7817_v9  ;;  %v7821_v17 = vrot.slane %v7820_v43, 4  ;;  %v7833_v27 = vld [vmem:[#allocation39_spill] sm:$0xff] }
 0x3a5   :  { %v1979_v48 = vsel %vm1978_vm3, %v1861_v23, %v1977_v36  ;;  %v1995_v5 = vsel %vm1974_vm1, %v1917_v46, %v1913_v49  ;;  %v2017_v6 = vsel %vm2013_vm8, %v1994_v57, 0.0  ;;  %v6843_v45 = vsel %vm1974_vm1, %v1949_v1, %v1945_v30  ;;  %v7824_v36 = vld [vmem:[#allocation14_spill] sm:$0xff]  ;;  %v7832_v57 = vld [vmem:[#allocation5_spill] sm:$0xff]  ;;  %v7835_v30 = vld [vmem:[#allocation55_spill] sm:$0xff] }
 0x3a6   :  { %v2357_v21 = vadd.f32 %v4290_v22, %v7821_v17  ;;  %v1981_v63 = vsel %vm1980_vm4, %v1865_v31, %v1979_v48  ;;  %v1873_v28 = vrot.slane %v7822_v18, %v7811_v37  ;;  %v1921_v19 = vrot.slane %v6720_v11, %v7811_v37 }
 0x3a7   :  { %v2154_v8 = vrot.slane %v2153_v13, 2  ;;  %v2404_v2 = vrot.slane %v7823_v16, 4  ;;  %v6854_v23 = vadd.f32 %v3076_v4, %v6584_v20  ;;  %v1869_v15 = vrot.slane %v7824_v36, %v7811_v37 }
 0x3a8   :  { %v2160_v32 = vrot.slane %v2159_v24, 2  ;;  %v1996_v31 = vsel %vm1976_vm2, %v1921_v19, %v1995_v5  ;;  %v1929_v47 = vrot.slane %v6778_v62, %v7811_v37  ;;  %2018 = vadd.xlane.f32.xlu1 %v2017_v6  ;;  %v2166_v54 = vrot.slane %v2165_v25, 2 }
 0x3a9   :  { %v2358_v11 = vrot.slane %v2357_v21, 2  ;;  %v1925_v34 = vrot.slane %v6706_v7, %v7811_v37  ;;  %v1983_v0 = vsel %vm1982_vm5, %v1869_v15, %v1981_v63  ;;  %v7826_v20 = vrot.slane %v7825_v38, 2  ;;  %v7827_v7 = vld [vmem:[#allocation38_spill] sm:$0xff] }
 0x3aa   :  { %v2433_v51 = vmul.f32 %v4290_v22, %v7817_v9  ;;  %v6869_v56 = vadd.f32 %v3072_v26, %v6756_v50  ;;  %v1933_v62 = vrot.slane %v6744_v59, %v7811_v37  ;;  %v1985_v14 = vsel %vm1984_vm6, %v1873_v28, %v1983_v0  ;;  %v7838_v63 = vld [vmem:[#allocation22_spill] sm:$0xff] }
 0x3ab   :  { %v2149_v4 = vadd.f32 %v7826_v20, %v7825_v38  ;;  %v2155_v49 = vadd.f32 %v2154_v8, %v2153_v13  ;;  %v1997_v42 = vsel %vm1978_vm3, %v1925_v34, %v1996_v31  ;;  %v2144_v39 = vrot.slane %v7827_v7, 1  ;;  %v7840_v31 = vld [vmem:[#allocation46_spill] sm:$0xff] }
 0x3ac   :  { %v2161_v41 = vadd.f32 %v2160_v32, %v2159_v24  ;;  %v7829_v10 = vrot.slane %v7828_v33, 2  ;;  %v1998_v9 = vsel %vm1980_vm4, %v1929_v47, %v1997_v42  ;;  %v2167_v12 = vadd.f32 %v2166_v54, %v2165_v25  ;;  %v7841_v0 = vld [vmem:[#allocation50_spill] sm:$0xff] }
 0x3ad   :  { %v2359_v50 = vadd.f32 %v2358_v11, %v2357_v21  ;;  %v7831_v46 = vrot.slane %v7830_v29, 4  ;;  %v1937_v52 = vrot.slane %v6800_v53, %v7811_v37  ;;  %v2150_v3 = vrot.slane %v2149_v4, 1  ;;  %v7837_v53 = vld [vmem:[#allocation104_spill] sm:$0xff] }
 0x3ae   :  { %v2353_v35 = vadd.f32 %v7829_v10, %v7828_v33  ;;  %v2574_v60 = vrot.slane %v7832_v57, 4  ;;  %v2580_v40 = vrot.slane %v2433_v51, 4  ;;  %v7834_v13 = vrot.slane %v7833_v27, 1 }
 0x3af   :  { %v2805_v59 = vadd.f32 %v7831_v46, %v7830_v29  ;;  %v2156_v1 = vrot.slane %v2155_v49, 1  ;;  %v7836_v24 = vrot.slane %v7835_v30, 2  ;;  %v6895_v22 = vadd.f32 %v2144_v39, %v7827_v7  ;;  %v7843_v39 = vld [vmem:[#allocation48_spill] sm:$0xff]  ;;  %v7845_v46 = vld [vmem:[#allocation2_spill] sm:$0xff] }
 0x3b0   :  { %v6889_v61 = vadd.f32 %v7834_v13, %v7833_v27  ;;  %v2162_v43 = vrot.slane %v2161_v41, 1  ;;  %v2348_v17 = vrot.slane %v7837_v53, 1  ;;  %v2354_v21 = vrot.slane %v2353_v35, 1 }
 0x3b1   :  { %v2801_v26 = vadd.f32 %v7836_v24, %v7835_v30  ;;  %v2806_v25 = vrot.slane %v2805_v59, 2  ;;  %v1999_v48 = vsel %vm1982_vm5, %v1933_v62, %v1998_v9  ;;  %v2168_v5 = vrot.slane %v2167_v12, 1 }
 0x3b2   :  { %v2360_v6 = vrot.slane %v2359_v50, 1  ;;  %v7839_v18 = vrot.slane %v7838_v63, 4  ;;  %v6905_v19 = vsel %vm1984_vm6, %v1937_v52, %v1999_v48  ;;  %v6907_v8 = vadd.f32 %v2150_v3, %v2149_v4 }
 0x3b3   :  { %v6910_v36 = vadd.f32 %v2574_v60, %v7832_v57  ;;  %v6912_v15 = vadd.f32 %v2580_v40, %v2433_v51  ;;  %v6914_v32 = vadd.f32 %v2156_v1, %v2155_v49  ;;  %v2796_v47 = vrot.slane %v7840_v31, 1  ;;  %v1763_v51 = vpop.xlane.xlu0 %1762  ;;  %v7848_v40 = vld [vmem:[#allocation28_spill] sm:$0xff] }
 0x3b4   :  { %v6902_v28 = vadd.f32 %v7839_v18, %v7838_v63  ;;  %v2802_v54 = vrot.slane %v2801_v26, 1  ;;  %v2807_v11 = vadd.f32 %v2806_v25, %v2805_v59  ;;  %v6917_v34 = vadd.f32 %v2162_v43, %v2161_v41  ;;  %v7849_v18 = vld [vmem:[#allocation44_spill] sm:$0xff] }
 0x3b5   :  { %v7842_v38 = vrot.slane %v7841_v0, 1  ;;  %v6925_v4 = vadd.f32 %v2348_v17, %v7837_v53  ;;  %v6927_v62 = vadd.f32 %v2354_v21, %v2353_v35  ;;  %v6929_v42 = vadd.f32 %v2168_v5, %v2167_v12 }
 0x3b6   :  { %v6931_v49 = vadd.f32 %v2360_v6, %v2359_v50  ;;  %v2570_v7 = vrot.slane %v6902_v28, 2  ;;  %v7844_v41 = vrot.slane %v7843_v39, 1  ;;  %v1877_v10 = vrot.slane %v1763_v51, %v7811_v37  ;;  %v7846_v50 = vld [vmem:[#allocation113_spill] sm:$0xff] }
 0x3b7   :  { %v6922_v20 = vadd.f32 %v7842_v38, %v7841_v0  ;;  %v2576_v9 = vrot.slane %v6910_v36, 2  ;;  %v2582_v29 = vrot.slane %v6912_v15, 2  ;;  %v3032_v35 = vrot.slane %v7845_v46, 1  ;;  %v7851_v51 = vld [vmem:[#allocation93_spill] sm:$0xff] }
 0x3b8   :  { %v2791_v33 = vadd.f32 %v7844_v41, %v7843_v39  ;;  %v2797_v59 = vadd.f32 %v2796_v47, %v7840_v31  ;;  %v2803_v12 = vadd.f32 %v2802_v54, %v2801_v26  ;;  %v2808_v52 = vrot.slane %v2807_v11, 1  ;;  %v7850_v47 = vld [vmem:[#allocation43_spill] sm:$0xff] }
 0x3b9   :  { %v7847_v3 = vrot.slane %v7846_v50, 1  ;;  %v1987_v60 = vsel %vm1986_vm7, %v1877_v10, %v1985_v14  ;;  %v3130_v27 = vmul.f32 0.125, %v7848_v40  ;;  %v3196_v13 = vmul.f32 %v6889_v61, %v6889_v61 }
 0x3ba   :  { %v3197_v1 = vmul.f32 %v6895_v22, %v6895_v22  ;;  %v2014_v30 = vsel %vm2013_vm8, %v1987_v60, 0.0  ;;  %v3198_v24 = vmul.f32 %v6907_v8, %v6907_v8  ;;  %v3199_v26 = vmul.f32 %v6914_v32, %v6914_v32 }
 0x3bb   :  { %v3027_v57 = vadd.f32 %v7847_v3, %v7846_v50  ;;  %v3200_v25 = vmul.f32 %v6917_v34, %v6917_v34  ;;  %2015 = vadd.xlane.f32.xlu0 %v2014_v30  ;;  %v3033_v14 = vadd.f32 %v3032_v35, %v7845_v46  ;;  %v3201_v43 = vmul.f32 %v6929_v42, %v6929_v42 }
 0x3bc   :  { %v3228_v53 = vmul.f32 0.125, %v3196_v13  ;;  %v3229_v17 = vmul.f32 0.125, %v3197_v1  ;;  %v3230_v21 = vmul.f32 0.125, %v3198_v24  ;;  %v3231_v48 = vmul.f32 0.125, %v3199_v26  ;;  %v7852_v13 = vld [vmem:[#allocation103_spill] sm:$0xff]  ;;  %v7853_v1 = vld [vmem:[#allocation102_spill] sm:$0xff] }
 0x3bd   :  { %v3232_v5 = vmul.f32 0.125, %v3200_v25  ;;  %v3294_v6 = vmul.f32 %v6922_v20, %v6922_v20  ;;  %v3233_v63 = vmul.f32 0.125, %v3201_v43  ;;  %v3295_v0 = vmul.f32 %v6925_v4, %v6925_v4  ;;  %v7855_v26 = vld [vmem:[#allocation49_spill] sm:$0xff]  ;;  %v7858_v43 = vld [vmem:[#allocation110_spill] sm:$0xff] }
 0x3be   :  { %v3260_v31 = vsub.f32 %v7849_v18, %v3228_v53  ;;  %v3261_v54 = vsub.f32 %v7850_v47, %v3229_v17  ;;  %v2809_v38 = vadd.f32 %v2808_v52, %v2807_v11  ;;  %v3162_v39 = vsub.f32 %v7851_v51, %v3130_v27  ;;  %v7856_v11 = vld [vmem:[#allocation97_spill] sm:$0xff]  ;;  %v1795_v47 = vpop.xlane.xlu0 %1794 }
 0x3bf   :  { %v3262_v41 = vsub.f32 %v2791_v33, %v3230_v21  ;;  %v3296_v10 = vmul.f32 %v6927_v62, %v6927_v62  ;;  %v3263_v46 = vsub.f32 %v2797_v59, %v3231_v48  ;;  %v3297_v35 = vmul.f32 %v6931_v49, %v6931_v49  ;;  %v7859_v59 = vld [vmem:[#allocation105_spill] sm:$0xff]  ;;  %v7860_v21 = vld [vmem:[#allocation51_spill] sm:$0xff] }
 0x3c0   :  { %v3326_v50 = vmul.f32 0.125, %v3294_v6  ;;  %v3327_v3 = vmul.f32 0.125, %v3295_v0  ;;  %v3264_v60 = vsub.f32 %v2803_v12, %v3232_v5  ;;  %v7854_v30 = vsub.f32 %v7852_v13, %v7853_v1  ;;  %v7861_v48 = vld [vmem:[#allocation41_spill] sm:$0xff] }
 0x3c1   :  { %v3328_v40 = vmul.f32 0.125, %v3296_v10  ;;  %v7857_v52 = vsub.f32 %v7855_v26, %v7856_v11  ;;  %v3265_v33 = vsub.f32 %v2809_v38, %v3233_v63  ;;  %v3329_v25 = vmul.f32 0.125, %v3297_v35  ;;  %v7862_v38 = vld [vmem:[#allocation40_spill] sm:$0xff]  ;;  %v7863_v1 = vld [vmem:[#allocation109_spill] sm:$0xff] }
 0x3c2   :  { %v3388_v24 = vmul.f32 %v7854_v30, %v3260_v31  ;;  %v3358_v53 = vsub.f32 %v7858_v43, %v3326_v50  ;;  %v3359_v17 = vsub.f32 %v7859_v59, %v3327_v3  ;;  %v3163_v6 = vsub.f32 %v7861_v48, %v7860_v21  ;;  %v6985_v31 = vld [vmem:[%s7258_s7 + $0x10] sm:$0xff]  ;;  %v7866_v59 = vld [vmem:[#allocation99_spill] sm:$0xff] }
 0x3c3   :  { %v3389_v27 = vmul.f32 %v7857_v52, %v3261_v54  ;;  %v3360_v18 = vsub.f32 %v3027_v57, %v3328_v40  ;;  %v3361_v0 = vsub.f32 %v3033_v14, %v3329_v25  ;;  %v3514_v51 = vmul.f32 %v7862_v38, %v3162_v39  ;;  %v7864_v52 = vld [vmem:[#allocation108_spill] sm:$0xff] }
 0x3c4   :  { %v3420_v12 = vmax.f32 %v3388_v24, 0.0  ;;  %v3390_v54 = vmul.f32 %v3358_v53, %v3262_v41  ;;  %v3391_v63 = vmul.f32 %v3359_v17, %v3263_v46  ;;  %v1941_v10 = vrot.slane %v1795_v47, %v7811_v37 }
 0x3c5   :  { %v3421_v5 = vmax.f32 %v3389_v27, 0.0  ;;  %v3392_v35 = vmul.f32 %v3360_v18, %v3264_v60  ;;  %v3393_v13 = vmul.f32 %v3361_v0, %v3265_v33  ;;  %v3515_v30 = vmul.f32 %v7863_v1, %v3163_v6  ;;  %v7867_v18 = vld [vmem:[#allocation95_spill] sm:$0xff] }
 0x3c6   :  { %v3452_v50 = vadd.f32 1e-08, %v3420_v12  ;;  %v3422_v57 = vmax.f32 %v3390_v54, 0.0  ;;  %v3423_v40 = vmax.f32 %v3391_v63, 0.0  ;;  %v2001_v24 = vsel %vm1986_vm7, %v1941_v10, %v6905_v19 }
 0x3c7   :  { %v3453_v3 = vadd.f32 1e-08, %v3421_v5  ;;  %v3424_v26 = vmax.f32 %v3392_v35, 0.0  ;;  %v3548_v14 = vrot.slane %v6985_v31, 1  ;;  %v2020_v41 = vsel %vm2013_vm8, %v2001_v24, 0.0 }
 0x3c8   :  { %4265 = vrsqrt.f32 %v3452_v50  ;;  %v3425_v39 = vmax.f32 %v3393_v13, 0.0  ;;  %v3454_v46 = vadd.f32 1e-08, %v3422_v57  ;;  %v3455_v11 = vadd.f32 1e-08, %v3423_v40  ;;  %2021 = vadd.xlane.f32.xlu0 %v2020_v41 }
 0x3c9   :  { %v3078_v60 = vrot.slane %v6854_v23, 2  ;;  %v7865_v27 = vrot.slane %v7864_v52, 2  ;;  %v3456_v25 = vadd.f32 1e-08, %v3424_v26  ;;  %4267 = vrsqrt.f32 %v3453_v3 }
 0x3ca   :  { %v2571_v19 = vadd.f32 %v2570_v7, %v6902_v28  ;;  %v2577_v43 = vadd.f32 %v2576_v9, %v6910_v36  ;;  %v3457_v53 = vadd.f32 1e-08, %v3425_v39  ;;  %4269 = vrsqrt.f32 %v3454_v46  ;;  %v7868_v36 = vld [vmem:[#allocation98_spill] sm:$0xff] }
 0x3cb   :  { %v2565_v33 = vadd.f32 %v7865_v27, %v7864_v52  ;;  %v3100_v17 = vmul.f32 %v7866_v59, %v6889_v61  ;;  %4271 = vrsqrt.f32 %v3455_v11  ;;  %v3610_v21 = vmul.f32 %v3514_v51, %v6985_v31  ;;  %v7869_v51 = vld [vmem:[#allocation101_spill] sm:$0xff] }
 0x3cc   :  { %v3611_v48 = vmul.f32 %v3548_v14, %v3515_v30  ;;  %v2583_v6 = vadd.f32 %v2582_v29, %v6912_v15  ;;  %v3101_v28 = vmul.f32 %v7867_v18, %v6895_v22  ;;  %v3102_v7 = vmul.f32 %v6922_v20, %v6907_v8 }
 0x3cd   :  { %4273 = vrsqrt.f32 %v3456_v25  ;;  %v2560_v9 = vrot.slane %v7868_v36, 1  ;;  %v3103_v61 = vmul.f32 %v6925_v4, %v6914_v32  ;;  %v2400_v5 = vrot.slane %v6830_v58, 2 }
 0x3ce   :  { %4275 = vrsqrt.f32 %v3457_v53  ;;  %v3686_v12 = vrot.slane %v3611_v48, 7  ;;  %v3074_v47 = vrot.slane %v6869_v56, 1  ;;  %v2566_v0 = vrot.slane %v2565_v33, 1 }
 0x3cf   :  { %v3104_v15 = vmul.f32 %v6927_v62, %v6917_v34  ;;  %v2572_v22 = vrot.slane %v2571_v19, 1  ;;  %v3105_v8 = vmul.f32 %v6931_v49, %v6929_v42  ;;  %v3132_v20 = vmul.f32 0.125, %v3100_v17  ;;  %v7871_v49 = vld [vmem:[#allocation60_spill] sm:$0xff]  ;;  %v7041_v17 = vpop.xlane.xlu1 %1802 }
 0x3d0   :  { %v3687_v29 = vsel %vm1974_vm1, %v3686_v12, %v3610_v21  ;;  %v2578_v54 = vrot.slane %v2577_v43, 1  ;;  %v2584_v63 = vrot.slane %v2583_v6, 1  ;;  %v3133_v32 = vmul.f32 0.125, %v3101_v28 }
 0x3d1   :  { %v3134_v4 = vmul.f32 0.125, %v3102_v7  ;;  %v7025_v38 = vadd.f32 %v3078_v60, %v6854_v23  ;;  %v7870_v10 = vrot.slane %v7869_v51, 1  ;;  %v2561_v34 = vadd.f32 %v2560_v9, %v7868_v36  ;;  %v7872_v60 = vld [vmem:[#allocation56_spill] sm:$0xff] }
 0x3d2   :  { %v3135_v62 = vmul.f32 0.125, %v3103_v61  ;;  %v2567_v50 = vadd.f32 %v2566_v0, %v2565_v33  ;;  %v3136_v3 = vmul.f32 0.125, %v3104_v15  ;;  %v2206_v42 = vrot.slane %v7743_v44, 4 }
 0x3d3   :  { %v2555_v35 = vadd.f32 %v7870_v10, %v7869_v51  ;;  %v2212_v13 = vrot.slane %v7871_v49, 4  ;;  %v2573_v57 = vadd.f32 %v2572_v22, %v2571_v19  ;;  %v3137_v40 = vmul.f32 0.125, %v3105_v8 }
 0x3d4   :  { %v3549_v30 = vrot.slane %v6985_v31, 2  ;;  %v2579_v24 = vadd.f32 %v2578_v54, %v2577_v43  ;;  %v2585_v26 = vadd.f32 %v2584_v63, %v2583_v6  ;;  %v3165_v14 = vsub.f32 %v2561_v34, %v3133_v32 }
 0x3d5   :  { %v3164_v1 = vsub.f32 %v2555_v35, %v3132_v20  ;;  %v4266_v23 = vpop.eup %4265  ;;  %v3166_v41 = vsub.f32 %v2567_v50, %v3134_v4  ;;  %v3167_v39 = vsub.f32 %v2573_v57, %v3135_v62  ;;  %v3550_v11 = vrot.slane %v6985_v31, 3  ;;  %v7874_v62 = vld [vmem:[#allocation57_spill] sm:$0xff]  ;;  %v7875_v57 = vld [vmem:[#allocation63_spill] sm:$0xff] }
 0x3d6   :  { %v7873_v52 = vrot.slane %v7872_v60, 4  ;;  %v4268_v33 = vpop.eup %4267  ;;  %v3168_v25 = vsub.f32 %v2579_v24, %v3136_v3  ;;  %v3551_v19 = vrot.slane %v6985_v31, 4  ;;  %v2207_v53 = vadd.f32 %v2206_v42, %v7743_v44 }
 0x3d7   :  { %v3516_v46 = vmul.f32 %v4266_v23, %v3164_v1  ;;  %v2213_v59 = vadd.f32 %v2212_v13, %v7871_v49  ;;  %v4270_v43 = vpop.eup %4269  ;;  %v3169_v21 = vsub.f32 %v2585_v26, %v3137_v40  ;;  %v3517_v48 = vmul.f32 %v4268_v33, %v3165_v14  ;;  %v7877_v33 = vld [vmem:[#allocation58_spill] sm:$0xff] }
 0x3d8   :  { %v2201_v27 = vadd.f32 %v7873_v52, %v7872_v60  ;;  %v3552_v6 = vrot.slane %v6985_v31, 5  ;;  %v4272_v28 = vpop.eup %4271  ;;  %v3518_v7 = vmul.f32 %v4270_v43, %v3166_v41  ;;  %v3553_v36 = vrot.slane %v6985_v31, 6 }
 0x3d9   :  { %v3612_v18 = vmul.f32 %v3549_v30, %v3516_v46  ;;  %v3554_v9 = vrot.slane %v6985_v31, 7  ;;  %v2405_v44 = vadd.f32 %v2404_v2, %v7823_v16  ;;  %v3519_v12 = vmul.f32 %v4272_v28, %v3167_v39  ;;  %v7051_v2 = vpop.xlane.xlu1 %1800 }
 0x3da   :  { %v4274_v61 = vpop.eup %4273  ;;  %v3613_v0 = vmul.f32 %v3550_v11, %v3517_v48  ;;  %v2202_v22 = vrot.slane %v2201_v27, 2  ;;  %v3614_v54 = vmul.f32 %v3551_v19, %v3518_v7  ;;  %v2208_v63 = vrot.slane %v2207_v53, 2 }
 0x3db   :  { %v3688_v15 = vrot.slane %v3612_v18, 6  ;;  %v4276_v8 = vpop.eup %4275  ;;  %v3520_v20 = vmul.f32 %v4274_v61, %v3168_v25  ;;  %v2214_v32 = vrot.slane %v2213_v59, 2  ;;  %v3615_v51 = vmul.f32 %v3552_v6, %v3519_v12  ;;  %v7883_v18 = vld [vmem:[#allocation126_spill] sm:$0xff]  ;;  %v7884_v12 = vld [vmem:[#allocation4_spill] sm:$0xff] }
 0x3dc   :  { %v3521_v4 = vmul.f32 %v4276_v8, %v3169_v21  ;;  %v3690_v35 = vrot.slane %v3613_v0, 5  ;;  %v3692_v34 = vrot.slane %v3614_v54, 4  ;;  %v2192_v50 = vrot.slane %v7874_v62, 1  ;;  %v4291_v8 = vld [vmem:[%s7257_s5 + $0xf8] sm:$0xff] }
 0x3dd   :  { %v3689_v10 = vsel %vm1976_vm2, %v3688_v15, %v3687_v29  ;;  %v3616_v31 = vmul.f32 %v3553_v36, %v3520_v20  ;;  %v2406_v16 = vrot.slane %v2405_v44, 2  ;;  %v3694_v13 = vrot.slane %v3615_v51, 3 }
 0x3de   :  { %v3617_v3 = vmul.f32 %v3554_v9, %v3521_v4  ;;  %v3691_v42 = vsel %vm1978_vm3, %v3690_v35, %v3689_v10  ;;  %v7876_v40 = vrot.slane %v7875_v57, 2  ;;  %v2203_v29 = vadd.f32 %v2202_v22, %v2201_v27 }
 0x3df   :  { %v3693_v30 = vsel %vm1980_vm4, %v3692_v34, %v3691_v42  ;;  %v3696_v23 = vrot.slane %v3616_v31, 2  ;;  %v2401_v24 = vadd.f32 %v2400_v5, %v6830_v58  ;;  %v2209_v41 = vadd.f32 %v2208_v63, %v2207_v53  ;;  %v7879_v5 = vld [vmem:[#allocation69_spill] sm:$0xff]  ;;  %v7886_v63 = vld [vmem:[#allocation66_spill] sm:$0xff] }
 0x3e0   :  { %v2197_v1 = vadd.f32 %v7876_v40, %v7875_v57  ;;  %v3695_v26 = vsel %vm1982_vm5, %v3694_v13, %v3693_v30  ;;  %v3698_v14 = vrot.slane %v3617_v3, 1  ;;  %v2215_v39 = vadd.f32 %v2214_v32, %v2213_v59  ;;  %v7881_v59 = vld [vmem:[#allocation62_spill] sm:$0xff]  ;;  %v7889_v30 = vld [vmem:[#allocation64_spill] sm:$0xff] }
 0x3e1   :  { %v1957_v46 = vrot.slane %v7041_v17, %v7811_v37  ;;  %v1953_v11 = vrot.slane %v7051_v2, %v7811_v37  ;;  %v3697_v60 = vsel %vm1984_vm6, %v3696_v23, %v3695_v26  ;;  %v2407_v52 = vadd.f32 %v2406_v16, %v2405_v44  ;;  %v7887_v16 = vld [vmem:[#allocation123_spill] sm:$0xff] }
 0x3e2   :  { %v3699_v27 = vsel %vm1986_vm7, %v3698_v14, %v3697_v60  ;;  %v7878_v25 = vrot.slane %v7877_v33, 1  ;;  %v7880_v19 = vrot.slane %v7879_v5, 2  ;;  %v7882_v43 = vrot.slane %v7881_v59, 4  ;;  %v7891_v60 = vld [vmem:[#allocation119_spill] sm:$0xff] }
 0x3e3   :  { %3722 = vadd.xlane.f32.xlu0 %v3699_v27  ;;  %v2198_v48 = vrot.slane %v2197_v1, 1  ;;  %v2204_v6 = vrot.slane %v2203_v29, 1  ;;  %v2396_v28 = vrot.slane %v7883_v18, 1  ;;  %v2402_v7 = vrot.slane %v2401_v24, 1 }
 0x3e4   :  { %v7071_v58 = vadd.f32 %v7878_v25, %v7877_v33  ;;  %v2849_v53 = vadd.f32 %v7880_v19, %v7879_v5  ;;  %v2853_v21 = vadd.f32 %v7882_v43, %v7881_v59  ;;  %v7081_v36 = vadd.f32 %v2192_v50, %v7874_v62 }
 0x3e5   :  { %v2210_v9 = vrot.slane %v2209_v41, 1  ;;  %v2216_v44 = vrot.slane %v2215_v39, 1  ;;  %v7885_v0 = vrot.slane %v7884_v12, 1  ;;  %v2408_v22 = vrot.slane %v2407_v52, 1 }
 0x3e6   :  { %v2854_v61 = vrot.slane %v2853_v21, 2  ;;  %v2441_v20 = vmul.f32 %v4291_v8, %v7871_v49  ;;  %v2622_v54 = vrot.slane %v6742_v55, 4  ;;  %v2844_v32 = vrot.slane %v7886_v63, 1 }
 0x3e7   :  { %v7086_v15 = vadd.f32 %v7885_v0, %v7884_v12  ;;  %v2850_v4 = vrot.slane %v2849_v53, 1  ;;  %v3080_v10 = vrot.slane %v7025_v38, 1  ;;  %v7095_v35 = vadd.f32 %v2198_v48, %v2197_v1 }
 0x3e8   :  { %v2855_v51 = vadd.f32 %v2854_v61, %v2853_v21  ;;  %v7097_v31 = vadd.f32 %v2204_v6, %v2203_v29  ;;  %v7100_v34 = vadd.f32 %v2396_v28, %v7883_v18  ;;  %v7102_v62 = vadd.f32 %v2402_v7, %v2401_v24  ;;  %v7143_v6 = vpop.xlane.xlu1 %1806  ;;  %v7892_v18 = vld [vmem:[#allocation61_spill] sm:$0xff]  ;;  %v7893_v7 = vld [vmem:[#allocation59_spill] sm:$0xff] }
 0x3e9   :  { %v7104_v50 = vadd.f32 %v2210_v9, %v2209_v41  ;;  %v7106_v49 = vadd.f32 %v2216_v44, %v2215_v39  ;;  %v7888_v3 = vrot.slane %v7887_v16, 4  ;;  %v7113_v57 = vadd.f32 %v2408_v22, %v2407_v52 }
 0x3ea   :  { %v2856_v13 = vrot.slane %v2855_v51, 1  ;;  %v7116_v40 = vadd.f32 %v2622_v54, %v6742_v55  ;;  %v2628_v1 = vrot.slane %v2441_v20, 4  ;;  %v7890_v23 = vrot.slane %v7889_v30, 1 }
 0x3eb   :  { %v7111_v42 = vadd.f32 %v7888_v3, %v7887_v16  ;;  %v2845_v24 = vadd.f32 %v2844_v32, %v7886_v63  ;;  %v2851_v26 = vadd.f32 %v2850_v4, %v2849_v53  ;;  %v3075_v14 = vadd.f32 %v3074_v47, %v6869_v56  ;;  %v7895_v3 = vld [vmem:[#allocation124_spill] sm:$0xff] }
 0x3ec   :  { %v2839_v29 = vadd.f32 %v7890_v23, %v7889_v30  ;;  %v3081_v41 = vadd.f32 %v3080_v10, %v7025_v38  ;;  %v2857_v39 = vadd.f32 %v2856_v13, %v2855_v51  ;;  %v3138_v52 = vmul.f32 0.125, %v7891_v60  ;;  %v7894_v10 = vld [vmem:[#allocation120_spill] sm:$0xff]  ;;  %v7896_v13 = vld [vmem:[#allocation125_spill] sm:$0xff]  ;;  %v7898_v60 = vld [vmem:[#allocation114_spill] sm:$0xff] }
 0x3ed   :  { %v3204_v55 = vmul.f32 %v7071_v58, %v7071_v58  ;;  %v3205_v27 = vmul.f32 %v7081_v36, %v7081_v36  ;;  %v3206_v33 = vmul.f32 %v7095_v35, %v7095_v35  ;;  %v3207_v25 = vmul.f32 %v7097_v31, %v7097_v31 }
 0x3ee   :  { %v3208_v56 = vmul.f32 %v7104_v50, %v7104_v50  ;;  %v3209_v47 = vmul.f32 %v7106_v49, %v7106_v49  ;;  %v3302_v19 = vmul.f32 %v7086_v15, %v7086_v15  ;;  %v3303_v53 = vmul.f32 %v7100_v34, %v7100_v34 }
 0x3ef   :  { %v3236_v38 = vmul.f32 0.125, %v3204_v55  ;;  %v3237_v5 = vmul.f32 0.125, %v3205_v27  ;;  %v3238_v59 = vmul.f32 0.125, %v3206_v33  ;;  %v3239_v43 = vmul.f32 0.125, %v3207_v25  ;;  %v7899_v55 = vld [vmem:[#allocation115_spill] sm:$0xff] }
 0x3f0   :  { %v3240_v21 = vmul.f32 0.125, %v3208_v56  ;;  %v3241_v48 = vmul.f32 0.125, %v3209_v47  ;;  %v3304_v44 = vmul.f32 %v7102_v62, %v7102_v62  ;;  %v3305_v61 = vmul.f32 %v7113_v57, %v7113_v57  ;;  %v7904_v56 = vld [vmem:[#allocation106_spill] sm:$0xff] }
 0x3f1   :  { %v3268_v28 = vsub.f32 %v7892_v18, %v3236_v38  ;;  %v3269_v9 = vsub.f32 %v7893_v7, %v3237_v5  ;;  %v3270_v12 = vsub.f32 %v2839_v29, %v3238_v59  ;;  %v3271_v0 = vsub.f32 %v2845_v24, %v3239_v43  ;;  %v7161_v29 = vld [vmem:[%s7258_s7 + $0x18] sm:$0xff]  ;;  %v1805_v59 = vpop.xlane.xlu1 %1804 }
 0x3f2   :  { %v3272_v22 = vsub.f32 %v2851_v26, %v3240_v21  ;;  %v3273_v8 = vsub.f32 %v2857_v39, %v3241_v48  ;;  %v3334_v54 = vmul.f32 0.125, %v3302_v19  ;;  %v3335_v63 = vmul.f32 0.125, %v3303_v53  ;;  %v7901_v24 = vld [vmem:[#allocation9_spill] sm:$0xff]  ;;  %v7902_v39 = vld [vmem:[#allocation8_spill] sm:$0xff]  ;;  %v7905_v19 = vld [vmem:[#allocation7_spill] sm:$0xff] }
 0x3f3   :  { %v3336_v32 = vmul.f32 0.125, %v3304_v44  ;;  %v3337_v4 = vmul.f32 0.125, %v3305_v61  ;;  %v2629_v51 = vadd.f32 %v2628_v1, %v2441_v20  ;;  %v3170_v16 = vsub.f32 %v7894_v10, %v3138_v52  ;;  %v7903_v52 = vld [vmem:[#allocation107_spill] sm:$0xff]  ;;  %v3719_v2 = vpop.xlane.xlu0 %3718 }
 0x3f4   :  { %v7897_v30 = vsub.f32 %v7895_v3, %v7896_v13  ;;  %v7900_v27 = vsub.f32 %v7898_v60, %v7899_v55  ;;  %v3366_v26 = vsub.f32 %v7901_v24, %v3334_v54  ;;  %v3367_v25 = vsub.f32 %v7902_v39, %v3335_v63  ;;  %3730 = vst [vmem:[%s7259_s9] sm:$0xff] %v3719_v2 }
 0x3f5   :  { %v3368_v20 = vsub.f32 %v3075_v14, %v3336_v32  ;;  %v3369_v1 = vsub.f32 %v3081_v41, %v3337_v4  ;;  %v3171_v47 = vsub.f32 %v7904_v56, %v7903_v52  ;;  %v3522_v53 = vmul.f32 %v7905_v19, %v3170_v16 }
 0x3f6   :  { %v3396_v23 = vmul.f32 %v7897_v30, %v3268_v28  ;;  %v3397_v33 = vmul.f32 %v7900_v27, %v3269_v9  ;;  %v3398_v43 = vmul.f32 %v3366_v26, %v3270_v12  ;;  %v3399_v21 = vmul.f32 %v3367_v25, %v3271_v0  ;;  %v7906_v9 = vld [vmem:[#allocation116_spill] sm:$0xff]  ;;  %v7907_v0 = vld [vmem:[#allocation127_spill] sm:$0xff]  ;;  %v7909_v27 = vld [vmem:[#allocation121_spill] sm:$0xff] }
 0x3f7   :  { %v3400_v48 = vmul.f32 %v3368_v20, %v3272_v22  ;;  %v3401_v18 = vmul.f32 %v3369_v1, %v3273_v8  ;;  %v3523_v44 = vmul.f32 %v7906_v9, %v3171_v47  ;;  %v3555_v61 = vrot.slane %v7161_v29, 1  ;;  %v7910_v26 = vld [vmem:[#allocation117_spill] sm:$0xff]  ;;  %v7911_v25 = vld [vmem:[#allocation112_spill] sm:$0xff] }
 0x3f8   :  { %v3428_v38 = vmax.f32 %v3396_v23, 0.0  ;;  %v3429_v5 = vmax.f32 %v3397_v33, 0.0  ;;  %v3430_v14 = vmax.f32 %v3398_v43, 0.0  ;;  %v3431_v41 = vmax.f32 %v3399_v21, 0.0 }
 0x3f9   :  { %v3432_v54 = vmax.f32 %v3400_v48, 0.0  ;;  %v3433_v63 = vmax.f32 %v3401_v18, 0.0  ;;  %v2003_v32 = vsel %vm1976_vm2, %v1953_v11, %v6843_v45  ;;  %v1961_v12 = vrot.slane %v1805_v59, %v7811_v37  ;;  %v7912_v59 = vld [vmem:[#allocation118_spill] sm:$0xff] }
 0x3fa   :  { %v3460_v28 = vadd.f32 1e-08, %v3428_v38  ;;  %v3461_v7 = vadd.f32 1e-08, %v3429_v5  ;;  %v7908_v22 = vrot.slane %v7907_v0, 2  ;;  %v2618_v3 = vrot.slane %v7111_v42, 2 }
 0x3fb   :  { %v3462_v4 = vadd.f32 1e-08, %v3430_v14  ;;  %v3463_v10 = vadd.f32 1e-08, %v3431_v41  ;;  %v3464_v16 = vadd.f32 1e-08, %v3432_v54  ;;  %v3618_v30 = vmul.f32 %v3522_v53, %v7161_v29 }
 0x3fc   :  { %v2613_v8 = vadd.f32 %v7908_v22, %v7907_v0  ;;  %4277 = vrsqrt.f32 %v3460_v28  ;;  %v3465_v13 = vadd.f32 1e-08, %v3433_v63  ;;  %v3619_v23 = vmul.f32 %v3555_v61, %v3523_v44 }
 0x3fd   :  { %4279 = vrsqrt.f32 %v3461_v7  ;;  %v2004_v45 = vsel %vm1978_vm3, %v1957_v46, %v2003_v32  ;;  %v2624_v11 = vrot.slane %v7116_v40, 2  ;;  %v2630_v60 = vrot.slane %v2629_v51, 2  ;;  %v1809_v46 = vpop.xlane.xlu1 %1808 }
 0x3fe   :  { %4281 = vrsqrt.f32 %v3462_v4  ;;  %v1965_v55 = vrot.slane %v7143_v6, %v7811_v37  ;;  %v3108_v33 = vmul.f32 %v7909_v27, %v7071_v58  ;;  %v3700_v24 = vrot.slane %v3619_v23, 7 }
 0x3ff   :  { %4283 = vrsqrt.f32 %v3463_v10  ;;  %v2005_v17 = vsel %vm1980_vm4, %v1961_v12, %v2004_v45  ;;  %v2608_v39 = vrot.slane %v7910_v26, 1  ;;  %v3109_v20 = vmul.f32 %v7911_v25, %v7081_v36 }
 0x400   :  { %4285 = vrsqrt.f32 %v3464_v16  ;;  %v2614_v1 = vrot.slane %v2613_v8, 1  ;;  %v2619_v6 = vadd.f32 %v2618_v3, %v7111_v42  ;;  %v3701_v52 = vsel %vm1974_vm1, %v3700_v24, %v3618_v30 }
 0x401   :  { %4287 = vrsqrt.f32 %v3465_v13  ;;  %v1969_v56 = vrot.slane %v1809_v46, %v7811_v37  ;;  %v2625_v58 = vadd.f32 %v2624_v11, %v7116_v40  ;;  %v2631_v47 = vadd.f32 %v2630_v60, %v2629_v51  ;;  %v1811_v53 = vpop.xlane.xlu1 %1810 }
 0x402   :  { %v3110_v38 = vmul.f32 %v7086_v15, %v7095_v35  ;;  %v2006_v5 = vsel %vm1982_vm5, %v1965_v55, %v2005_v17  ;;  %v3111_v36 = vmul.f32 %v7100_v34, %v7097_v31  ;;  %v3140_v19 = vmul.f32 0.125, %v3108_v33 }
 0x403   :  { %v7913_v42 = vrot.slane %v7912_v59, 1  ;;  %v2609_v21 = vadd.f32 %v2608_v39, %v7910_v26  ;;  %v3112_v40 = vmul.f32 %v7102_v62, %v7104_v50  ;;  %v3141_v51 = vmul.f32 0.125, %v3109_v20 }
 0x404   :  { %v1973_v48 = vrot.slane %v1811_v53, %v7811_v37  ;;  %v2615_v15 = vadd.f32 %v2614_v1, %v2613_v8  ;;  %v2620_v35 = vrot.slane %v2619_v6, 1  ;;  %v3113_v18 = vmul.f32 %v7113_v57, %v7106_v49 }
 0x405   :  { %v2603_v43 = vadd.f32 %v7913_v42, %v7912_v59  ;;  %v2007_v31 = vsel %vm1984_vm6, %v1969_v56, %v2006_v5  ;;  %v2626_v34 = vrot.slane %v2625_v58, 1  ;;  %v2632_v28 = vrot.slane %v2631_v47, 1 }
 0x406   :  { %v3142_v7 = vmul.f32 0.125, %v3110_v38  ;;  %v2008_v9 = vsel %vm1986_vm7, %v1973_v48, %v2007_v31  ;;  %v3143_v44 = vmul.f32 0.125, %v3111_v36  ;;  %v3556_v14 = vrot.slane %v7161_v29, 2 }
 0x407   :  { %v3172_v61 = vsub.f32 %v2603_v43, %v3140_v19  ;;  %v2023_v50 = vsel %vm2013_vm8, %v2008_v9, 0.0  ;;  %v3144_v37 = vmul.f32 0.125, %v3112_v40  ;;  %v3173_v41 = vsub.f32 %v2609_v21, %v3141_v51 }
 0x408   :  { %v3557_v54 = vrot.slane %v7161_v29, 3  ;;  %2024 = vadd.xlane.f32.xlu1 %v2023_v50  ;;  %v2621_v49 = vadd.f32 %v2620_v35, %v2619_v6  ;;  %v3145_v57 = vmul.f32 0.125, %v3113_v18  ;;  %v2627_v12 = vadd.f32 %v2626_v34, %v2625_v58 }
 0x409   :  { %v4278_v62 = vpop.eup %4277  ;;  %v3174_v0 = vsub.f32 %v2615_v15, %v3142_v7  ;;  %v3558_v8 = vrot.slane %v7161_v29, 4  ;;  %v2633_v10 = vadd.f32 %v2632_v28, %v2631_v47  ;;  %v3559_v3 = vrot.slane %v7161_v29, 5 }
 0x40a   :  { %v4280_v63 = vpop.eup %4279  ;;  %v3524_v32 = vmul.f32 %v4278_v62, %v3172_v61  ;;  %v3175_v16 = vsub.f32 %v2621_v49, %v3143_v44  ;;  %v3176_v23 = vsub.f32 %v2627_v12, %v3144_v37  ;;  %v3560_v2 = vrot.slane %v7161_v29, 6 }
 0x40b   :  { %v3525_v22 = vmul.f32 %v4280_v63, %v3173_v41  ;;  %v4282_v4 = vpop.eup %4281  ;;  %v3177_v55 = vsub.f32 %v2633_v10, %v3145_v57  ;;  %v3561_v33 = vrot.slane %v7161_v29, 7 }
 0x40c   :  { %v3620_v13 = vmul.f32 %v3556_v14, %v3524_v32  ;;  %v4284_v30 = vpop.eup %4283  ;;  %v3526_v45 = vmul.f32 %v4282_v4, %v3174_v0 }
 0x40d   :  { %v3621_v11 = vmul.f32 %v3557_v54, %v3525_v22  ;;  %v4286_v60 = vpop.eup %4285  ;;  %v3527_v27 = vmul.f32 %v4284_v30, %v3175_v16 }
 0x40e   :  { %v3702_v24 = vrot.slane %v3620_v13, 6  ;;  %v4288_v17 = vpop.eup %4287  ;;  %v3528_v46 = vmul.f32 %v4286_v60, %v3176_v23  ;;  %v3622_v26 = vmul.f32 %v3558_v8, %v3526_v45 }
 0x40f   :  { %v3704_v39 = vrot.slane %v3621_v11, 5  ;;  %v3529_v25 = vmul.f32 %v4288_v17, %v3177_v55  ;;  %v3623_v20 = vmul.f32 %v3559_v3, %v3527_v27 }
 0x410   :  { %v3703_v1 = vsel %vm1976_vm2, %v3702_v24, %v3701_v52  ;;  %v3624_v6 = vmul.f32 %v3560_v2, %v3528_v46  ;;  %v3706_v58 = vrot.slane %v3622_v26, 4 }
 0x411   :  { %v3705_v56 = vsel %vm1978_vm3, %v3704_v39, %v3703_v1  ;;  %v3625_v47 = vmul.f32 %v3561_v33, %v3529_v25  ;;  %v3708_v38 = vrot.slane %v3623_v20, 3 }
 0x412   :  { %v3707_v5 = vsel %vm1980_vm4, %v3706_v58, %v3705_v56  ;;  %v3710_v36 = vrot.slane %v3624_v6, 2 }
 0x413   :  { %v3709_v29 = vsel %vm1982_vm5, %v3708_v38, %v3707_v5  ;;  %v3712_v19 = vrot.slane %v3625_v47, 1 }
 0x414   :  { %v3711_v53 = vsel %vm1984_vm6, %v3710_v36, %v3709_v29 }
 0x415   :  { %v3713_v59 = vsel %vm1986_vm7, %v3712_v19, %v3711_v53 }
 0x416   :  { %3724 = vadd.xlane.f32.xlu1 %v3713_v59 }
 0x42d   :  { %v3721_v42 = vpop.xlane.xlu1 %3720 }
 0x42e   :  { %3731 = vst [vmem:[%s7259_s9 + $0x8] sm:$0xff] %v3721_v42 }
 0x431   :  { %v2019_v52 = vpop.xlane.xlu1 %2018 }
 0x432   :  { %3727 = vst [vmem:[%s7260_s8 + $0x8] sm:$0xff] %v2019_v52 }
 0x444   :  { %v2016_v43 = vpop.xlane.xlu0 %2015 }
 0x445   :  { %3726 = vst [vmem:[%s7260_s8] sm:$0xff] %v2016_v43 }
 0x451   :  { %v2022_v21 = vpop.xlane.xlu0 %2021 }
 0x452   :  { %3728 = vst [vmem:[%s7260_s8 + $0x10] sm:$0xff] %v2022_v21 }
 0x46c   :  { %v3723_v40 = vpop.xlane.xlu0 %3722 }
 0x46d   :  { %3732 = vst [vmem:[%s7259_s9 + $0x10] sm:$0xff] %v3723_v40 }
 0x491   :  { %v2025_v51 = vpop.xlane.xlu1 %2024 }
 0x492   :  { %3729 = vst [vmem:[%s7260_s8 + $0x18] sm:$0xff] %v2025_v51 }
 0x49f   :  { %v3725_v48 = vpop.xlane.xlu1 %3724 }
 0x4a0   :  { %3733 = vst [vmem:[%s7259_s9 + $0x18] sm:$0xff] %v3725_v48 }

</bundles_post_ra>
